<compile_context>
chip_gen: v5e
topology: v5e:2x2
jax: 0.10.0
libtpu: 0.0.40
codegen_flags: <defaults>
</compile_context>

<pallas_src>
import numpy as np

import jax
import jax.numpy as jnp
from jax import lax
from jax.experimental import pallas as pl
from jax.experimental.pallas import tpu as pltpu


DP = 128                      # padded lane width for features / assignment columns
_MXU_DTYPE = jnp.bfloat16     # matmul operand dtype (accumulation is always f32)
_EXP_SCALE = 10.0             # LorentzLinear: scale param init log(10); exp(scale) = 10


def _round8(n):
    return max(8, ((int(n) + 7) // 8) * 8)


def _vspec():
    return pl.BlockSpec(memory_space=pltpu.MemorySpace.VMEM)


# ----------------------------------------------------------------------------
# In-kernel helpers.  All node-feature arrays are lane-padded to DP with zeros,
# so full-width reductions are exact and the zero padding is preserved by every op.
# ----------------------------------------------------------------------------
def _cols(shape):
    return lax.broadcasted_iota(jnp.int32, shape, len(shape) - 1)


def _time_col(x):
    """Per-row value of column 0 as (R, 1) via a masked lane reduce (no lane slicing)."""
    return jnp.sum(jnp.where(_cols(x.shape) == 0, x, 0.0), axis=-1, keepdims=True)


def _sigmoid(x):
    """Single-EUP-transcendental sigmoid: 0.5*(tanh(x/2)+1)."""
    return 0.5 * (jnp.tanh(0.5 * x) + 1.0)


def _mm(a, b):
    """MXU matmul: bf16 operands (weights are pre-cast), f32 accumulation."""
    return jnp.dot(a.astype(_MXU_DTYPE), b.astype(_MXU_DTYPE),
                   preferred_element_type=jnp.float32)


def _mm_t0(a, b):
    """a^T @ b without materializing the transpose (contract dim 0 of both)."""
    return lax.dot_general(a.astype(_MXU_DTYPE), b.astype(_MXU_DTYPE),
                           (((0,), (0,)), ((), ())),
                           preferred_element_type=jnp.float32)


def _mm_t1(a, b):
    """a @ b^T without materializing the transpose (contract dim 1 of both)."""
    return lax.dot_general(a.astype(_MXU_DTYPE), b.astype(_MXU_DTYPE),
                           (((1,), (1,)), ((), ())),
                           preferred_element_type=jnp.float32)


def _expmap0(u):
    """Lorentz expmap at the origin (k=1); caller guarantees u[:, 0] == 0, pad cols == 0."""
    cols = _cols(u.shape)
    nrm = jnp.sqrt(jnp.clip(jnp.sum(u * u, axis=-1, keepdims=True), 1e-8, None))
    e = jnp.exp(nrm)
    ei = pl.reciprocal(e, approx=True)                     # exp(-nrm) via EUP reciprocal
    cosh, sinh = 0.5 * (e + ei), 0.5 * (e - ei)
    r = sinh * u * (1.0 / nrm)                             # r[:, 0] == 0 since u[:, 0] == 0
    return jnp.where(cols == 0, cosh, r)                   # time column is cosh directly


def _lorentz_linear(x, w, b, use_relu):
    """LorentzLinear: (optional relu) -> x @ W + b -> re-project onto the hyperboloid."""
    if use_relu:
        x = jnp.maximum(x, 0.0)
    y = _mm(x, w) + b
    cols = _cols(y.shape)
    t_raw = jnp.sum(jnp.where(cols == 0, y, 0.0), axis=-1, keepdims=True)
    # space norm via masked sum (no total - t^2 cancellation -> safe with bf16 operands)
    s2 = jnp.clip(jnp.sum(jnp.where(cols == 0, 0.0, y * y), axis=-1, keepdims=True),
                  1e-8, None)
    time = _sigmoid(t_raw) * _EXP_SCALE + 1.1
    factor = jnp.sqrt((time * time - 1.0) / s2)            # exact per-row divide
    return jnp.where(cols == 0, time, y * factor)          # padded cols: 0 * factor = 0


def _hyperboloid_renorm(s):
    """Project s back onto the hyperboloid: s / sqrt(|<s, s>_L|) (exact divide)."""
    cols = _cols(s.shape)
    t = _time_col(s)
    sp = jnp.sum(jnp.where(cols == 0, 0.0, s * s), axis=-1, keepdims=True)
    denorm = jnp.sqrt(jnp.clip(jnp.abs(sp - t * t), 1e-8, None))
    return s * (1.0 / denorm)


def _normalize(z, scale):
    """to_poincare -> L2 normalize * scale -> from_poincare (k = 1)."""
    cols = _cols(z.shape)
    t = _time_col(z)
    p = jnp.where(cols == 0, 0.0, z) * (1.0 / (t + 1.0))
    nrm = jnp.sqrt(jnp.sum(p * p, axis=-1, keepdims=True))
    p = p * (scale / jnp.maximum(nrm, 1e-12))
    pn2 = jnp.sum(p * p, axis=-1, keepdims=True)
    # exact divide: 1 - pn2 ~ 2e-3 at scale=0.999; approx reciprocal error would be ~500x amplified
    return jnp.where(cols == 0, 1.0 + pn2, 2.0 * p) * (1.0 / (1.0 - pn2 + 1e-6))


def _layer_step(z, edge_f, edge_mx, wp, bp, wa, ba, wq, bq, wk, bk,
                *, m_valid, inv_att_scale, att_bias, inv_tau):
    """One LSENetLayer on the 8-aligned valid rows of this level.

    z: (R, DP) Lorentz coords, rows beyond the previous level's valid count are zero.
    edge_f/edge_mx: (R, R) level adjacency in f32 / bf16, zero outside the valid block.
    Returns pooled coords (m8, DP), pooled adjacency (m8, DP), assignments (R, DP),
    all exactly zero outside their valid rows/cols.
    """
    m8 = _round8(m_valid)

    # assignment features: proj -> assign-linear(relu) -> graph aggregation
    h1 = _lorentz_linear(z, wp, bp, use_relu=False)
    a1 = _lorentz_linear(h1, wa, ba, use_relu=True)
    a1 = _hyperboloid_renorm(_mm(edge_mx, a1))
    # drop the time column with a lane rotation (col j <- col j+1); XLU only, no concat
    ass_feat = pltpu.roll(a1, shift=DP - 1, axis=1)

    # Lorentz attention: att = sigmoid((2 + 2*<q,k>_L)/scale + bias) * adj
    q = _lorentz_linear(z, wq, bq, use_relu=False)
    k = _lorentz_linear(z, wk, bk, use_relu=False)
    qm = jnp.where(_cols(q.shape) == 0, -q, q)              # Lorentz metric sign flip
    cinner = _mm_t1(qm, k)                                   # q diag(-1,1,..,1) k^T
    att = _sigmoid((2.0 + 2.0 * cinner) * inv_att_scale + att_bias) * edge_f
    ass_pre = _mm(att, ass_feat)

    # tempered softmax over the m_valid assignment columns
    # (the reference's log_softmax is a per-row shift, so softmax(ass/tau) is identical;
    #  TODO(synk): Gumbel noise of torch gumbel_softmax omitted -- deterministic eval.)
    valid = _cols(ass_pre.shape) < m_valid
    lg = jnp.where(valid, ass_pre, -1e30)
    mx = jnp.max(lg, axis=-1, keepdims=True)
    e = jnp.exp((lg - mx) * inv_tau)                         # exactly 0 in padded columns
    ass = e * (1.0 / jnp.sum(e, axis=-1, keepdims=True))

    # pooling: contract on dim 0 (no materialized transpose)
    z_new = _hyperboloid_renorm(_mm_t0(ass, z)[:m8, :])      # ass^T @ z, renormalized
    a = _mm(_mm_t0(ass, edge_f)[:m8, :], ass)                # ass^T @ adj @ ass (valid rows only)
    rid = lax.broadcasted_iota(jnp.int32, (m8, DP), 0)
    cid = lax.broadcasted_iota(jnp.int32, (m8, DP), 1)
    a = jnp.where(rid == cid, 0.0, a)                        # zero the diagonal (as in reference)
    keep = (rid < m_valid) & (cid < m_valid)
    # sigmoid only over the valid block: padding stays exactly 0 so it cannot inject
    # spurious 0.5 edges into the next level's aggregation.
    # TODO(synk): Gumbel noise of gumbel_sigmoid omitted (deterministic eval).
    edge_new = jnp.where(keep, _sigmoid(a * inv_tau), 0.0)
    return z_new, edge_new, ass


# ----------------------------------------------------------------------------
# The single fused kernel: encoder + all LSENet layers + Frechet-mean candidate.
# ----------------------------------------------------------------------------
def _make_lsenet_kernel(layer_cfg, scale, inv_tau):
    num_layers = len(layer_cfg)
    n_in = 6 + 8 * num_layers

    def kernel(*refs):
        x_ref, adj_ref = refs[0], refs[1]
        we0, be0, we1, be1 = refs[2], refs[3], refs[4], refs[5]
        lrefs = refs[6:n_in]
        out_refs = refs[n_in:]

        adj = adj_ref[...]                                   # f32 for elementwise uses
        adj_mx = adj.astype(_MXU_DTYPE)                      # cast ONCE for all MXU uses

        # ---- graph encoder + normalize ----------------------------------------------
        h = _expmap0(x_ref[...])
        h = _lorentz_linear(h, we0[...], be0[...], use_relu=False)
        h = _hyperboloid_renorm(_mm(adj_mx, h))
        h = _lorentz_linear(h, we1[...], be1[...], use_relu=True)
        z = _hyperboloid_renorm(_mm(adj_mx, h))
        z = _normalize(z, scale)
        out_refs[0][...] = z

        # ---- LSENet layers (statically unrolled; z / edge never leave the chip) -----
        edge_f, edge_mx = adj, adj_mx
        for li, cfg in enumerate(layer_cfg):
            wp, bp, wa, ba, wq, bq, wk, bk = (r[...] for r in lrefs[8 * li:8 * li + 8])
            z, edge_new, ass = _layer_step(
                z, edge_f, edge_mx, wp, bp, wa, ba, wq, bq, wk, bk,
                m_valid=cfg["m"], inv_att_scale=cfg["inv_att_scale"],
                att_bias=cfg["att_bias"], inv_tau=inv_tau)
            out_refs[1 + 3 * li][...] = z
            out_refs[2 + 3 * li][...] = edge_new
            out_refs[3 + 3 * li][...] = ass
            m8 = z.shape[0]
            edge_f = edge_new[:, :m8]                        # (m8, m8), zero outside valid block
            edge_mx = edge_f.astype(_MXU_DTYPE)

        # ---- Frechet-mean candidate of the last pooled level (padded rows are zero) --
        out_refs[-1][...] = _hyperboloid_renorm(jnp.sum(z, axis=0, keepdims=True))

    return kernel


def _cost_estimate(n, m_list):
    """Rough advisory cost so XLA can schedule the custom call sensibly."""
    flops = 2 * (2 * n * DP * DP) + 2 * (2 * n * n * DP)     # encoder linears + aggs
    trans = 4 * n * DP
    nv = n
    for m in m_list:
        m8 = _round8(m)
        flops += 5 * (2 * nv * DP * DP)                      # 5 LorentzLinear per layer
        flops += 3 * (2 * nv * nv * DP)                      # agg, cinner, att @ feat
        flops += 2 * (2 * nv * DP * DP)                      # pooling contractions
        trans += nv * DP + 2 * nv * nv + m8 * DP
        nv = m8
    byts = 4 * (n * DP + n * n)                              # x, adj (f32)
    byts += 2 * DP * DP * (2 + 4 * len(m_list))              # bf16 weights
    byts += 4 * (n * DP + sum(2 * _round8(m) * DP for m in m_list) + DP)
    return pl.CostEstimate(flops=int(flops), transcendentals=int(trans),
                           bytes_accessed=int(byts))


# ----------------------------------------------------------------------------
# Deterministic parameter init (mirrors LorentzLinear: bias 0, weight uniform
# (+-1/sqrt(out)) with the time-input column zeroed), stored zero-padded to DP
# and pre-cast to bf16 exactly once (review item: weights dominate input traffic).
# ----------------------------------------------------------------------------
def init_lorentz_linear(key, din, dout):
    assert din <= DP and dout <= DP
    stdv = 1.0 / np.sqrt(dout)
    w = jax.random.uniform(key, (dout, din), jnp.float32, -stdv, stdv)
    w = w.at[:, 0].set(0.0)
    w_pad = jnp.zeros((DP, DP), jnp.float32).at[:din, :dout].set(jnp.transpose(w))
    return {"w": w_pad.astype(_MXU_DTYPE), "b": jnp.zeros((1, DP), jnp.float32)}


def init_params(key, in_features, hidden_dim_enc, hidden_features, embed_dim,
                num_nodes, height):
    d = embed_dim + 1
    keys = jax.random.split(key, 2 + 4 * (height - 1))
    params = {"scale": 0.999, "d": d}
    params["enc0"] = init_lorentz_linear(keys[0], in_features + 1, hidden_dim_enc)
    params["enc1"] = init_lorentz_linear(keys[1], hidden_dim_enc, d)
    decay_rate = int(np.exp(np.log(num_nodes) / height))
    max_nums = [int(num_nodes / decay_rate ** i) for i in range(1, height)]
    layers = []
    kidx = 2
    for i in range(height - 1):
        layers.append({
            "proj":   init_lorentz_linear(keys[kidx + 0], d, hidden_features),
            "assign": init_lorentz_linear(keys[kidx + 1], hidden_features, max_nums[i] + 1),
            "query":  init_lorentz_linear(keys[kidx + 2], d, d),
            "key":    init_lorentz_linear(keys[kidx + 3], d, d),
            "att_bias": 20.0,
            "att_scale": float(np.sqrt(d)),
            "num_assign": max_nums[i],
        })
        kidx += 4
    params["layers"] = layers
    return params, max_nums


# ----------------------------------------------------------------------------
# LSENet forward: ONE pallas_call for the whole network.
# ----------------------------------------------------------------------------
def lsenet_forward(params, x, adj, height, temperature):
    n, f = x.shape
    d = params["d"]
    # map into the Lorentz model: zero time coordinate, features padded to DP lanes
    xp = jnp.zeros((n, DP), jnp.float32).at[:, 1:f + 1].set(x)

    m_list = [lp["num_assign"] for lp in params["layers"]]
    layer_cfg = [dict(m=lp["num_assign"],
                      inv_att_scale=1.0 / float(lp["att_scale"]),
                      att_bias=float(lp["att_bias"]))
                 for lp in params["layers"]]

    kernel = _make_lsenet_kernel(
        layer_cfg,
        scale=float(np.clip(params["scale"], 0.01, 0.999)),
        inv_tau=1.0 / float(temperature))

    args = [xp, adj,
            params["enc0"]["w"], params["enc0"]["b"],
            params["enc1"]["w"], params["enc1"]["b"]]
    for lp in params["layers"]:
        for name in ("proj", "assign", "query", "key"):
            args.append(lp[name]["w"])
            args.append(lp[name]["b"])

    out_shapes = [jax.ShapeDtypeStruct((n, DP), jnp.float32)]        # encoder output
    nv = n
    for m in m_list:
        m8 = _round8(m)
        out_shapes += [jax.ShapeDtypeStruct((m8, DP), jnp.float32),  # pooled coords
                       jax.ShapeDtypeStruct((m8, DP), jnp.float32),  # pooled adjacency
                       jax.ShapeDtypeStruct((nv, DP), jnp.float32)]  # soft assignment
        nv = m8
    out_shapes.append(jax.ShapeDtypeStruct((1, DP), jnp.float32))    # Frechet-mean candidate

    outs = pl.pallas_call(
        kernel,
        out_shape=tuple(out_shapes),
        in_specs=[_vspec() for _ in args],
        out_specs=tuple(_vspec() for _ in out_shapes),
        compiler_params=pltpu.CompilerParams(vmem_limit_bytes=32 * 1024 * 1024),
        cost_estimate=_cost_estimate(n, m_list),
    )(*args)

    z_enc, root = outs[0], outs[-1]
    tree = {height: z_enc[:, :d]}
    assignments = {}
    adj_set = {height: adj}
    n_prev = n
    for i, m in enumerate(m_list):
        z_i, e_i, a_i = outs[1 + 3 * i], outs[2 + 3 * i], outs[3 + 3 * i]
        tree[height - i - 1] = z_i[:m, :d]
        adj_set[height - i - 1] = e_i[:m, :m]
        assignments[height - i] = a_i[:n_prev, :m]
        n_prev = m
    tree[0] = root[:, :d]                                    # Frechet mean of the last level
    assignments[1] = jnp.ones((m_list[-1], 1), jnp.float32)
    return tree, assignments, adj_set


# ----------------------------------------------------------------------------
# Main
# ----------------------------------------------------------------------------
if __name__ == "__main__":
    key = jax.random.PRNGKey(0)
    kx, ka, kp = jax.random.split(key, 3)

    N, in_features = 16, 8
    hidden_dim_enc, hidden_features, embed_dim = 16, 16, 8
    height, temperature = 3, 0.1

    x = jax.random.normal(kx, (N, in_features), jnp.float32)

    # symmetric adjacency with self loops, row-normalized
    a = (jax.random.uniform(ka, (N, N)) < 0.3).astype(jnp.float32)
    a = jnp.maximum(a, a.T)
    a = jnp.minimum(a + jnp.eye(N, dtype=jnp.float32), 1.0)
    adj = a / jnp.sum(a, axis=-1, keepdims=True)

    params, max_nums = init_params(kp, in_features, hidden_dim_enc, hidden_features,
                                   embed_dim, N, height)

    tree, assignments, adj_set = lsenet_forward(params, x, adj, height, temperature)

    for leaf in jax.tree_util.tree_leaves((tree, assignments, adj_set)):
        jax.block_until_ready(leaf)

    # sanity checks on the tree structure produced by the forward pass
    assert tree[height].shape == (N, embed_dim + 1)
    assert tree[height - 1].shape == (max_nums[0], embed_dim + 1)
    assert tree[1].shape == (max_nums[1], embed_dim + 1)
    assert tree[0].shape == (1, embed_dim + 1)
    assert assignments[height].shape == (N, max_nums[0])
    assert assignments[height - 1].shape == (max_nums[0], max_nums[1])
    assert assignments[1].shape == (max_nums[1], 1)
    assert adj_set[height - 1].shape == (max_nums[0], max_nums[0])
    for leaf in jax.tree_util.tree_leaves(tree):
        assert bool(jnp.all(jnp.isfinite(leaf)))

    print("KERNEL_OK")
</pallas_src>

<mosaic_0001>
module attributes {stable_mosaic.version = 11 : i64} {
  func.func @kernel(%arg0: memref<16x128xf32, #tpu.memory_space<vmem>>, %arg1: memref<16x16xf32, #tpu.memory_space<vmem>>, %arg2: memref<128x128xbf16, #tpu.memory_space<vmem>>, %arg3: memref<1x128xf32, #tpu.memory_space<vmem>>, %arg4: memref<128x128xbf16, #tpu.memory_space<vmem>>, %arg5: memref<1x128xf32, #tpu.memory_space<vmem>>, %arg6: memref<128x128xbf16, #tpu.memory_space<vmem>>, %arg7: memref<1x128xf32, #tpu.memory_space<vmem>>, %arg8: memref<128x128xbf16, #tpu.memory_space<vmem>>, %arg9: memref<1x128xf32, #tpu.memory_space<vmem>>, %arg10: memref<128x128xbf16, #tpu.memory_space<vmem>>, %arg11: memref<1x128xf32, #tpu.memory_space<vmem>>, %arg12: memref<128x128xbf16, #tpu.memory_space<vmem>>, %arg13: memref<1x128xf32, #tpu.memory_space<vmem>>, %arg14: memref<128x128xbf16, #tpu.memory_space<vmem>>, %arg15: memref<1x128xf32, #tpu.memory_space<vmem>>, %arg16: memref<128x128xbf16, #tpu.memory_space<vmem>>, %arg17: memref<1x128xf32, #tpu.memory_space<vmem>>, %arg18: memref<128x128xbf16, #tpu.memory_space<vmem>>, %arg19: memref<1x128xf32, #tpu.memory_space<vmem>>, %arg20: memref<128x128xbf16, #tpu.memory_space<vmem>>, %arg21: memref<1x128xf32, #tpu.memory_space<vmem>>, %arg22: memref<16x128xf32, #tpu.memory_space<vmem>>, %arg23: memref<8x128xf32, #tpu.memory_space<vmem>>, %arg24: memref<8x128xf32, #tpu.memory_space<vmem>>, %arg25: memref<16x128xf32, #tpu.memory_space<vmem>>, %arg26: memref<8x128xf32, #tpu.memory_space<vmem>>, %arg27: memref<8x128xf32, #tpu.memory_space<vmem>>, %arg28: memref<8x128xf32, #tpu.memory_space<vmem>>, %arg29: memref<1x128xf32, #tpu.memory_space<vmem>>) attributes {dimension_semantics = [], scalar_prefetch = 0 : i64, scratch_operands = 0 : i64, tpu.core_type = #tpu.core_type<tc>} {
    %c0 = arith.constant 0 : index
    %c0_0 = arith.constant 0 : index
    %0 = vector.load %arg1[%c0, %c0_0] : memref<16x16xf32, #tpu.memory_space<vmem>>, vector<16x16xf32>
    %1 = arith.truncf %0 : vector<16x16xf32> to vector<16x16xbf16>
    %c0_1 = arith.constant 0 : index
    %c0_2 = arith.constant 0 : index
    %2 = vector.load %arg0[%c0_1, %c0_2] : memref<16x128xf32, #tpu.memory_space<vmem>>, vector<16x128xf32>
    %3 = tpu.iota {dimensions = array<i32: 1>} : vector<16x128xi32>
    %4 = arith.mulf %2, %2 : vector<16x128xf32>
    %cst = arith.constant dense<0.000000e+00> : vector<16xf32>
    %5 = vector.multi_reduction <add>, %4, %cst [1] : vector<16x128xf32> to vector<16xf32>
    %6 = vector.shape_cast %5 : vector<16xf32> to vector<16x1xf32>
    %cst_3 = arith.constant 9.99999993E-9 : f32
    %7 = vector.broadcast %cst_3 : f32 to vector<16x1xf32>
    %8 = arith.maximumf %7, %6 : vector<16x1xf32>
    %9 = math.sqrt %8 : vector<16x1xf32>
    %10 = math.exp %9 : vector<16x1xf32>
    %11 = tpu.reciprocal %10 {approx = true} : vector<16x1xf32> -> vector<16x1xf32>
    %12 = arith.addf %10, %11 : vector<16x1xf32>
    %cst_4 = arith.constant 5.000000e-01 : f32
    %13 = vector.broadcast %cst_4 : f32 to vector<16x1xf32>
    %14 = arith.mulf %13, %12 : vector<16x1xf32>
    %15 = arith.subf %10, %11 : vector<16x1xf32>
    %cst_5 = arith.constant 5.000000e-01 : f32
    %16 = vector.broadcast %cst_5 : f32 to vector<16x1xf32>
    %17 = arith.mulf %16, %15 : vector<16x1xf32>
    %18 = vector.broadcast %17 : vector<16x1xf32> to vector<16x128xf32>
    %19 = arith.mulf %18, %2 : vector<16x128xf32>
    %cst_6 = arith.constant 1.000000e+00 : f32
    %20 = vector.broadcast %cst_6 : f32 to vector<16x1xf32>
    %21 = arith.divf %20, %9 : vector<16x1xf32>
    %22 = vector.broadcast %21 : vector<16x1xf32> to vector<16x128xf32>
    %23 = arith.mulf %19, %22 : vector<16x128xf32>
    %c0_i32 = arith.constant 0 : i32
    %24 = vector.broadcast %c0_i32 : i32 to vector<16x128xi32>
    %25 = arith.cmpi eq, %3, %24 : vector<16x128xi32>
    %26 = vector.shape_cast %14 : vector<16x1xf32> to vector<16x1xf32>
    %27 = vector.broadcast %26 : vector<16x1xf32> to vector<16x128xf32>
    %28 = arith.select %25, %27, %23 : vector<16x128xi1>, vector<16x128xf32>
    %c0_7 = arith.constant 0 : index
    %c0_8 = arith.constant 0 : index
    %29 = vector.load %arg2[%c0_7, %c0_8] : memref<128x128xbf16, #tpu.memory_space<vmem>>, vector<128x128xbf16>
    %c0_9 = arith.constant 0 : index
    %c0_10 = arith.constant 0 : index
    %30 = vector.load %arg3[%c0_9, %c0_10] : memref<1x128xf32, #tpu.memory_space<vmem>>, vector<1x128xf32>
    %31 = arith.truncf %28 : vector<16x128xf32> to vector<16x128xbf16>
    %cst_11 = arith.constant dense<0.000000e+00> : vector<16x128xf32>
    %32 = tpu.matmul %31, %29, %cst_11 {dimension_numbers = #tpu.dot_dimension_numbers<[1], [0], [0], [1], [0, 0, 1, 1], [], []>} : vector<16x128xbf16>, vector<128x128xbf16>, vector<16x128xf32> -> vector<16x128xf32>
    %33 = vector.broadcast %30 : vector<1x128xf32> to vector<16x128xf32>
    %34 = arith.addf %32, %33 : vector<16x128xf32>
    %35 = tpu.iota {dimensions = array<i32: 1>} : vector<16x128xi32>
    %c0_i32_12 = arith.constant 0 : i32
    %36 = vector.broadcast %c0_i32_12 : i32 to vector<16x128xi32>
    %37 = arith.cmpi eq, %35, %36 : vector<16x128xi32>
    %cst_13 = arith.constant 0.000000e+00 : f32
    %38 = vector.broadcast %cst_13 : f32 to vector<16x128xf32>
    %39 = arith.select %37, %34, %38 : vector<16x128xi1>, vector<16x128xf32>
    %cst_14 = arith.constant dense<0.000000e+00> : vector<16xf32>
    %40 = vector.multi_reduction <add>, %39, %cst_14 [1] : vector<16x128xf32> to vector<16xf32>
    %41 = vector.shape_cast %40 : vector<16xf32> to vector<16x1xf32>
    %c0_i32_15 = arith.constant 0 : i32
    %42 = vector.broadcast %c0_i32_15 : i32 to vector<16x128xi32>
    %43 = arith.cmpi eq, %35, %42 : vector<16x128xi32>
    %44 = arith.mulf %34, %34 : vector<16x128xf32>
    %cst_16 = arith.constant 0.000000e+00 : f32
    %45 = vector.broadcast %cst_16 : f32 to vector<16x128xf32>
    %46 = arith.select %43, %45, %44 : vector<16x128xi1>, vector<16x128xf32>
    %cst_17 = arith.constant dense<0.000000e+00> : vector<16xf32>
    %47 = vector.multi_reduction <add>, %46, %cst_17 [1] : vector<16x128xf32> to vector<16xf32>
    %48 = vector.shape_cast %47 : vector<16xf32> to vector<16x1xf32>
    %cst_18 = arith.constant 9.99999993E-9 : f32
    %49 = vector.broadcast %cst_18 : f32 to vector<16x1xf32>
    %50 = arith.maximumf %49, %48 : vector<16x1xf32>
    %cst_19 = arith.constant 5.000000e-01 : f32
    %51 = vector.broadcast %cst_19 : f32 to vector<16x1xf32>
    %52 = arith.mulf %51, %41 : vector<16x1xf32>
    %53 = math.tanh %52 : vector<16x1xf32>
    %cst_20 = arith.constant 1.000000e+00 : f32
    %54 = vector.broadcast %cst_20 : f32 to vector<16x1xf32>
    %55 = arith.addf %53, %54 : vector<16x1xf32>
    %cst_21 = arith.constant 5.000000e-01 : f32
    %56 = vector.broadcast %cst_21 : f32 to vector<16x1xf32>
    %57 = arith.mulf %56, %55 : vector<16x1xf32>
    %cst_22 = arith.constant 1.000000e+01 : f32
    %58 = vector.broadcast %cst_22 : f32 to vector<16x1xf32>
    %59 = arith.mulf %57, %58 : vector<16x1xf32>
    %cst_23 = arith.constant 1.100000e+00 : f32
    %60 = vector.broadcast %cst_23 : f32 to vector<16x1xf32>
    %61 = arith.addf %59, %60 : vector<16x1xf32>
    %62 = arith.mulf %61, %61 : vector<16x1xf32>
    %cst_24 = arith.constant 1.000000e+00 : f32
    %63 = vector.broadcast %cst_24 : f32 to vector<16x1xf32>
    %64 = arith.subf %62, %63 : vector<16x1xf32>
    %65 = arith.divf %64, %50 : vector<16x1xf32>
    %66 = math.sqrt %65 : vector<16x1xf32>
    %c0_i32_25 = arith.constant 0 : i32
    %67 = vector.broadcast %c0_i32_25 : i32 to vector<16x128xi32>
    %68 = arith.cmpi eq, %35, %67 : vector<16x128xi32>
    %69 = vector.broadcast %66 : vector<16x1xf32> to vector<16x128xf32>
    %70 = arith.mulf %34, %69 : vector<16x128xf32>
    %71 = vector.shape_cast %61 : vector<16x1xf32> to vector<16x1xf32>
    %72 = vector.broadcast %71 : vector<16x1xf32> to vector<16x128xf32>
    %73 = arith.select %68, %72, %70 : vector<16x128xi1>, vector<16x128xf32>
    %74 = arith.truncf %73 : vector<16x128xf32> to vector<16x128xbf16>
    %cst_26 = arith.constant dense<0.000000e+00> : vector<16x128xf32>
    %75 = tpu.matmul %1, %74, %cst_26 {dimension_numbers = #tpu.dot_dimension_numbers<[1], [0], [0], [1], [0, 0, 1, 1], [], []>} : vector<16x16xbf16>, vector<16x128xbf16>, vector<16x128xf32> -> vector<16x128xf32>
    %76 = tpu.iota {dimensions = array<i32: 1>} : vector<16x128xi32>
    %77 = tpu.iota {dimensions = array<i32: 1>} : vector<16x128xi32>
    %c0_i32_27 = arith.constant 0 : i32
    %78 = vector.broadcast %c0_i32_27 : i32 to vector<16x128xi32>
    %79 = arith.cmpi eq, %77, %78 : vector<16x128xi32>
    %cst_28 = arith.constant 0.000000e+00 : f32
    %80 = vector.broadcast %cst_28 : f32 to vector<16x128xf32>
    %81 = arith.select %79, %75, %80 : vector<16x128xi1>, vector<16x128xf32>
    %cst_29 = arith.constant dense<0.000000e+00> : vector<16xf32>
    %82 = vector.multi_reduction <add>, %81, %cst_29 [1] : vector<16x128xf32> to vector<16xf32>
    %83 = vector.shape_cast %82 : vector<16xf32> to vector<16x1xf32>
    %c0_i32_30 = arith.constant 0 : i32
    %84 = vector.broadcast %c0_i32_30 : i32 to vector<16x128xi32>
    %85 = arith.cmpi eq, %76, %84 : vector<16x128xi32>
    %86 = arith.mulf %75, %75 : vector<16x128xf32>
    %cst_31 = arith.constant 0.000000e+00 : f32
    %87 = vector.broadcast %cst_31 : f32 to vector<16x128xf32>
    %88 = arith.select %85, %87, %86 : vector<16x128xi1>, vector<16x128xf32>
    %cst_32 = arith.constant dense<0.000000e+00> : vector<16xf32>
    %89 = vector.multi_reduction <add>, %88, %cst_32 [1] : vector<16x128xf32> to vector<16xf32>
    %90 = vector.shape_cast %89 : vector<16xf32> to vector<16x1xf32>
    %91 = arith.mulf %83, %83 : vector<16x1xf32>
    %92 = arith.subf %90, %91 : vector<16x1xf32>
    %93 = math.absf %92 : vector<16x1xf32>
    %cst_33 = arith.constant 9.99999993E-9 : f32
    %94 = vector.broadcast %cst_33 : f32 to vector<16x1xf32>
    %95 = arith.maximumf %94, %93 : vector<16x1xf32>
    %96 = math.sqrt %95 : vector<16x1xf32>
    %cst_34 = arith.constant 1.000000e+00 : f32
    %97 = vector.broadcast %cst_34 : f32 to vector<16x1xf32>
    %98 = arith.divf %97, %96 : vector<16x1xf32>
    %99 = vector.broadcast %98 : vector<16x1xf32> to vector<16x128xf32>
    %100 = arith.mulf %75, %99 : vector<16x128xf32>
    %c0_35 = arith.constant 0 : index
    %c0_36 = arith.constant 0 : index
    %101 = vector.load %arg4[%c0_35, %c0_36] : memref<128x128xbf16, #tpu.memory_space<vmem>>, vector<128x128xbf16>
    %c0_37 = arith.constant 0 : index
    %c0_38 = arith.constant 0 : index
    %102 = vector.load %arg5[%c0_37, %c0_38] : memref<1x128xf32, #tpu.memory_space<vmem>>, vector<1x128xf32>
    %cst_39 = arith.constant 0.000000e+00 : f32
    %103 = vector.broadcast %cst_39 : f32 to vector<16x128xf32>
    %104 = arith.maximumf %100, %103 : vector<16x128xf32>
    %105 = arith.truncf %104 : vector<16x128xf32> to vector<16x128xbf16>
    %cst_40 = arith.constant dense<0.000000e+00> : vector<16x128xf32>
    %106 = tpu.matmul %105, %101, %cst_40 {dimension_numbers = #tpu.dot_dimension_numbers<[1], [0], [0], [1], [0, 0, 1, 1], [], []>} : vector<16x128xbf16>, vector<128x128xbf16>, vector<16x128xf32> -> vector<16x128xf32>
    %107 = vector.broadcast %102 : vector<1x128xf32> to vector<16x128xf32>
    %108 = arith.addf %106, %107 : vector<16x128xf32>
    %109 = tpu.iota {dimensions = array<i32: 1>} : vector<16x128xi32>
    %c0_i32_41 = arith.constant 0 : i32
    %110 = vector.broadcast %c0_i32_41 : i32 to vector<16x128xi32>
    %111 = arith.cmpi eq, %109, %110 : vector<16x128xi32>
    %cst_42 = arith.constant 0.000000e+00 : f32
    %112 = vector.broadcast %cst_42 : f32 to vector<16x128xf32>
    %113 = arith.select %111, %108, %112 : vector<16x128xi1>, vector<16x128xf32>
    %cst_43 = arith.constant dense<0.000000e+00> : vector<16xf32>
    %114 = vector.multi_reduction <add>, %113, %cst_43 [1] : vector<16x128xf32> to vector<16xf32>
    %115 = vector.shape_cast %114 : vector<16xf32> to vector<16x1xf32>
    %c0_i32_44 = arith.constant 0 : i32
    %116 = vector.broadcast %c0_i32_44 : i32 to vector<16x128xi32>
    %117 = arith.cmpi eq, %109, %116 : vector<16x128xi32>
    %118 = arith.mulf %108, %108 : vector<16x128xf32>
    %cst_45 = arith.constant 0.000000e+00 : f32
    %119 = vector.broadcast %cst_45 : f32 to vector<16x128xf32>
    %120 = arith.select %117, %119, %118 : vector<16x128xi1>, vector<16x128xf32>
    %cst_46 = arith.constant dense<0.000000e+00> : vector<16xf32>
    %121 = vector.multi_reduction <add>, %120, %cst_46 [1] : vector<16x128xf32> to vector<16xf32>
    %122 = vector.shape_cast %121 : vector<16xf32> to vector<16x1xf32>
    %cst_47 = arith.constant 9.99999993E-9 : f32
    %123 = vector.broadcast %cst_47 : f32 to vector<16x1xf32>
    %124 = arith.maximumf %123, %122 : vector<16x1xf32>
    %cst_48 = arith.constant 5.000000e-01 : f32
    %125 = vector.broadcast %cst_48 : f32 to vector<16x1xf32>
    %126 = arith.mulf %125, %115 : vector<16x1xf32>
    %127 = math.tanh %126 : vector<16x1xf32>
    %cst_49 = arith.constant 1.000000e+00 : f32
    %128 = vector.broadcast %cst_49 : f32 to vector<16x1xf32>
    %129 = arith.addf %127, %128 : vector<16x1xf32>
    %cst_50 = arith.constant 5.000000e-01 : f32
    %130 = vector.broadcast %cst_50 : f32 to vector<16x1xf32>
    %131 = arith.mulf %130, %129 : vector<16x1xf32>
    %cst_51 = arith.constant 1.000000e+01 : f32
    %132 = vector.broadcast %cst_51 : f32 to vector<16x1xf32>
    %133 = arith.mulf %131, %132 : vector<16x1xf32>
    %cst_52 = arith.constant 1.100000e+00 : f32
    %134 = vector.broadcast %cst_52 : f32 to vector<16x1xf32>
    %135 = arith.addf %133, %134 : vector<16x1xf32>
    %136 = arith.mulf %135, %135 : vector<16x1xf32>
    %cst_53 = arith.constant 1.000000e+00 : f32
    %137 = vector.broadcast %cst_53 : f32 to vector<16x1xf32>
    %138 = arith.subf %136, %137 : vector<16x1xf32>
    %139 = arith.divf %138, %124 : vector<16x1xf32>
    %140 = math.sqrt %139 : vector<16x1xf32>
    %c0_i32_54 = arith.constant 0 : i32
    %141 = vector.broadcast %c0_i32_54 : i32 to vector<16x128xi32>
    %142 = arith.cmpi eq, %109, %141 : vector<16x128xi32>
    %143 = vector.broadcast %140 : vector<16x1xf32> to vector<16x128xf32>
    %144 = arith.mulf %108, %143 : vector<16x128xf32>
    %145 = vector.shape_cast %135 : vector<16x1xf32> to vector<16x1xf32>
    %146 = vector.broadcast %145 : vector<16x1xf32> to vector<16x128xf32>
    %147 = arith.select %142, %146, %144 : vector<16x128xi1>, vector<16x128xf32>
    %148 = arith.truncf %147 : vector<16x128xf32> to vector<16x128xbf16>
    %cst_55 = arith.constant dense<0.000000e+00> : vector<16x128xf32>
    %149 = tpu.matmul %1, %148, %cst_55 {dimension_numbers = #tpu.dot_dimension_numbers<[1], [0], [0], [1], [0, 0, 1, 1], [], []>} : vector<16x16xbf16>, vector<16x128xbf16>, vector<16x128xf32> -> vector<16x128xf32>
    %150 = tpu.iota {dimensions = array<i32: 1>} : vector<16x128xi32>
    %151 = tpu.iota {dimensions = array<i32: 1>} : vector<16x128xi32>
    %c0_i32_56 = arith.constant 0 : i32
    %152 = vector.broadcast %c0_i32_56 : i32 to vector<16x128xi32>
    %153 = arith.cmpi eq, %151, %152 : vector<16x128xi32>
    %cst_57 = arith.constant 0.000000e+00 : f32
    %154 = vector.broadcast %cst_57 : f32 to vector<16x128xf32>
    %155 = arith.select %153, %149, %154 : vector<16x128xi1>, vector<16x128xf32>
    %cst_58 = arith.constant dense<0.000000e+00> : vector<16xf32>
    %156 = vector.multi_reduction <add>, %155, %cst_58 [1] : vector<16x128xf32> to vector<16xf32>
    %157 = vector.shape_cast %156 : vector<16xf32> to vector<16x1xf32>
    %c0_i32_59 = arith.constant 0 : i32
    %158 = vector.broadcast %c0_i32_59 : i32 to vector<16x128xi32>
    %159 = arith.cmpi eq, %150, %158 : vector<16x128xi32>
    %160 = arith.mulf %149, %149 : vector<16x128xf32>
    %cst_60 = arith.constant 0.000000e+00 : f32
    %161 = vector.broadcast %cst_60 : f32 to vector<16x128xf32>
    %162 = arith.select %159, %161, %160 : vector<16x128xi1>, vector<16x128xf32>
    %cst_61 = arith.constant dense<0.000000e+00> : vector<16xf32>
    %163 = vector.multi_reduction <add>, %162, %cst_61 [1] : vector<16x128xf32> to vector<16xf32>
    %164 = vector.shape_cast %163 : vector<16xf32> to vector<16x1xf32>
    %165 = arith.mulf %157, %157 : vector<16x1xf32>
    %166 = arith.subf %164, %165 : vector<16x1xf32>
    %167 = math.absf %166 : vector<16x1xf32>
    %cst_62 = arith.constant 9.99999993E-9 : f32
    %168 = vector.broadcast %cst_62 : f32 to vector<16x1xf32>
    %169 = arith.maximumf %168, %167 : vector<16x1xf32>
    %170 = math.sqrt %169 : vector<16x1xf32>
    %cst_63 = arith.constant 1.000000e+00 : f32
    %171 = vector.broadcast %cst_63 : f32 to vector<16x1xf32>
    %172 = arith.divf %171, %170 : vector<16x1xf32>
    %173 = vector.broadcast %172 : vector<16x1xf32> to vector<16x128xf32>
    %174 = arith.mulf %149, %173 : vector<16x128xf32>
    %175 = tpu.iota {dimensions = array<i32: 1>} : vector<16x128xi32>
    %176 = tpu.iota {dimensions = array<i32: 1>} : vector<16x128xi32>
    %c0_i32_64 = arith.constant 0 : i32
    %177 = vector.broadcast %c0_i32_64 : i32 to vector<16x128xi32>
    %178 = arith.cmpi eq, %176, %177 : vector<16x128xi32>
    %cst_65 = arith.constant 0.000000e+00 : f32
    %179 = vector.broadcast %cst_65 : f32 to vector<16x128xf32>
    %180 = arith.select %178, %174, %179 : vector<16x128xi1>, vector<16x128xf32>
    %cst_66 = arith.constant dense<0.000000e+00> : vector<16xf32>
    %181 = vector.multi_reduction <add>, %180, %cst_66 [1] : vector<16x128xf32> to vector<16xf32>
    %182 = vector.shape_cast %181 : vector<16xf32> to vector<16x1xf32>
    %c0_i32_67 = arith.constant 0 : i32
    %183 = vector.broadcast %c0_i32_67 : i32 to vector<16x128xi32>
    %184 = arith.cmpi eq, %175, %183 : vector<16x128xi32>
    %cst_68 = arith.constant 0.000000e+00 : f32
    %185 = vector.broadcast %cst_68 : f32 to vector<16x128xf32>
    %186 = arith.select %184, %185, %174 : vector<16x128xi1>, vector<16x128xf32>
    %cst_69 = arith.constant 1.000000e+00 : f32
    %187 = vector.broadcast %cst_69 : f32 to vector<16x1xf32>
    %188 = arith.addf %182, %187 : vector<16x1xf32>
    %cst_70 = arith.constant 1.000000e+00 : f32
    %189 = vector.broadcast %cst_70 : f32 to vector<16x1xf32>
    %190 = arith.divf %189, %188 : vector<16x1xf32>
    %191 = vector.broadcast %190 : vector<16x1xf32> to vector<16x128xf32>
    %192 = arith.mulf %186, %191 : vector<16x128xf32>
    %193 = arith.mulf %192, %192 : vector<16x128xf32>
    %cst_71 = arith.constant dense<0.000000e+00> : vector<16xf32>
    %194 = vector.multi_reduction <add>, %193, %cst_71 [1] : vector<16x128xf32> to vector<16xf32>
    %195 = vector.shape_cast %194 : vector<16xf32> to vector<16x1xf32>
    %196 = math.sqrt %195 : vector<16x1xf32>
    %cst_72 = arith.constant 9.99999996E-13 : f32
    %197 = vector.broadcast %cst_72 : f32 to vector<16x1xf32>
    %198 = arith.maximumf %196, %197 : vector<16x1xf32>
    %cst_73 = arith.constant 9.990000e-01 : f32
    %199 = vector.broadcast %cst_73 : f32 to vector<16x1xf32>
    %200 = arith.divf %199, %198 : vector<16x1xf32>
    %201 = vector.broadcast %200 : vector<16x1xf32> to vector<16x128xf32>
    %202 = arith.mulf %192, %201 : vector<16x128xf32>
    %203 = arith.mulf %202, %202 : vector<16x128xf32>
    %cst_74 = arith.constant dense<0.000000e+00> : vector<16xf32>
    %204 = vector.multi_reduction <add>, %203, %cst_74 [1] : vector<16x128xf32> to vector<16xf32>
    %205 = vector.shape_cast %204 : vector<16xf32> to vector<16x1xf32>
    %c0_i32_75 = arith.constant 0 : i32
    %206 = vector.broadcast %c0_i32_75 : i32 to vector<16x128xi32>
    %207 = arith.cmpi eq, %175, %206 : vector<16x128xi32>
    %cst_76 = arith.constant 1.000000e+00 : f32
    %208 = vector.broadcast %cst_76 : f32 to vector<16x1xf32>
    %209 = arith.addf %208, %205 : vector<16x1xf32>
    %cst_77 = arith.constant 2.000000e+00 : f32
    %210 = vector.broadcast %cst_77 : f32 to vector<16x128xf32>
    %211 = arith.mulf %210, %202 : vector<16x128xf32>
    %212 = vector.shape_cast %209 : vector<16x1xf32> to vector<16x1xf32>
    %213 = vector.broadcast %212 : vector<16x1xf32> to vector<16x128xf32>
    %214 = arith.select %207, %213, %211 : vector<16x128xi1>, vector<16x128xf32>
    %cst_78 = arith.constant 1.000000e+00 : f32
    %215 = vector.broadcast %cst_78 : f32 to vector<16x1xf32>
    %216 = arith.subf %215, %205 : vector<16x1xf32>
    %cst_79 = arith.constant 9.99999997E-7 : f32
    %217 = vector.broadcast %cst_79 : f32 to vector<16x1xf32>
    %218 = arith.addf %216, %217 : vector<16x1xf32>
    %cst_80 = arith.constant 1.000000e+00 : f32
    %219 = vector.broadcast %cst_80 : f32 to vector<16x1xf32>
    %220 = arith.divf %219, %218 : vector<16x1xf32>
    %221 = vector.broadcast %220 : vector<16x1xf32> to vector<16x128xf32>
    %222 = arith.mulf %214, %221 : vector<16x128xf32>
    %c0_81 = arith.constant 0 : index
    %c0_82 = arith.constant 0 : index
    %223 = vector.load %arg22[%c0_81, %c0_82] : memref<16x128xf32, #tpu.memory_space<vmem>>, vector<16x128xf32>
    tpu.vector_store %arg22[%c0_81, %c0_82], %222 {strides = array<i32>} : memref<16x128xf32, #tpu.memory_space<vmem>>, vector<16x128xf32>,
    %c0_83 = arith.constant 0 : index
    %c0_84 = arith.constant 0 : index
    %224 = vector.load %arg6[%c0_83, %c0_84] : memref<128x128xbf16, #tpu.memory_space<vmem>>, vector<128x128xbf16>
    %c0_85 = arith.constant 0 : index
    %c0_86 = arith.constant 0 : index
    %225 = vector.load %arg7[%c0_85, %c0_86] : memref<1x128xf32, #tpu.memory_space<vmem>>, vector<1x128xf32>
    %c0_87 = arith.constant 0 : index
    %c0_88 = arith.constant 0 : index
    %226 = vector.load %arg8[%c0_87, %c0_88] : memref<128x128xbf16, #tpu.memory_space<vmem>>, vector<128x128xbf16>
    %c0_89 = arith.constant 0 : index
    %c0_90 = arith.constant 0 : index
    %227 = vector.load %arg9[%c0_89, %c0_90] : memref<1x128xf32, #tpu.memory_space<vmem>>, vector<1x128xf32>
    %c0_91 = arith.constant 0 : index
    %c0_92 = arith.constant 0 : index
    %228 = vector.load %arg10[%c0_91, %c0_92] : memref<128x128xbf16, #tpu.memory_space<vmem>>, vector<128x128xbf16>
    %c0_93 = arith.constant 0 : index
    %c0_94 = arith.constant 0 : index
    %229 = vector.load %arg11[%c0_93, %c0_94] : memref<1x128xf32, #tpu.memory_space<vmem>>, vector<1x128xf32>
    %c0_95 = arith.constant 0 : index
    %c0_96 = arith.constant 0 : index
    %230 = vector.load %arg12[%c0_95, %c0_96] : memref<128x128xbf16, #tpu.memory_space<vmem>>, vector<128x128xbf16>
    %c0_97 = arith.constant 0 : index
    %c0_98 = arith.constant 0 : index
    %231 = vector.load %arg13[%c0_97, %c0_98] : memref<1x128xf32, #tpu.memory_space<vmem>>, vector<1x128xf32>
    %232 = arith.truncf %222 : vector<16x128xf32> to vector<16x128xbf16>
    %cst_99 = arith.constant dense<0.000000e+00> : vector<16x128xf32>
    %233 = tpu.matmul %232, %224, %cst_99 {dimension_numbers = #tpu.dot_dimension_numbers<[1], [0], [0], [1], [0, 0, 1, 1], [], []>} : vector<16x128xbf16>, vector<128x128xbf16>, vector<16x128xf32> -> vector<16x128xf32>
    %234 = vector.broadcast %225 : vector<1x128xf32> to vector<16x128xf32>
    %235 = arith.addf %233, %234 : vector<16x128xf32>
    %236 = tpu.iota {dimensions = array<i32: 1>} : vector<16x128xi32>
    %c0_i32_100 = arith.constant 0 : i32
    %237 = vector.broadcast %c0_i32_100 : i32 to vector<16x128xi32>
    %238 = arith.cmpi eq, %236, %237 : vector<16x128xi32>
    %cst_101 = arith.constant 0.000000e+00 : f32
    %239 = vector.broadcast %cst_101 : f32 to vector<16x128xf32>
    %240 = arith.select %238, %235, %239 : vector<16x128xi1>, vector<16x128xf32>
    %cst_102 = arith.constant dense<0.000000e+00> : vector<16xf32>
    %241 = vector.multi_reduction <add>, %240, %cst_102 [1] : vector<16x128xf32> to vector<16xf32>
    %242 = vector.shape_cast %241 : vector<16xf32> to vector<16x1xf32>
    %c0_i32_103 = arith.constant 0 : i32
    %243 = vector.broadcast %c0_i32_103 : i32 to vector<16x128xi32>
    %244 = arith.cmpi eq, %236, %243 : vector<16x128xi32>
    %245 = arith.mulf %235, %235 : vector<16x128xf32>
    %cst_104 = arith.constant 0.000000e+00 : f32
    %246 = vector.broadcast %cst_104 : f32 to vector<16x128xf32>
    %247 = arith.select %244, %246, %245 : vector<16x128xi1>, vector<16x128xf32>
    %cst_105 = arith.constant dense<0.000000e+00> : vector<16xf32>
    %248 = vector.multi_reduction <add>, %247, %cst_105 [1] : vector<16x128xf32> to vector<16xf32>
    %249 = vector.shape_cast %248 : vector<16xf32> to vector<16x1xf32>
    %cst_106 = arith.constant 9.99999993E-9 : f32
    %250 = vector.broadcast %cst_106 : f32 to vector<16x1xf32>
    %251 = arith.maximumf %250, %249 : vector<16x1xf32>
    %cst_107 = arith.constant 5.000000e-01 : f32
    %252 = vector.broadcast %cst_107 : f32 to vector<16x1xf32>
    %253 = arith.mulf %252, %242 : vector<16x1xf32>
    %254 = math.tanh %253 : vector<16x1xf32>
    %cst_108 = arith.constant 1.000000e+00 : f32
    %255 = vector.broadcast %cst_108 : f32 to vector<16x1xf32>
    %256 = arith.addf %254, %255 : vector<16x1xf32>
    %cst_109 = arith.constant 5.000000e-01 : f32
    %257 = vector.broadcast %cst_109 : f32 to vector<16x1xf32>
    %258 = arith.mulf %257, %256 : vector<16x1xf32>
    %cst_110 = arith.constant 1.000000e+01 : f32
    %259 = vector.broadcast %cst_110 : f32 to vector<16x1xf32>
    %260 = arith.mulf %258, %259 : vector<16x1xf32>
    %cst_111 = arith.constant 1.100000e+00 : f32
    %261 = vector.broadcast %cst_111 : f32 to vector<16x1xf32>
    %262 = arith.addf %260, %261 : vector<16x1xf32>
    %263 = arith.mulf %262, %262 : vector<16x1xf32>
    %cst_112 = arith.constant 1.000000e+00 : f32
    %264 = vector.broadcast %cst_112 : f32 to vector<16x1xf32>
    %265 = arith.subf %263, %264 : vector<16x1xf32>
    %266 = arith.divf %265, %251 : vector<16x1xf32>
    %267 = math.sqrt %266 : vector<16x1xf32>
    %c0_i32_113 = arith.constant 0 : i32
    %268 = vector.broadcast %c0_i32_113 : i32 to vector<16x128xi32>
    %269 = arith.cmpi eq, %236, %268 : vector<16x128xi32>
    %270 = vector.broadcast %267 : vector<16x1xf32> to vector<16x128xf32>
    %271 = arith.mulf %235, %270 : vector<16x128xf32>
    %272 = vector.shape_cast %262 : vector<16x1xf32> to vector<16x1xf32>
    %273 = vector.broadcast %272 : vector<16x1xf32> to vector<16x128xf32>
    %274 = arith.select %269, %273, %271 : vector<16x128xi1>, vector<16x128xf32>
    %cst_114 = arith.constant 0.000000e+00 : f32
    %275 = vector.broadcast %cst_114 : f32 to vector<16x128xf32>
    %276 = arith.maximumf %274, %275 : vector<16x128xf32>
    %277 = arith.truncf %276 : vector<16x128xf32> to vector<16x128xbf16>
    %cst_115 = arith.constant dense<0.000000e+00> : vector<16x128xf32>
    %278 = tpu.matmul %277, %226, %cst_115 {dimension_numbers = #tpu.dot_dimension_numbers<[1], [0], [0], [1], [0, 0, 1, 1], [], []>} : vector<16x128xbf16>, vector<128x128xbf16>, vector<16x128xf32> -> vector<16x128xf32>
    %279 = vector.broadcast %227 : vector<1x128xf32> to vector<16x128xf32>
    %280 = arith.addf %278, %279 : vector<16x128xf32>
    %281 = tpu.iota {dimensions = array<i32: 1>} : vector<16x128xi32>
    %c0_i32_116 = arith.constant 0 : i32
    %282 = vector.broadcast %c0_i32_116 : i32 to vector<16x128xi32>
    %283 = arith.cmpi eq, %281, %282 : vector<16x128xi32>
    %cst_117 = arith.constant 0.000000e+00 : f32
    %284 = vector.broadcast %cst_117 : f32 to vector<16x128xf32>
    %285 = arith.select %283, %280, %284 : vector<16x128xi1>, vector<16x128xf32>
    %cst_118 = arith.constant dense<0.000000e+00> : vector<16xf32>
    %286 = vector.multi_reduction <add>, %285, %cst_118 [1] : vector<16x128xf32> to vector<16xf32>
    %287 = vector.shape_cast %286 : vector<16xf32> to vector<16x1xf32>
    %c0_i32_119 = arith.constant 0 : i32
    %288 = vector.broadcast %c0_i32_119 : i32 to vector<16x128xi32>
    %289 = arith.cmpi eq, %281, %288 : vector<16x128xi32>
    %290 = arith.mulf %280, %280 : vector<16x128xf32>
    %cst_120 = arith.constant 0.000000e+00 : f32
    %291 = vector.broadcast %cst_120 : f32 to vector<16x128xf32>
    %292 = arith.select %289, %291, %290 : vector<16x128xi1>, vector<16x128xf32>
    %cst_121 = arith.constant dense<0.000000e+00> : vector<16xf32>
    %293 = vector.multi_reduction <add>, %292, %cst_121 [1] : vector<16x128xf32> to vector<16xf32>
    %294 = vector.shape_cast %293 : vector<16xf32> to vector<16x1xf32>
    %cst_122 = arith.constant 9.99999993E-9 : f32
    %295 = vector.broadcast %cst_122 : f32 to vector<16x1xf32>
    %296 = arith.maximumf %295, %294 : vector<16x1xf32>
    %cst_123 = arith.constant 5.000000e-01 : f32
    %297 = vector.broadcast %cst_123 : f32 to vector<16x1xf32>
    %298 = arith.mulf %297, %287 : vector<16x1xf32>
    %299 = math.tanh %298 : vector<16x1xf32>
    %cst_124 = arith.constant 1.000000e+00 : f32
    %300 = vector.broadcast %cst_124 : f32 to vector<16x1xf32>
    %301 = arith.addf %299, %300 : vector<16x1xf32>
    %cst_125 = arith.constant 5.000000e-01 : f32
    %302 = vector.broadcast %cst_125 : f32 to vector<16x1xf32>
    %303 = arith.mulf %302, %301 : vector<16x1xf32>
    %cst_126 = arith.constant 1.000000e+01 : f32
    %304 = vector.broadcast %cst_126 : f32 to vector<16x1xf32>
    %305 = arith.mulf %303, %304 : vector<16x1xf32>
    %cst_127 = arith.constant 1.100000e+00 : f32
    %306 = vector.broadcast %cst_127 : f32 to vector<16x1xf32>
    %307 = arith.addf %305, %306 : vector<16x1xf32>
    %308 = arith.mulf %307, %307 : vector<16x1xf32>
    %cst_128 = arith.constant 1.000000e+00 : f32
    %309 = vector.broadcast %cst_128 : f32 to vector<16x1xf32>
    %310 = arith.subf %308, %309 : vector<16x1xf32>
    %311 = arith.divf %310, %296 : vector<16x1xf32>
    %312 = math.sqrt %311 : vector<16x1xf32>
    %c0_i32_129 = arith.constant 0 : i32
    %313 = vector.broadcast %c0_i32_129 : i32 to vector<16x128xi32>
    %314 = arith.cmpi eq, %281, %313 : vector<16x128xi32>
    %315 = vector.broadcast %312 : vector<16x1xf32> to vector<16x128xf32>
    %316 = arith.mulf %280, %315 : vector<16x128xf32>
    %317 = vector.shape_cast %307 : vector<16x1xf32> to vector<16x1xf32>
    %318 = vector.broadcast %317 : vector<16x1xf32> to vector<16x128xf32>
    %319 = arith.select %314, %318, %316 : vector<16x128xi1>, vector<16x128xf32>
    %320 = arith.truncf %319 : vector<16x128xf32> to vector<16x128xbf16>
    %cst_130 = arith.constant dense<0.000000e+00> : vector<16x128xf32>
    %321 = tpu.matmul %1, %320, %cst_130 {dimension_numbers = #tpu.dot_dimension_numbers<[1], [0], [0], [1], [0, 0, 1, 1], [], []>} : vector<16x16xbf16>, vector<16x128xbf16>, vector<16x128xf32> -> vector<16x128xf32>
    %322 = tpu.iota {dimensions = array<i32: 1>} : vector<16x128xi32>
    %323 = tpu.iota {dimensions = array<i32: 1>} : vector<16x128xi32>
    %c0_i32_131 = arith.constant 0 : i32
    %324 = vector.broadcast %c0_i32_131 : i32 to vector<16x128xi32>
    %325 = arith.cmpi eq, %323, %324 : vector<16x128xi32>
    %cst_132 = arith.constant 0.000000e+00 : f32
    %326 = vector.broadcast %cst_132 : f32 to vector<16x128xf32>
    %327 = arith.select %325, %321, %326 : vector<16x128xi1>, vector<16x128xf32>
    %cst_133 = arith.constant dense<0.000000e+00> : vector<16xf32>
    %328 = vector.multi_reduction <add>, %327, %cst_133 [1] : vector<16x128xf32> to vector<16xf32>
    %329 = vector.shape_cast %328 : vector<16xf32> to vector<16x1xf32>
    %c0_i32_134 = arith.constant 0 : i32
    %330 = vector.broadcast %c0_i32_134 : i32 to vector<16x128xi32>
    %331 = arith.cmpi eq, %322, %330 : vector<16x128xi32>
    %332 = arith.mulf %321, %321 : vector<16x128xf32>
    %cst_135 = arith.constant 0.000000e+00 : f32
    %333 = vector.broadcast %cst_135 : f32 to vector<16x128xf32>
    %334 = arith.select %331, %333, %332 : vector<16x128xi1>, vector<16x128xf32>
    %cst_136 = arith.constant dense<0.000000e+00> : vector<16xf32>
    %335 = vector.multi_reduction <add>, %334, %cst_136 [1] : vector<16x128xf32> to vector<16xf32>
    %336 = vector.shape_cast %335 : vector<16xf32> to vector<16x1xf32>
    %337 = arith.mulf %329, %329 : vector<16x1xf32>
    %338 = arith.subf %336, %337 : vector<16x1xf32>
    %339 = math.absf %338 : vector<16x1xf32>
    %cst_137 = arith.constant 9.99999993E-9 : f32
    %340 = vector.broadcast %cst_137 : f32 to vector<16x1xf32>
    %341 = arith.maximumf %340, %339 : vector<16x1xf32>
    %342 = math.sqrt %341 : vector<16x1xf32>
    %cst_138 = arith.constant 1.000000e+00 : f32
    %343 = vector.broadcast %cst_138 : f32 to vector<16x1xf32>
    %344 = arith.divf %343, %342 : vector<16x1xf32>
    %345 = vector.broadcast %344 : vector<16x1xf32> to vector<16x128xf32>
    %346 = arith.mulf %321, %345 : vector<16x128xf32>
    %c127_i32 = arith.constant 127 : i32
    %347 = tpu.dynamic_rotate %346 by %c127_i32 dim 1 : vector<16x128xf32>, i32 -> vector<16x128xf32>
    %348 = arith.truncf %222 : vector<16x128xf32> to vector<16x128xbf16>
    %cst_139 = arith.constant dense<0.000000e+00> : vector<16x128xf32>
    %349 = tpu.matmul %348, %228, %cst_139 {dimension_numbers = #tpu.dot_dimension_numbers<[1], [0], [0], [1], [0, 0, 1, 1], [], []>} : vector<16x128xbf16>, vector<128x128xbf16>, vector<16x128xf32> -> vector<16x128xf32>
    %350 = vector.broadcast %229 : vector<1x128xf32> to vector<16x128xf32>
    %351 = arith.addf %349, %350 : vector<16x128xf32>
    %352 = tpu.iota {dimensions = array<i32: 1>} : vector<16x128xi32>
    %c0_i32_140 = arith.constant 0 : i32
    %353 = vector.broadcast %c0_i32_140 : i32 to vector<16x128xi32>
    %354 = arith.cmpi eq, %352, %353 : vector<16x128xi32>
    %cst_141 = arith.constant 0.000000e+00 : f32
    %355 = vector.broadcast %cst_141 : f32 to vector<16x128xf32>
    %356 = arith.select %354, %351, %355 : vector<16x128xi1>, vector<16x128xf32>
    %cst_142 = arith.constant dense<0.000000e+00> : vector<16xf32>
    %357 = vector.multi_reduction <add>, %356, %cst_142 [1] : vector<16x128xf32> to vector<16xf32>
    %358 = vector.shape_cast %357 : vector<16xf32> to vector<16x1xf32>
    %c0_i32_143 = arith.constant 0 : i32
    %359 = vector.broadcast %c0_i32_143 : i32 to vector<16x128xi32>
    %360 = arith.cmpi eq, %352, %359 : vector<16x128xi32>
    %361 = arith.mulf %351, %351 : vector<16x128xf32>
    %cst_144 = arith.constant 0.000000e+00 : f32
    %362 = vector.broadcast %cst_144 : f32 to vector<16x128xf32>
    %363 = arith.select %360, %362, %361 : vector<16x128xi1>, vector<16x128xf32>
    %cst_145 = arith.constant dense<0.000000e+00> : vector<16xf32>
    %364 = vector.multi_reduction <add>, %363, %cst_145 [1] : vector<16x128xf32> to vector<16xf32>
    %365 = vector.shape_cast %364 : vector<16xf32> to vector<16x1xf32>
    %cst_146 = arith.constant 9.99999993E-9 : f32
    %366 = vector.broadcast %cst_146 : f32 to vector<16x1xf32>
    %367 = arith.maximumf %366, %365 : vector<16x1xf32>
    %cst_147 = arith.constant 5.000000e-01 : f32
    %368 = vector.broadcast %cst_147 : f32 to vector<16x1xf32>
    %369 = arith.mulf %368, %358 : vector<16x1xf32>
    %370 = math.tanh %369 : vector<16x1xf32>
    %cst_148 = arith.constant 1.000000e+00 : f32
    %371 = vector.broadcast %cst_148 : f32 to vector<16x1xf32>
    %372 = arith.addf %370, %371 : vector<16x1xf32>
    %cst_149 = arith.constant 5.000000e-01 : f32
    %373 = vector.broadcast %cst_149 : f32 to vector<16x1xf32>
    %374 = arith.mulf %373, %372 : vector<16x1xf32>
    %cst_150 = arith.constant 1.000000e+01 : f32
    %375 = vector.broadcast %cst_150 : f32 to vector<16x1xf32>
    %376 = arith.mulf %374, %375 : vector<16x1xf32>
    %cst_151 = arith.constant 1.100000e+00 : f32
    %377 = vector.broadcast %cst_151 : f32 to vector<16x1xf32>
    %378 = arith.addf %376, %377 : vector<16x1xf32>
    %379 = arith.mulf %378, %378 : vector<16x1xf32>
    %cst_152 = arith.constant 1.000000e+00 : f32
    %380 = vector.broadcast %cst_152 : f32 to vector<16x1xf32>
    %381 = arith.subf %379, %380 : vector<16x1xf32>
    %382 = arith.divf %381, %367 : vector<16x1xf32>
    %383 = math.sqrt %382 : vector<16x1xf32>
    %c0_i32_153 = arith.constant 0 : i32
    %384 = vector.broadcast %c0_i32_153 : i32 to vector<16x128xi32>
    %385 = arith.cmpi eq, %352, %384 : vector<16x128xi32>
    %386 = vector.broadcast %383 : vector<16x1xf32> to vector<16x128xf32>
    %387 = arith.mulf %351, %386 : vector<16x128xf32>
    %388 = vector.shape_cast %378 : vector<16x1xf32> to vector<16x1xf32>
    %389 = vector.broadcast %388 : vector<16x1xf32> to vector<16x128xf32>
    %390 = arith.select %385, %389, %387 : vector<16x128xi1>, vector<16x128xf32>
    %391 = arith.truncf %222 : vector<16x128xf32> to vector<16x128xbf16>
    %cst_154 = arith.constant dense<0.000000e+00> : vector<16x128xf32>
    %392 = tpu.matmul %391, %230, %cst_154 {dimension_numbers = #tpu.dot_dimension_numbers<[1], [0], [0], [1], [0, 0, 1, 1], [], []>} : vector<16x128xbf16>, vector<128x128xbf16>, vector<16x128xf32> -> vector<16x128xf32>
    %393 = vector.broadcast %231 : vector<1x128xf32> to vector<16x128xf32>
    %394 = arith.addf %392, %393 : vector<16x128xf32>
    %395 = tpu.iota {dimensions = array<i32: 1>} : vector<16x128xi32>
    %c0_i32_155 = arith.constant 0 : i32
    %396 = vector.broadcast %c0_i32_155 : i32 to vector<16x128xi32>
    %397 = arith.cmpi eq, %395, %396 : vector<16x128xi32>
    %cst_156 = arith.constant 0.000000e+00 : f32
    %398 = vector.broadcast %cst_156 : f32 to vector<16x128xf32>
    %399 = arith.select %397, %394, %398 : vector<16x128xi1>, vector<16x128xf32>
    %cst_157 = arith.constant dense<0.000000e+00> : vector<16xf32>
    %400 = vector.multi_reduction <add>, %399, %cst_157 [1] : vector<16x128xf32> to vector<16xf32>
    %401 = vector.shape_cast %400 : vector<16xf32> to vector<16x1xf32>
    %c0_i32_158 = arith.constant 0 : i32
    %402 = vector.broadcast %c0_i32_158 : i32 to vector<16x128xi32>
    %403 = arith.cmpi eq, %395, %402 : vector<16x128xi32>
    %404 = arith.mulf %394, %394 : vector<16x128xf32>
    %cst_159 = arith.constant 0.000000e+00 : f32
    %405 = vector.broadcast %cst_159 : f32 to vector<16x128xf32>
    %406 = arith.select %403, %405, %404 : vector<16x128xi1>, vector<16x128xf32>
    %cst_160 = arith.constant dense<0.000000e+00> : vector<16xf32>
    %407 = vector.multi_reduction <add>, %406, %cst_160 [1] : vector<16x128xf32> to vector<16xf32>
    %408 = vector.shape_cast %407 : vector<16xf32> to vector<16x1xf32>
    %cst_161 = arith.constant 9.99999993E-9 : f32
    %409 = vector.broadcast %cst_161 : f32 to vector<16x1xf32>
    %410 = arith.maximumf %409, %408 : vector<16x1xf32>
    %cst_162 = arith.constant 5.000000e-01 : f32
    %411 = vector.broadcast %cst_162 : f32 to vector<16x1xf32>
    %412 = arith.mulf %411, %401 : vector<16x1xf32>
    %413 = math.tanh %412 : vector<16x1xf32>
    %cst_163 = arith.constant 1.000000e+00 : f32
    %414 = vector.broadcast %cst_163 : f32 to vector<16x1xf32>
    %415 = arith.addf %413, %414 : vector<16x1xf32>
    %cst_164 = arith.constant 5.000000e-01 : f32
    %416 = vector.broadcast %cst_164 : f32 to vector<16x1xf32>
    %417 = arith.mulf %416, %415 : vector<16x1xf32>
    %cst_165 = arith.constant 1.000000e+01 : f32
    %418 = vector.broadcast %cst_165 : f32 to vector<16x1xf32>
    %419 = arith.mulf %417, %418 : vector<16x1xf32>
    %cst_166 = arith.constant 1.100000e+00 : f32
    %420 = vector.broadcast %cst_166 : f32 to vector<16x1xf32>
    %421 = arith.addf %419, %420 : vector<16x1xf32>
    %422 = arith.mulf %421, %421 : vector<16x1xf32>
    %cst_167 = arith.constant 1.000000e+00 : f32
    %423 = vector.broadcast %cst_167 : f32 to vector<16x1xf32>
    %424 = arith.subf %422, %423 : vector<16x1xf32>
    %425 = arith.divf %424, %410 : vector<16x1xf32>
    %426 = math.sqrt %425 : vector<16x1xf32>
    %c0_i32_168 = arith.constant 0 : i32
    %427 = vector.broadcast %c0_i32_168 : i32 to vector<16x128xi32>
    %428 = arith.cmpi eq, %395, %427 : vector<16x128xi32>
    %429 = vector.broadcast %426 : vector<16x1xf32> to vector<16x128xf32>
    %430 = arith.mulf %394, %429 : vector<16x128xf32>
    %431 = vector.shape_cast %421 : vector<16x1xf32> to vector<16x1xf32>
    %432 = vector.broadcast %431 : vector<16x1xf32> to vector<16x128xf32>
    %433 = arith.select %428, %432, %430 : vector<16x128xi1>, vector<16x128xf32>
    %434 = tpu.iota {dimensions = array<i32: 1>} : vector<16x128xi32>
    %c0_i32_169 = arith.constant 0 : i32
    %435 = vector.broadcast %c0_i32_169 : i32 to vector<16x128xi32>
    %436 = arith.cmpi eq, %434, %435 : vector<16x128xi32>
    %cst_170 = arith.constant 0.000000e+00 : f32
    %437 = vector.broadcast %cst_170 : f32 to vector<16x128xf32>
    %438 = arith.subf %437, %390 : vector<16x128xf32>
    %439 = arith.select %436, %438, %390 : vector<16x128xi1>, vector<16x128xf32>
    %440 = arith.truncf %439 : vector<16x128xf32> to vector<16x128xbf16>
    %441 = arith.truncf %433 : vector<16x128xf32> to vector<16x128xbf16>
    %cst_171 = arith.constant dense<0.000000e+00> : vector<16x16xf32>
    %442 = tpu.matmul %440, %441, %cst_171 {dimension_numbers = #tpu.dot_dimension_numbers<[1], [1], [0], [0], [0, 0, 1, 0], [], []>} : vector<16x128xbf16>, vector<16x128xbf16>, vector<16x16xf32> -> vector<16x16xf32>
    %cst_172 = arith.constant 2.000000e+00 : f32
    %443 = vector.broadcast %cst_172 : f32 to vector<16x16xf32>
    %444 = arith.mulf %443, %442 : vector<16x16xf32>
    %cst_173 = arith.constant 2.000000e+00 : f32
    %445 = vector.broadcast %cst_173 : f32 to vector<16x16xf32>
    %446 = arith.addf %445, %444 : vector<16x16xf32>
    %cst_174 = arith.constant 0.333333343 : f32
    %447 = vector.broadcast %cst_174 : f32 to vector<16x16xf32>
    %448 = arith.mulf %446, %447 : vector<16x16xf32>
    %cst_175 = arith.constant 2.000000e+01 : f32
    %449 = vector.broadcast %cst_175 : f32 to vector<16x16xf32>
    %450 = arith.addf %448, %449 : vector<16x16xf32>
    %cst_176 = arith.constant 5.000000e-01 : f32
    %451 = vector.broadcast %cst_176 : f32 to vector<16x16xf32>
    %452 = arith.mulf %451, %450 : vector<16x16xf32>
    %453 = math.tanh %452 : vector<16x16xf32>
    %cst_177 = arith.constant 1.000000e+00 : f32
    %454 = vector.broadcast %cst_177 : f32 to vector<16x16xf32>
    %455 = arith.addf %453, %454 : vector<16x16xf32>
    %cst_178 = arith.constant 5.000000e-01 : f32
    %456 = vector.broadcast %cst_178 : f32 to vector<16x16xf32>
    %457 = arith.mulf %456, %455 : vector<16x16xf32>
    %458 = arith.mulf %457, %0 : vector<16x16xf32>
    %459 = arith.truncf %458 : vector<16x16xf32> to vector<16x16xbf16>
    %460 = arith.truncf %347 : vector<16x128xf32> to vector<16x128xbf16>
    %cst_179 = arith.constant dense<0.000000e+00> : vector<16x128xf32>
    %461 = tpu.matmul %459, %460, %cst_179 {dimension_numbers = #tpu.dot_dimension_numbers<[1], [0], [0], [1], [0, 0, 1, 1], [], []>} : vector<16x16xbf16>, vector<16x128xbf16>, vector<16x128xf32> -> vector<16x128xf32>
    %462 = tpu.iota {dimensions = array<i32: 1>} : vector<16x128xi32>
    %c8_i32 = arith.constant 8 : i32
    %463 = vector.broadcast %c8_i32 : i32 to vector<16x128xi32>
    %464 = arith.cmpi slt, %462, %463 : vector<16x128xi32>
    %cst_180 = arith.constant -1.000000e+30 : f32
    %465 = vector.broadcast %cst_180 : f32 to vector<16x128xf32>
    %466 = arith.select %464, %461, %465 : vector<16x128xi1>, vector<16x128xf32>
    %cst_181 = arith.constant dense<0xFF800000> : vector<16xf32>
    %467 = vector.multi_reduction <maximumf>, %466, %cst_181 [1] : vector<16x128xf32> to vector<16xf32>
    %468 = vector.shape_cast %467 : vector<16xf32> to vector<16x1xf32>
    %469 = vector.broadcast %468 : vector<16x1xf32> to vector<16x128xf32>
    %470 = arith.subf %466, %469 : vector<16x128xf32>
    %cst_182 = arith.constant 1.000000e+01 : f32
    %471 = vector.broadcast %cst_182 : f32 to vector<16x128xf32>
    %472 = arith.mulf %470, %471 : vector<16x128xf32>
    %473 = math.exp %472 : vector<16x128xf32>
    %cst_183 = arith.constant dense<0.000000e+00> : vector<16xf32>
    %474 = vector.multi_reduction <add>, %473, %cst_183 [1] : vector<16x128xf32> to vector<16xf32>
    %475 = vector.shape_cast %474 : vector<16xf32> to vector<16x1xf32>
    %cst_184 = arith.constant 1.000000e+00 : f32
    %476 = vector.broadcast %cst_184 : f32 to vector<16x1xf32>
    %477 = arith.divf %476, %475 : vector<16x1xf32>
    %478 = vector.broadcast %477 : vector<16x1xf32> to vector<16x128xf32>
    %479 = arith.mulf %473, %478 : vector<16x128xf32>
    %480 = arith.truncf %479 : vector<16x128xf32> to vector<16x128xbf16>
    %481 = arith.truncf %222 : vector<16x128xf32> to vector<16x128xbf16>
    %cst_185 = arith.constant dense<0.000000e+00> : vector<128x128xf32>
    %482 = tpu.matmul %480, %481, %cst_185 {dimension_numbers = #tpu.dot_dimension_numbers<[0], [0], [1], [1], [0, 1, 1, 1], [], []>} : vector<16x128xbf16>, vector<16x128xbf16>, vector<128x128xf32> -> vector<128x128xf32>
    %483 = vector.extract_strided_slice %482 {offsets = [0, 0], sizes = [8, 128], strides = [1, 1]} : vector<128x128xf32> to vector<8x128xf32>
    %484 = tpu.iota {dimensions = array<i32: 1>} : vector<8x128xi32>
    %485 = tpu.iota {dimensions = array<i32: 1>} : vector<8x128xi32>
    %c0_i32_186 = arith.constant 0 : i32
    %486 = vector.broadcast %c0_i32_186 : i32 to vector<8x128xi32>
    %487 = arith.cmpi eq, %485, %486 : vector<8x128xi32>
    %cst_187 = arith.constant 0.000000e+00 : f32
    %488 = vector.broadcast %cst_187 : f32 to vector<8x128xf32>
    %489 = arith.select %487, %483, %488 : vector<8x128xi1>, vector<8x128xf32>
    %cst_188 = arith.constant dense<0.000000e+00> : vector<8xf32>
    %490 = vector.multi_reduction <add>, %489, %cst_188 [1] : vector<8x128xf32> to vector<8xf32>
    %491 = vector.shape_cast %490 : vector<8xf32> to vector<8x1xf32>
    %c0_i32_189 = arith.constant 0 : i32
    %492 = vector.broadcast %c0_i32_189 : i32 to vector<8x128xi32>
    %493 = arith.cmpi eq, %484, %492 : vector<8x128xi32>
    %494 = arith.mulf %483, %483 : vector<8x128xf32>
    %cst_190 = arith.constant 0.000000e+00 : f32
    %495 = vector.broadcast %cst_190 : f32 to vector<8x128xf32>
    %496 = arith.select %493, %495, %494 : vector<8x128xi1>, vector<8x128xf32>
    %cst_191 = arith.constant dense<0.000000e+00> : vector<8xf32>
    %497 = vector.multi_reduction <add>, %496, %cst_191 [1] : vector<8x128xf32> to vector<8xf32>
    %498 = vector.shape_cast %497 : vector<8xf32> to vector<8x1xf32>
    %499 = arith.mulf %491, %491 : vector<8x1xf32>
    %500 = arith.subf %498, %499 : vector<8x1xf32>
    %501 = math.absf %500 : vector<8x1xf32>
    %cst_192 = arith.constant 9.99999993E-9 : f32
    %502 = vector.broadcast %cst_192 : f32 to vector<8x1xf32>
    %503 = arith.maximumf %502, %501 : vector<8x1xf32>
    %504 = math.sqrt %503 : vector<8x1xf32>
    %cst_193 = arith.constant 1.000000e+00 : f32
    %505 = vector.broadcast %cst_193 : f32 to vector<8x1xf32>
    %506 = arith.divf %505, %504 : vector<8x1xf32>
    %507 = vector.broadcast %506 : vector<8x1xf32> to vector<8x128xf32>
    %508 = arith.mulf %483, %507 : vector<8x128xf32>
    %509 = arith.truncf %479 : vector<16x128xf32> to vector<16x128xbf16>
    %510 = arith.truncf %0 : vector<16x16xf32> to vector<16x16xbf16>
    %cst_194 = arith.constant dense<0.000000e+00> : vector<128x16xf32>
    %511 = tpu.matmul %509, %510, %cst_194 {dimension_numbers = #tpu.dot_dimension_numbers<[0], [0], [1], [1], [0, 1, 1, 1], [], []>} : vector<16x128xbf16>, vector<16x16xbf16>, vector<128x16xf32> -> vector<128x16xf32>
    %512 = vector.extract_strided_slice %511 {offsets = [0, 0], sizes = [8, 16], strides = [1, 1]} : vector<128x16xf32> to vector<8x16xf32>
    %513 = arith.truncf %512 : vector<8x16xf32> to vector<8x16xbf16>
    %514 = arith.truncf %479 : vector<16x128xf32> to vector<16x128xbf16>
    %cst_195 = arith.constant dense<0.000000e+00> : vector<8x128xf32>
    %515 = tpu.matmul %513, %514, %cst_195 {dimension_numbers = #tpu.dot_dimension_numbers<[1], [0], [0], [1], [0, 0, 1, 1], [], []>} : vector<8x16xbf16>, vector<16x128xbf16>, vector<8x128xf32> -> vector<8x128xf32>
    %516 = tpu.iota {dimensions = array<i32: 0>} : vector<8x128xi32>
    %517 = tpu.iota {dimensions = array<i32: 1>} : vector<8x128xi32>
    %518 = arith.cmpi eq, %516, %517 : vector<8x128xi32>
    %cst_196 = arith.constant 0.000000e+00 : f32
    %519 = vector.broadcast %cst_196 : f32 to vector<8x128xf32>
    %520 = arith.select %518, %519, %515 : vector<8x128xi1>, vector<8x128xf32>
    %c8_i32_197 = arith.constant 8 : i32
    %521 = vector.broadcast %c8_i32_197 : i32 to vector<8x128xi32>
    %522 = arith.cmpi slt, %516, %521 : vector<8x128xi32>
    %c8_i32_198 = arith.constant 8 : i32
    %523 = vector.broadcast %c8_i32_198 : i32 to vector<8x128xi32>
    %524 = arith.cmpi slt, %517, %523 : vector<8x128xi32>
    %525 = arith.andi %522, %524 : vector<8x128xi1>
    %cst_199 = arith.constant 1.000000e+01 : f32
    %526 = vector.broadcast %cst_199 : f32 to vector<8x128xf32>
    %527 = arith.mulf %520, %526 : vector<8x128xf32>
    %cst_200 = arith.constant 5.000000e-01 : f32
    %528 = vector.broadcast %cst_200 : f32 to vector<8x128xf32>
    %529 = arith.mulf %528, %527 : vector<8x128xf32>
    %530 = math.tanh %529 : vector<8x128xf32>
    %cst_201 = arith.constant 1.000000e+00 : f32
    %531 = vector.broadcast %cst_201 : f32 to vector<8x128xf32>
    %532 = arith.addf %530, %531 : vector<8x128xf32>
    %cst_202 = arith.constant 5.000000e-01 : f32
    %533 = vector.broadcast %cst_202 : f32 to vector<8x128xf32>
    %534 = arith.mulf %533, %532 : vector<8x128xf32>
    %cst_203 = arith.constant 0.000000e+00 : f32
    %535 = vector.broadcast %cst_203 : f32 to vector<8x128xf32>
    %536 = arith.select %525, %534, %535 : vector<8x128xi1>, vector<8x128xf32>
    %c0_204 = arith.constant 0 : index
    %c0_205 = arith.constant 0 : index
    %537 = vector.load %arg23[%c0_204, %c0_205] : memref<8x128xf32, #tpu.memory_space<vmem>>, vector<8x128xf32>
    tpu.vector_store %arg23[%c0_204, %c0_205], %508 {strides = array<i32>} : memref<8x128xf32, #tpu.memory_space<vmem>>, vector<8x128xf32>,
    %c0_206 = arith.constant 0 : index
    %c0_207 = arith.constant 0 : index
    %538 = vector.load %arg24[%c0_206, %c0_207] : memref<8x128xf32, #tpu.memory_space<vmem>>, vector<8x128xf32>
    tpu.vector_store %arg24[%c0_206, %c0_207], %536 {strides = array<i32>} : memref<8x128xf32, #tpu.memory_space<vmem>>, vector<8x128xf32>,
    %c0_208 = arith.constant 0 : index
    %c0_209 = arith.constant 0 : index
    %539 = vector.load %arg25[%c0_208, %c0_209] : memref<16x128xf32, #tpu.memory_space<vmem>>, vector<16x128xf32>
    tpu.vector_store %arg25[%c0_208, %c0_209], %479 {strides = array<i32>} : memref<16x128xf32, #tpu.memory_space<vmem>>, vector<16x128xf32>,
    %540 = vector.extract_strided_slice %536 {offsets = [0, 0], sizes = [8, 8], strides = [1, 1]} : vector<8x128xf32> to vector<8x8xf32>
    %541 = arith.truncf %540 : vector<8x8xf32> to vector<8x8xbf16>
    %c0_210 = arith.constant 0 : index
    %c0_211 = arith.constant 0 : index
    %542 = vector.load %arg14[%c0_210, %c0_211] : memref<128x128xbf16, #tpu.memory_space<vmem>>, vector<128x128xbf16>
    %c0_212 = arith.constant 0 : index
    %c0_213 = arith.constant 0 : index
    %543 = vector.load %arg15[%c0_212, %c0_213] : memref<1x128xf32, #tpu.memory_space<vmem>>, vector<1x128xf32>
    %c0_214 = arith.constant 0 : index
    %c0_215 = arith.constant 0 : index
    %544 = vector.load %arg16[%c0_214, %c0_215] : memref<128x128xbf16, #tpu.memory_space<vmem>>, vector<128x128xbf16>
    %c0_216 = arith.constant 0 : index
    %c0_217 = arith.constant 0 : index
    %545 = vector.load %arg17[%c0_216, %c0_217] : memref<1x128xf32, #tpu.memory_space<vmem>>, vector<1x128xf32>
    %c0_218 = arith.constant 0 : index
    %c0_219 = arith.constant 0 : index
    %546 = vector.load %arg18[%c0_218, %c0_219] : memref<128x128xbf16, #tpu.memory_space<vmem>>, vector<128x128xbf16>
    %c0_220 = arith.constant 0 : index
    %c0_221 = arith.constant 0 : index
    %547 = vector.load %arg19[%c0_220, %c0_221] : memref<1x128xf32, #tpu.memory_space<vmem>>, vector<1x128xf32>
    %c0_222 = arith.constant 0 : index
    %c0_223 = arith.constant 0 : index
    %548 = vector.load %arg20[%c0_222, %c0_223] : memref<128x128xbf16, #tpu.memory_space<vmem>>, vector<128x128xbf16>
    %c0_224 = arith.constant 0 : index
    %c0_225 = arith.constant 0 : index
    %549 = vector.load %arg21[%c0_224, %c0_225] : memref<1x128xf32, #tpu.memory_space<vmem>>, vector<1x128xf32>
    %550 = arith.truncf %508 : vector<8x128xf32> to vector<8x128xbf16>
    %cst_226 = arith.constant dense<0.000000e+00> : vector<8x128xf32>
    %551 = tpu.matmul %550, %542, %cst_226 {dimension_numbers = #tpu.dot_dimension_numbers<[1], [0], [0], [1], [0, 0, 1, 1], [], []>} : vector<8x128xbf16>, vector<128x128xbf16>, vector<8x128xf32> -> vector<8x128xf32>
    %552 = vector.broadcast %543 : vector<1x128xf32> to vector<8x128xf32>
    %553 = arith.addf %551, %552 : vector<8x128xf32>
    %554 = tpu.iota {dimensions = array<i32: 1>} : vector<8x128xi32>
    %c0_i32_227 = arith.constant 0 : i32
    %555 = vector.broadcast %c0_i32_227 : i32 to vector<8x128xi32>
    %556 = arith.cmpi eq, %554, %555 : vector<8x128xi32>
    %cst_228 = arith.constant 0.000000e+00 : f32
    %557 = vector.broadcast %cst_228 : f32 to vector<8x128xf32>
    %558 = arith.select %556, %553, %557 : vector<8x128xi1>, vector<8x128xf32>
    %cst_229 = arith.constant dense<0.000000e+00> : vector<8xf32>
    %559 = vector.multi_reduction <add>, %558, %cst_229 [1] : vector<8x128xf32> to vector<8xf32>
    %560 = vector.shape_cast %559 : vector<8xf32> to vector<8x1xf32>
    %c0_i32_230 = arith.constant 0 : i32
    %561 = vector.broadcast %c0_i32_230 : i32 to vector<8x128xi32>
    %562 = arith.cmpi eq, %554, %561 : vector<8x128xi32>
    %563 = arith.mulf %553, %553 : vector<8x128xf32>
    %cst_231 = arith.constant 0.000000e+00 : f32
    %564 = vector.broadcast %cst_231 : f32 to vector<8x128xf32>
    %565 = arith.select %562, %564, %563 : vector<8x128xi1>, vector<8x128xf32>
    %cst_232 = arith.constant dense<0.000000e+00> : vector<8xf32>
    %566 = vector.multi_reduction <add>, %565, %cst_232 [1] : vector<8x128xf32> to vector<8xf32>
    %567 = vector.shape_cast %566 : vector<8xf32> to vector<8x1xf32>
    %cst_233 = arith.constant 9.99999993E-9 : f32
    %568 = vector.broadcast %cst_233 : f32 to vector<8x1xf32>
    %569 = arith.maximumf %568, %567 : vector<8x1xf32>
    %cst_234 = arith.constant 5.000000e-01 : f32
    %570 = vector.broadcast %cst_234 : f32 to vector<8x1xf32>
    %571 = arith.mulf %570, %560 : vector<8x1xf32>
    %572 = math.tanh %571 : vector<8x1xf32>
    %cst_235 = arith.constant 1.000000e+00 : f32
    %573 = vector.broadcast %cst_235 : f32 to vector<8x1xf32>
    %574 = arith.addf %572, %573 : vector<8x1xf32>
    %cst_236 = arith.constant 5.000000e-01 : f32
    %575 = vector.broadcast %cst_236 : f32 to vector<8x1xf32>
    %576 = arith.mulf %575, %574 : vector<8x1xf32>
    %cst_237 = arith.constant 1.000000e+01 : f32
    %577 = vector.broadcast %cst_237 : f32 to vector<8x1xf32>
    %578 = arith.mulf %576, %577 : vector<8x1xf32>
    %cst_238 = arith.constant 1.100000e+00 : f32
    %579 = vector.broadcast %cst_238 : f32 to vector<8x1xf32>
    %580 = arith.addf %578, %579 : vector<8x1xf32>
    %581 = arith.mulf %580, %580 : vector<8x1xf32>
    %cst_239 = arith.constant 1.000000e+00 : f32
    %582 = vector.broadcast %cst_239 : f32 to vector<8x1xf32>
    %583 = arith.subf %581, %582 : vector<8x1xf32>
    %584 = arith.divf %583, %569 : vector<8x1xf32>
    %585 = math.sqrt %584 : vector<8x1xf32>
    %c0_i32_240 = arith.constant 0 : i32
    %586 = vector.broadcast %c0_i32_240 : i32 to vector<8x128xi32>
    %587 = arith.cmpi eq, %554, %586 : vector<8x128xi32>
    %588 = vector.broadcast %585 : vector<8x1xf32> to vector<8x128xf32>
    %589 = arith.mulf %553, %588 : vector<8x128xf32>
    %590 = vector.shape_cast %580 : vector<8x1xf32> to vector<8x1xf32>
    %591 = vector.broadcast %590 : vector<8x1xf32> to vector<8x128xf32>
    %592 = arith.select %587, %591, %589 : vector<8x128xi1>, vector<8x128xf32>
    %cst_241 = arith.constant 0.000000e+00 : f32
    %593 = vector.broadcast %cst_241 : f32 to vector<8x128xf32>
    %594 = arith.maximumf %592, %593 : vector<8x128xf32>
    %595 = arith.truncf %594 : vector<8x128xf32> to vector<8x128xbf16>
    %cst_242 = arith.constant dense<0.000000e+00> : vector<8x128xf32>
    %596 = tpu.matmul %595, %544, %cst_242 {dimension_numbers = #tpu.dot_dimension_numbers<[1], [0], [0], [1], [0, 0, 1, 1], [], []>} : vector<8x128xbf16>, vector<128x128xbf16>, vector<8x128xf32> -> vector<8x128xf32>
    %597 = vector.broadcast %545 : vector<1x128xf32> to vector<8x128xf32>
    %598 = arith.addf %596, %597 : vector<8x128xf32>
    %599 = tpu.iota {dimensions = array<i32: 1>} : vector<8x128xi32>
    %c0_i32_243 = arith.constant 0 : i32
    %600 = vector.broadcast %c0_i32_243 : i32 to vector<8x128xi32>
    %601 = arith.cmpi eq, %599, %600 : vector<8x128xi32>
    %cst_244 = arith.constant 0.000000e+00 : f32
    %602 = vector.broadcast %cst_244 : f32 to vector<8x128xf32>
    %603 = arith.select %601, %598, %602 : vector<8x128xi1>, vector<8x128xf32>
    %cst_245 = arith.constant dense<0.000000e+00> : vector<8xf32>
    %604 = vector.multi_reduction <add>, %603, %cst_245 [1] : vector<8x128xf32> to vector<8xf32>
    %605 = vector.shape_cast %604 : vector<8xf32> to vector<8x1xf32>
    %c0_i32_246 = arith.constant 0 : i32
    %606 = vector.broadcast %c0_i32_246 : i32 to vector<8x128xi32>
    %607 = arith.cmpi eq, %599, %606 : vector<8x128xi32>
    %608 = arith.mulf %598, %598 : vector<8x128xf32>
    %cst_247 = arith.constant 0.000000e+00 : f32
    %609 = vector.broadcast %cst_247 : f32 to vector<8x128xf32>
    %610 = arith.select %607, %609, %608 : vector<8x128xi1>, vector<8x128xf32>
    %cst_248 = arith.constant dense<0.000000e+00> : vector<8xf32>
    %611 = vector.multi_reduction <add>, %610, %cst_248 [1] : vector<8x128xf32> to vector<8xf32>
    %612 = vector.shape_cast %611 : vector<8xf32> to vector<8x1xf32>
    %cst_249 = arith.constant 9.99999993E-9 : f32
    %613 = vector.broadcast %cst_249 : f32 to vector<8x1xf32>
    %614 = arith.maximumf %613, %612 : vector<8x1xf32>
    %cst_250 = arith.constant 5.000000e-01 : f32
    %615 = vector.broadcast %cst_250 : f32 to vector<8x1xf32>
    %616 = arith.mulf %615, %605 : vector<8x1xf32>
    %617 = math.tanh %616 : vector<8x1xf32>
    %cst_251 = arith.constant 1.000000e+00 : f32
    %618 = vector.broadcast %cst_251 : f32 to vector<8x1xf32>
    %619 = arith.addf %617, %618 : vector<8x1xf32>
    %cst_252 = arith.constant 5.000000e-01 : f32
    %620 = vector.broadcast %cst_252 : f32 to vector<8x1xf32>
    %621 = arith.mulf %620, %619 : vector<8x1xf32>
    %cst_253 = arith.constant 1.000000e+01 : f32
    %622 = vector.broadcast %cst_253 : f32 to vector<8x1xf32>
    %623 = arith.mulf %621, %622 : vector<8x1xf32>
    %cst_254 = arith.constant 1.100000e+00 : f32
    %624 = vector.broadcast %cst_254 : f32 to vector<8x1xf32>
    %625 = arith.addf %623, %624 : vector<8x1xf32>
    %626 = arith.mulf %625, %625 : vector<8x1xf32>
    %cst_255 = arith.constant 1.000000e+00 : f32
    %627 = vector.broadcast %cst_255 : f32 to vector<8x1xf32>
    %628 = arith.subf %626, %627 : vector<8x1xf32>
    %629 = arith.divf %628, %614 : vector<8x1xf32>
    %630 = math.sqrt %629 : vector<8x1xf32>
    %c0_i32_256 = arith.constant 0 : i32
    %631 = vector.broadcast %c0_i32_256 : i32 to vector<8x128xi32>
    %632 = arith.cmpi eq, %599, %631 : vector<8x128xi32>
    %633 = vector.broadcast %630 : vector<8x1xf32> to vector<8x128xf32>
    %634 = arith.mulf %598, %633 : vector<8x128xf32>
    %635 = vector.shape_cast %625 : vector<8x1xf32> to vector<8x1xf32>
    %636 = vector.broadcast %635 : vector<8x1xf32> to vector<8x128xf32>
    %637 = arith.select %632, %636, %634 : vector<8x128xi1>, vector<8x128xf32>
    %638 = arith.truncf %637 : vector<8x128xf32> to vector<8x128xbf16>
    %cst_257 = arith.constant dense<0.000000e+00> : vector<8x128xf32>
    %639 = tpu.matmul %541, %638, %cst_257 {dimension_numbers = #tpu.dot_dimension_numbers<[1], [0], [0], [1], [0, 0, 1, 1], [], []>} : vector<8x8xbf16>, vector<8x128xbf16>, vector<8x128xf32> -> vector<8x128xf32>
    %640 = tpu.iota {dimensions = array<i32: 1>} : vector<8x128xi32>
    %641 = tpu.iota {dimensions = array<i32: 1>} : vector<8x128xi32>
    %c0_i32_258 = arith.constant 0 : i32
    %642 = vector.broadcast %c0_i32_258 : i32 to vector<8x128xi32>
    %643 = arith.cmpi eq, %641, %642 : vector<8x128xi32>
    %cst_259 = arith.constant 0.000000e+00 : f32
    %644 = vector.broadcast %cst_259 : f32 to vector<8x128xf32>
    %645 = arith.select %643, %639, %644 : vector<8x128xi1>, vector<8x128xf32>
    %cst_260 = arith.constant dense<0.000000e+00> : vector<8xf32>
    %646 = vector.multi_reduction <add>, %645, %cst_260 [1] : vector<8x128xf32> to vector<8xf32>
    %647 = vector.shape_cast %646 : vector<8xf32> to vector<8x1xf32>
    %c0_i32_261 = arith.constant 0 : i32
    %648 = vector.broadcast %c0_i32_261 : i32 to vector<8x128xi32>
    %649 = arith.cmpi eq, %640, %648 : vector<8x128xi32>
    %650 = arith.mulf %639, %639 : vector<8x128xf32>
    %cst_262 = arith.constant 0.000000e+00 : f32
    %651 = vector.broadcast %cst_262 : f32 to vector<8x128xf32>
    %652 = arith.select %649, %651, %650 : vector<8x128xi1>, vector<8x128xf32>
    %cst_263 = arith.constant dense<0.000000e+00> : vector<8xf32>
    %653 = vector.multi_reduction <add>, %652, %cst_263 [1] : vector<8x128xf32> to vector<8xf32>
    %654 = vector.shape_cast %653 : vector<8xf32> to vector<8x1xf32>
    %655 = arith.mulf %647, %647 : vector<8x1xf32>
    %656 = arith.subf %654, %655 : vector<8x1xf32>
    %657 = math.absf %656 : vector<8x1xf32>
    %cst_264 = arith.constant 9.99999993E-9 : f32
    %658 = vector.broadcast %cst_264 : f32 to vector<8x1xf32>
    %659 = arith.maximumf %658, %657 : vector<8x1xf32>
    %660 = math.sqrt %659 : vector<8x1xf32>
    %cst_265 = arith.constant 1.000000e+00 : f32
    %661 = vector.broadcast %cst_265 : f32 to vector<8x1xf32>
    %662 = arith.divf %661, %660 : vector<8x1xf32>
    %663 = vector.broadcast %662 : vector<8x1xf32> to vector<8x128xf32>
    %664 = arith.mulf %639, %663 : vector<8x128xf32>
    %c127_i32_266 = arith.constant 127 : i32
    %665 = tpu.dynamic_rotate %664 by %c127_i32_266 dim 1 : vector<8x128xf32>, i32 -> vector<8x128xf32>
    %666 = arith.truncf %508 : vector<8x128xf32> to vector<8x128xbf16>
    %cst_267 = arith.constant dense<0.000000e+00> : vector<8x128xf32>
    %667 = tpu.matmul %666, %546, %cst_267 {dimension_numbers = #tpu.dot_dimension_numbers<[1], [0], [0], [1], [0, 0, 1, 1], [], []>} : vector<8x128xbf16>, vector<128x128xbf16>, vector<8x128xf32> -> vector<8x128xf32>
    %668 = vector.broadcast %547 : vector<1x128xf32> to vector<8x128xf32>
    %669 = arith.addf %667, %668 : vector<8x128xf32>
    %670 = tpu.iota {dimensions = array<i32: 1>} : vector<8x128xi32>
    %c0_i32_268 = arith.constant 0 : i32
    %671 = vector.broadcast %c0_i32_268 : i32 to vector<8x128xi32>
    %672 = arith.cmpi eq, %670, %671 : vector<8x128xi32>
    %cst_269 = arith.constant 0.000000e+00 : f32
    %673 = vector.broadcast %cst_269 : f32 to vector<8x128xf32>
    %674 = arith.select %672, %669, %673 : vector<8x128xi1>, vector<8x128xf32>
    %cst_270 = arith.constant dense<0.000000e+00> : vector<8xf32>
    %675 = vector.multi_reduction <add>, %674, %cst_270 [1] : vector<8x128xf32> to vector<8xf32>
    %676 = vector.shape_cast %675 : vector<8xf32> to vector<8x1xf32>
    %c0_i32_271 = arith.constant 0 : i32
    %677 = vector.broadcast %c0_i32_271 : i32 to vector<8x128xi32>
    %678 = arith.cmpi eq, %670, %677 : vector<8x128xi32>
    %679 = arith.mulf %669, %669 : vector<8x128xf32>
    %cst_272 = arith.constant 0.000000e+00 : f32
    %680 = vector.broadcast %cst_272 : f32 to vector<8x128xf32>
    %681 = arith.select %678, %680, %679 : vector<8x128xi1>, vector<8x128xf32>
    %cst_273 = arith.constant dense<0.000000e+00> : vector<8xf32>
    %682 = vector.multi_reduction <add>, %681, %cst_273 [1] : vector<8x128xf32> to vector<8xf32>
    %683 = vector.shape_cast %682 : vector<8xf32> to vector<8x1xf32>
    %cst_274 = arith.constant 9.99999993E-9 : f32
    %684 = vector.broadcast %cst_274 : f32 to vector<8x1xf32>
    %685 = arith.maximumf %684, %683 : vector<8x1xf32>
    %cst_275 = arith.constant 5.000000e-01 : f32
    %686 = vector.broadcast %cst_275 : f32 to vector<8x1xf32>
    %687 = arith.mulf %686, %676 : vector<8x1xf32>
    %688 = math.tanh %687 : vector<8x1xf32>
    %cst_276 = arith.constant 1.000000e+00 : f32
    %689 = vector.broadcast %cst_276 : f32 to vector<8x1xf32>
    %690 = arith.addf %688, %689 : vector<8x1xf32>
    %cst_277 = arith.constant 5.000000e-01 : f32
    %691 = vector.broadcast %cst_277 : f32 to vector<8x1xf32>
    %692 = arith.mulf %691, %690 : vector<8x1xf32>
    %cst_278 = arith.constant 1.000000e+01 : f32
    %693 = vector.broadcast %cst_278 : f32 to vector<8x1xf32>
    %694 = arith.mulf %692, %693 : vector<8x1xf32>
    %cst_279 = arith.constant 1.100000e+00 : f32
    %695 = vector.broadcast %cst_279 : f32 to vector<8x1xf32>
    %696 = arith.addf %694, %695 : vector<8x1xf32>
    %697 = arith.mulf %696, %696 : vector<8x1xf32>
    %cst_280 = arith.constant 1.000000e+00 : f32
    %698 = vector.broadcast %cst_280 : f32 to vector<8x1xf32>
    %699 = arith.subf %697, %698 : vector<8x1xf32>
    %700 = arith.divf %699, %685 : vector<8x1xf32>
    %701 = math.sqrt %700 : vector<8x1xf32>
    %c0_i32_281 = arith.constant 0 : i32
    %702 = vector.broadcast %c0_i32_281 : i32 to vector<8x128xi32>
    %703 = arith.cmpi eq, %670, %702 : vector<8x128xi32>
    %704 = vector.broadcast %701 : vector<8x1xf32> to vector<8x128xf32>
    %705 = arith.mulf %669, %704 : vector<8x128xf32>
    %706 = vector.shape_cast %696 : vector<8x1xf32> to vector<8x1xf32>
    %707 = vector.broadcast %706 : vector<8x1xf32> to vector<8x128xf32>
    %708 = arith.select %703, %707, %705 : vector<8x128xi1>, vector<8x128xf32>
    %709 = arith.truncf %508 : vector<8x128xf32> to vector<8x128xbf16>
    %cst_282 = arith.constant dense<0.000000e+00> : vector<8x128xf32>
    %710 = tpu.matmul %709, %548, %cst_282 {dimension_numbers = #tpu.dot_dimension_numbers<[1], [0], [0], [1], [0, 0, 1, 1], [], []>} : vector<8x128xbf16>, vector<128x128xbf16>, vector<8x128xf32> -> vector<8x128xf32>
    %711 = vector.broadcast %549 : vector<1x128xf32> to vector<8x128xf32>
    %712 = arith.addf %710, %711 : vector<8x128xf32>
    %713 = tpu.iota {dimensions = array<i32: 1>} : vector<8x128xi32>
    %c0_i32_283 = arith.constant 0 : i32
    %714 = vector.broadcast %c0_i32_283 : i32 to vector<8x128xi32>
    %715 = arith.cmpi eq, %713, %714 : vector<8x128xi32>
    %cst_284 = arith.constant 0.000000e+00 : f32
    %716 = vector.broadcast %cst_284 : f32 to vector<8x128xf32>
    %717 = arith.select %715, %712, %716 : vector<8x128xi1>, vector<8x128xf32>
    %cst_285 = arith.constant dense<0.000000e+00> : vector<8xf32>
    %718 = vector.multi_reduction <add>, %717, %cst_285 [1] : vector<8x128xf32> to vector<8xf32>
    %719 = vector.shape_cast %718 : vector<8xf32> to vector<8x1xf32>
    %c0_i32_286 = arith.constant 0 : i32
    %720 = vector.broadcast %c0_i32_286 : i32 to vector<8x128xi32>
    %721 = arith.cmpi eq, %713, %720 : vector<8x128xi32>
    %722 = arith.mulf %712, %712 : vector<8x128xf32>
    %cst_287 = arith.constant 0.000000e+00 : f32
    %723 = vector.broadcast %cst_287 : f32 to vector<8x128xf32>
    %724 = arith.select %721, %723, %722 : vector<8x128xi1>, vector<8x128xf32>
    %cst_288 = arith.constant dense<0.000000e+00> : vector<8xf32>
    %725 = vector.multi_reduction <add>, %724, %cst_288 [1] : vector<8x128xf32> to vector<8xf32>
    %726 = vector.shape_cast %725 : vector<8xf32> to vector<8x1xf32>
    %cst_289 = arith.constant 9.99999993E-9 : f32
    %727 = vector.broadcast %cst_289 : f32 to vector<8x1xf32>
    %728 = arith.maximumf %727, %726 : vector<8x1xf32>
    %cst_290 = arith.constant 5.000000e-01 : f32
    %729 = vector.broadcast %cst_290 : f32 to vector<8x1xf32>
    %730 = arith.mulf %729, %719 : vector<8x1xf32>
    %731 = math.tanh %730 : vector<8x1xf32>
    %cst_291 = arith.constant 1.000000e+00 : f32
    %732 = vector.broadcast %cst_291 : f32 to vector<8x1xf32>
    %733 = arith.addf %731, %732 : vector<8x1xf32>
    %cst_292 = arith.constant 5.000000e-01 : f32
    %734 = vector.broadcast %cst_292 : f32 to vector<8x1xf32>
    %735 = arith.mulf %734, %733 : vector<8x1xf32>
    %cst_293 = arith.constant 1.000000e+01 : f32
    %736 = vector.broadcast %cst_293 : f32 to vector<8x1xf32>
    %737 = arith.mulf %735, %736 : vector<8x1xf32>
    %cst_294 = arith.constant 1.100000e+00 : f32
    %738 = vector.broadcast %cst_294 : f32 to vector<8x1xf32>
    %739 = arith.addf %737, %738 : vector<8x1xf32>
    %740 = arith.mulf %739, %739 : vector<8x1xf32>
    %cst_295 = arith.constant 1.000000e+00 : f32
    %741 = vector.broadcast %cst_295 : f32 to vector<8x1xf32>
    %742 = arith.subf %740, %741 : vector<8x1xf32>
    %743 = arith.divf %742, %728 : vector<8x1xf32>
    %744 = math.sqrt %743 : vector<8x1xf32>
    %c0_i32_296 = arith.constant 0 : i32
    %745 = vector.broadcast %c0_i32_296 : i32 to vector<8x128xi32>
    %746 = arith.cmpi eq, %713, %745 : vector<8x128xi32>
    %747 = vector.broadcast %744 : vector<8x1xf32> to vector<8x128xf32>
    %748 = arith.mulf %712, %747 : vector<8x128xf32>
    %749 = vector.shape_cast %739 : vector<8x1xf32> to vector<8x1xf32>
    %750 = vector.broadcast %749 : vector<8x1xf32> to vector<8x128xf32>
    %751 = arith.select %746, %750, %748 : vector<8x128xi1>, vector<8x128xf32>
    %752 = tpu.iota {dimensions = array<i32: 1>} : vector<8x128xi32>
    %c0_i32_297 = arith.constant 0 : i32
    %753 = vector.broadcast %c0_i32_297 : i32 to vector<8x128xi32>
    %754 = arith.cmpi eq, %752, %753 : vector<8x128xi32>
    %cst_298 = arith.constant 0.000000e+00 : f32
    %755 = vector.broadcast %cst_298 : f32 to vector<8x128xf32>
    %756 = arith.subf %755, %708 : vector<8x128xf32>
    %757 = arith.select %754, %756, %708 : vector<8x128xi1>, vector<8x128xf32>
    %758 = arith.truncf %757 : vector<8x128xf32> to vector<8x128xbf16>
    %759 = arith.truncf %751 : vector<8x128xf32> to vector<8x128xbf16>
    %cst_299 = arith.constant dense<0.000000e+00> : vector<8x8xf32>
    %760 = tpu.matmul %758, %759, %cst_299 {dimension_numbers = #tpu.dot_dimension_numbers<[1], [1], [0], [0], [0, 0, 1, 0], [], []>} : vector<8x128xbf16>, vector<8x128xbf16>, vector<8x8xf32> -> vector<8x8xf32>
    %cst_300 = arith.constant 2.000000e+00 : f32
    %761 = vector.broadcast %cst_300 : f32 to vector<8x8xf32>
    %762 = arith.mulf %761, %760 : vector<8x8xf32>
    %cst_301 = arith.constant 2.000000e+00 : f32
    %763 = vector.broadcast %cst_301 : f32 to vector<8x8xf32>
    %764 = arith.addf %763, %762 : vector<8x8xf32>
    %cst_302 = arith.constant 0.333333343 : f32
    %765 = vector.broadcast %cst_302 : f32 to vector<8x8xf32>
    %766 = arith.mulf %764, %765 : vector<8x8xf32>
    %cst_303 = arith.constant 2.000000e+01 : f32
    %767 = vector.broadcast %cst_303 : f32 to vector<8x8xf32>
    %768 = arith.addf %766, %767 : vector<8x8xf32>
    %cst_304 = arith.constant 5.000000e-01 : f32
    %769 = vector.broadcast %cst_304 : f32 to vector<8x8xf32>
    %770 = arith.mulf %769, %768 : vector<8x8xf32>
    %771 = math.tanh %770 : vector<8x8xf32>
    %cst_305 = arith.constant 1.000000e+00 : f32
    %772 = vector.broadcast %cst_305 : f32 to vector<8x8xf32>
    %773 = arith.addf %771, %772 : vector<8x8xf32>
    %cst_306 = arith.constant 5.000000e-01 : f32
    %774 = vector.broadcast %cst_306 : f32 to vector<8x8xf32>
    %775 = arith.mulf %774, %773 : vector<8x8xf32>
    %776 = arith.mulf %775, %540 : vector<8x8xf32>
    %777 = arith.truncf %776 : vector<8x8xf32> to vector<8x8xbf16>
    %778 = arith.truncf %665 : vector<8x128xf32> to vector<8x128xbf16>
    %cst_307 = arith.constant dense<0.000000e+00> : vector<8x128xf32>
    %779 = tpu.matmul %777, %778, %cst_307 {dimension_numbers = #tpu.dot_dimension_numbers<[1], [0], [0], [1], [0, 0, 1, 1], [], []>} : vector<8x8xbf16>, vector<8x128xbf16>, vector<8x128xf32> -> vector<8x128xf32>
    %780 = tpu.iota {dimensions = array<i32: 1>} : vector<8x128xi32>
    %c4_i32 = arith.constant 4 : i32
    %781 = vector.broadcast %c4_i32 : i32 to vector<8x128xi32>
    %782 = arith.cmpi slt, %780, %781 : vector<8x128xi32>
    %cst_308 = arith.constant -1.000000e+30 : f32
    %783 = vector.broadcast %cst_308 : f32 to vector<8x128xf32>
    %784 = arith.select %782, %779, %783 : vector<8x128xi1>, vector<8x128xf32>
    %cst_309 = arith.constant dense<0xFF800000> : vector<8xf32>
    %785 = vector.multi_reduction <maximumf>, %784, %cst_309 [1] : vector<8x128xf32> to vector<8xf32>
    %786 = vector.shape_cast %785 : vector<8xf32> to vector<8x1xf32>
    %787 = vector.broadcast %786 : vector<8x1xf32> to vector<8x128xf32>
    %788 = arith.subf %784, %787 : vector<8x128xf32>
    %cst_310 = arith.constant 1.000000e+01 : f32
    %789 = vector.broadcast %cst_310 : f32 to vector<8x128xf32>
    %790 = arith.mulf %788, %789 : vector<8x128xf32>
    %791 = math.exp %790 : vector<8x128xf32>
    %cst_311 = arith.constant dense<0.000000e+00> : vector<8xf32>
    %792 = vector.multi_reduction <add>, %791, %cst_311 [1] : vector<8x128xf32> to vector<8xf32>
    %793 = vector.shape_cast %792 : vector<8xf32> to vector<8x1xf32>
    %cst_312 = arith.constant 1.000000e+00 : f32
    %794 = vector.broadcast %cst_312 : f32 to vector<8x1xf32>
    %795 = arith.divf %794, %793 : vector<8x1xf32>
    %796 = vector.broadcast %795 : vector<8x1xf32> to vector<8x128xf32>
    %797 = arith.mulf %791, %796 : vector<8x128xf32>
    %798 = arith.truncf %797 : vector<8x128xf32> to vector<8x128xbf16>
    %799 = arith.truncf %508 : vector<8x128xf32> to vector<8x128xbf16>
    %cst_313 = arith.constant dense<0.000000e+00> : vector<128x128xf32>
    %800 = tpu.matmul %798, %799, %cst_313 {dimension_numbers = #tpu.dot_dimension_numbers<[0], [0], [1], [1], [0, 1, 1, 1], [], []>} : vector<8x128xbf16>, vector<8x128xbf16>, vector<128x128xf32> -> vector<128x128xf32>
    %801 = vector.extract_strided_slice %800 {offsets = [0, 0], sizes = [8, 128], strides = [1, 1]} : vector<128x128xf32> to vector<8x128xf32>
    %802 = tpu.iota {dimensions = array<i32: 1>} : vector<8x128xi32>
    %803 = tpu.iota {dimensions = array<i32: 1>} : vector<8x128xi32>
    %c0_i32_314 = arith.constant 0 : i32
    %804 = vector.broadcast %c0_i32_314 : i32 to vector<8x128xi32>
    %805 = arith.cmpi eq, %803, %804 : vector<8x128xi32>
    %cst_315 = arith.constant 0.000000e+00 : f32
    %806 = vector.broadcast %cst_315 : f32 to vector<8x128xf32>
    %807 = arith.select %805, %801, %806 : vector<8x128xi1>, vector<8x128xf32>
    %cst_316 = arith.constant dense<0.000000e+00> : vector<8xf32>
    %808 = vector.multi_reduction <add>, %807, %cst_316 [1] : vector<8x128xf32> to vector<8xf32>
    %809 = vector.shape_cast %808 : vector<8xf32> to vector<8x1xf32>
    %c0_i32_317 = arith.constant 0 : i32
    %810 = vector.broadcast %c0_i32_317 : i32 to vector<8x128xi32>
    %811 = arith.cmpi eq, %802, %810 : vector<8x128xi32>
    %812 = arith.mulf %801, %801 : vector<8x128xf32>
    %cst_318 = arith.constant 0.000000e+00 : f32
    %813 = vector.broadcast %cst_318 : f32 to vector<8x128xf32>
    %814 = arith.select %811, %813, %812 : vector<8x128xi1>, vector<8x128xf32>
    %cst_319 = arith.constant dense<0.000000e+00> : vector<8xf32>
    %815 = vector.multi_reduction <add>, %814, %cst_319 [1] : vector<8x128xf32> to vector<8xf32>
    %816 = vector.shape_cast %815 : vector<8xf32> to vector<8x1xf32>
    %817 = arith.mulf %809, %809 : vector<8x1xf32>
    %818 = arith.subf %816, %817 : vector<8x1xf32>
    %819 = math.absf %818 : vector<8x1xf32>
    %cst_320 = arith.constant 9.99999993E-9 : f32
    %820 = vector.broadcast %cst_320 : f32 to vector<8x1xf32>
    %821 = arith.maximumf %820, %819 : vector<8x1xf32>
    %822 = math.sqrt %821 : vector<8x1xf32>
    %cst_321 = arith.constant 1.000000e+00 : f32
    %823 = vector.broadcast %cst_321 : f32 to vector<8x1xf32>
    %824 = arith.divf %823, %822 : vector<8x1xf32>
    %825 = vector.broadcast %824 : vector<8x1xf32> to vector<8x128xf32>
    %826 = arith.mulf %801, %825 : vector<8x128xf32>
    %827 = arith.truncf %797 : vector<8x128xf32> to vector<8x128xbf16>
    %828 = arith.truncf %540 : vector<8x8xf32> to vector<8x8xbf16>
    %cst_322 = arith.constant dense<0.000000e+00> : vector<128x8xf32>
    %829 = tpu.matmul %827, %828, %cst_322 {dimension_numbers = #tpu.dot_dimension_numbers<[0], [0], [1], [1], [0, 1, 1, 1], [], []>} : vector<8x128xbf16>, vector<8x8xbf16>, vector<128x8xf32> -> vector<128x8xf32>
    %830 = vector.extract_strided_slice %829 {offsets = [0, 0], sizes = [8, 8], strides = [1, 1]} : vector<128x8xf32> to vector<8x8xf32>
    %831 = arith.truncf %830 : vector<8x8xf32> to vector<8x8xbf16>
    %832 = arith.truncf %797 : vector<8x128xf32> to vector<8x128xbf16>
    %cst_323 = arith.constant dense<0.000000e+00> : vector<8x128xf32>
    %833 = tpu.matmul %831, %832, %cst_323 {dimension_numbers = #tpu.dot_dimension_numbers<[1], [0], [0], [1], [0, 0, 1, 1], [], []>} : vector<8x8xbf16>, vector<8x128xbf16>, vector<8x128xf32> -> vector<8x128xf32>
    %834 = tpu.iota {dimensions = array<i32: 0>} : vector<8x128xi32>
    %835 = tpu.iota {dimensions = array<i32: 1>} : vector<8x128xi32>
    %836 = arith.cmpi eq, %834, %835 : vector<8x128xi32>
    %cst_324 = arith.constant 0.000000e+00 : f32
    %837 = vector.broadcast %cst_324 : f32 to vector<8x128xf32>
    %838 = arith.select %836, %837, %833 : vector<8x128xi1>, vector<8x128xf32>
    %c4_i32_325 = arith.constant 4 : i32
    %839 = vector.broadcast %c4_i32_325 : i32 to vector<8x128xi32>
    %840 = arith.cmpi slt, %834, %839 : vector<8x128xi32>
    %c4_i32_326 = arith.constant 4 : i32
    %841 = vector.broadcast %c4_i32_326 : i32 to vector<8x128xi32>
    %842 = arith.cmpi slt, %835, %841 : vector<8x128xi32>
    %843 = arith.andi %840, %842 : vector<8x128xi1>
    %cst_327 = arith.constant 1.000000e+01 : f32
    %844 = vector.broadcast %cst_327 : f32 to vector<8x128xf32>
    %845 = arith.mulf %838, %844 : vector<8x128xf32>
    %cst_328 = arith.constant 5.000000e-01 : f32
    %846 = vector.broadcast %cst_328 : f32 to vector<8x128xf32>
    %847 = arith.mulf %846, %845 : vector<8x128xf32>
    %848 = math.tanh %847 : vector<8x128xf32>
    %cst_329 = arith.constant 1.000000e+00 : f32
    %849 = vector.broadcast %cst_329 : f32 to vector<8x128xf32>
    %850 = arith.addf %848, %849 : vector<8x128xf32>
    %cst_330 = arith.constant 5.000000e-01 : f32
    %851 = vector.broadcast %cst_330 : f32 to vector<8x128xf32>
    %852 = arith.mulf %851, %850 : vector<8x128xf32>
    %cst_331 = arith.constant 0.000000e+00 : f32
    %853 = vector.broadcast %cst_331 : f32 to vector<8x128xf32>
    %854 = arith.select %843, %852, %853 : vector<8x128xi1>, vector<8x128xf32>
    %c0_332 = arith.constant 0 : index
    %c0_333 = arith.constant 0 : index
    %855 = vector.load %arg26[%c0_332, %c0_333] : memref<8x128xf32, #tpu.memory_space<vmem>>, vector<8x128xf32>
    tpu.vector_store %arg26[%c0_332, %c0_333], %826 {strides = array<i32>} : memref<8x128xf32, #tpu.memory_space<vmem>>, vector<8x128xf32>,
    %c0_334 = arith.constant 0 : index
    %c0_335 = arith.constant 0 : index
    %856 = vector.load %arg27[%c0_334, %c0_335] : memref<8x128xf32, #tpu.memory_space<vmem>>, vector<8x128xf32>
    tpu.vector_store %arg27[%c0_334, %c0_335], %854 {strides = array<i32>} : memref<8x128xf32, #tpu.memory_space<vmem>>, vector<8x128xf32>,
    %c0_336 = arith.constant 0 : index
    %c0_337 = arith.constant 0 : index
    %857 = vector.load %arg28[%c0_336, %c0_337] : memref<8x128xf32, #tpu.memory_space<vmem>>, vector<8x128xf32>
    tpu.vector_store %arg28[%c0_336, %c0_337], %797 {strides = array<i32>} : memref<8x128xf32, #tpu.memory_space<vmem>>, vector<8x128xf32>,
    %cst_338 = arith.constant dense<0.000000e+00> : vector<128xf32>
    %858 = vector.multi_reduction <add>, %826, %cst_338 [0] : vector<8x128xf32> to vector<128xf32>
    %859 = vector.shape_cast %858 : vector<128xf32> to vector<1x128xf32>
    %860 = tpu.iota {dimensions = array<i32: 1>} : vector<1x128xi32>
    %861 = tpu.iota {dimensions = array<i32: 1>} : vector<1x128xi32>
    %c0_i32_339 = arith.constant 0 : i32
    %862 = vector.broadcast %c0_i32_339 : i32 to vector<1x128xi32>
    %863 = arith.cmpi eq, %861, %862 : vector<1x128xi32>
    %cst_340 = arith.constant 0.000000e+00 : f32
    %864 = vector.broadcast %cst_340 : f32 to vector<1x128xf32>
    %865 = arith.select %863, %859, %864 : vector<1x128xi1>, vector<1x128xf32>
    %cst_341 = arith.constant dense<0.000000e+00> : vector<1xf32>
    %866 = vector.multi_reduction <add>, %865, %cst_341 [1] : vector<1x128xf32> to vector<1xf32>
    %867 = vector.shape_cast %866 : vector<1xf32> to vector<1x1xf32>
    %c0_i32_342 = arith.constant 0 : i32
    %868 = vector.broadcast %c0_i32_342 : i32 to vector<1x128xi32>
    %869 = arith.cmpi eq, %860, %868 : vector<1x128xi32>
    %870 = arith.mulf %859, %859 : vector<1x128xf32>
    %cst_343 = arith.constant 0.000000e+00 : f32
    %871 = vector.broadcast %cst_343 : f32 to vector<1x128xf32>
    %872 = arith.select %869, %871, %870 : vector<1x128xi1>, vector<1x128xf32>
    %cst_344 = arith.constant dense<0.000000e+00> : vector<1xf32>
    %873 = vector.multi_reduction <add>, %872, %cst_344 [1] : vector<1x128xf32> to vector<1xf32>
    %874 = vector.shape_cast %873 : vector<1xf32> to vector<1x1xf32>
    %875 = arith.mulf %867, %867 : vector<1x1xf32>
    %876 = arith.subf %874, %875 : vector<1x1xf32>
    %877 = math.absf %876 : vector<1x1xf32>
    %cst_345 = arith.constant 9.99999993E-9 : f32
    %878 = vector.broadcast %cst_345 : f32 to vector<1x1xf32>
    %879 = arith.maximumf %878, %877 : vector<1x1xf32>
    %880 = math.sqrt %879 : vector<1x1xf32>
    %cst_346 = arith.constant 1.000000e+00 : f32
    %881 = vector.broadcast %cst_346 : f32 to vector<1x1xf32>
    %882 = arith.divf %881, %880 : vector<1x1xf32>
    %883 = vector.broadcast %882 : vector<1x1xf32> to vector<1x128xf32>
    %884 = arith.mulf %859, %883 : vector<1x128xf32>
    %c0_347 = arith.constant 0 : index
    %c0_348 = arith.constant 0 : index
    %885 = vector.load %arg29[%c0_347, %c0_348] : memref<1x128xf32, #tpu.memory_space<vmem>>, vector<1x128xf32>
    tpu.vector_store %arg29[%c0_347, %c0_348], %884 {strides = array<i32>} : memref<1x128xf32, #tpu.memory_space<vmem>>, vector<1x128xf32>,
    return
  }
}

</mosaic_0001>

<bundles_post_ra>
// kernel: tpu_custom_call.1
= control target key start
LH: loop header
LB: loop body
LE: loop exit
PB: predicated region body
PF: predicated region fallthrough
CT: control target
= control target key end

     0   :  { %s4427_s6 = smov 1   ;;  %s4428_s10 = smov 2   ;;  %s5417_s0 = inlined_call_operand.smem [shape: u32[30], index: -1, kind: input, shape index: {}] }
   0x1   :  { %s4489_s5 = sld [smem:[%s5417_s0]]   ;;  %s4429_s14 = smov 3  }
   0x2   :  { %s4494_s9 = sld [smem:[%s5417_s0 + %s4427_s6]]   ;;  %s4430_s18 = smov 4  }
   0x3   :  { %s4499_s13 = sld [smem:[%s5417_s0 + %s4428_s10]]   ;;  %s4431_s22 = smov 5  }
   0x4   :  { %s4504_s17 = sld [smem:[%s5417_s0 + %s4429_s14]]   ;;  %s4432_s26 = smov 6  }
   0x5   :  { %s4509_s21 = sld [smem:[%s5417_s0 + %s4430_s18]]   ;;  %s4433_s30 = smov 7  }
   0x6   :  { %s4514_s25 = sld [smem:[%s5417_s0 + %s4431_s22]]   ;;  %s4434_s4 = smov 8  }
   0x7   :  { %s4519_s29 = sld [smem:[%s5417_s0 + %s4432_s26]]   ;;  %s4435_s10 = smov 9  }
   0x8   :  { %s4524_s3 = sld [smem:[%s5417_s0 + %s4433_s30]]   ;;  %s4436_s15 = smov 10  }
   0x9   :  { %s4529_s8 = sld [smem:[%s5417_s0 + %s4434_s4]]   ;;  %s4437_s20 = smov 11  }
   0xa   :  { %s4534_s14 = sld [smem:[%s5417_s0 + %s4435_s10]]   ;;  %s4438_s26 = smov 12  }
   0xb   :  { %s4539_s19 = sld [smem:[%s5417_s0 + %s4436_s15]]   ;;  %s4439_s1 = smov 13  }
   0xc   :  { %s4544_s24 = sld [smem:[%s5417_s0 + %s4437_s20]]   ;;  %s4440_s7 = smov 14  }
   0xd   :  { %s4549_s30 = sld [smem:[%s5417_s0 + %s4438_s26]]   ;;  %s4441_s15 = smov 15  }
   0xe   :  { %5422 = sst [smem:[#allocation46_spill]] %s4524_s3  ;;  %s4442_s22 = smov 16  }
   0xf   :  { %s4554_s6 = sld [smem:[%s5417_s0 + %s4439_s1]]   ;;  %s4443_s28 = smov 17  }
  0x10   :  { %5423 = sst [smem:[#allocation47_spill]] %s4534_s14 }
  0x11   :  { %s4559_s12 = sld [smem:[%s5417_s0 + %s4440_s7]]   ;;  %s4444_s7 = smov 18  }
  0x12   :  { %5424 = sst [smem:[#allocation48_spill]] %s4544_s24 }
  0x13   :  { %s4564_s20 = sld [smem:[%s5417_s0 + %s4441_s15]]   ;;  %s4445_s15 = smov 19  }
  0x14   :  { %s4569_s27 = sld [smem:[%s5417_s0 + %s4442_s22]]   ;;  %s4446_s22 = smov 20  }
  0x15   :  { %5425 = sst [smem:[#allocation49_spill]] %s4554_s6 }
  0x16   :  { %s4574_s4 = sld [smem:[%s5417_s0 + %s4443_s28]]   ;;  %s4447_s28 = smov 21  }
  0x17   :  { %s4579_s24 = sld [smem:[%s5417_s0 + %s4444_s7]]   ;;  %s4448_s7 = smov 22  }
  0x18   :  { %s4589_s6 = sld [smem:[%s5417_s0 + %s4446_s22]]   ;;  %s4450_s22 = smov 24  }
  0x19   :  { %5426 = sst [smem:[#allocation50_spill]] %s4564_s20 }
  0x1a   :  { %s4584_s20 = sld [smem:[%s5417_s0 + %s4445_s15]]   ;;  %s4449_s15 = smov 23  }
  0x1b   :  { %s4599_s14 = sld [smem:[%s5417_s0 + %s4448_s7]]   ;;  %s4452_s7 = smov 26  }
  0x1c   :  { %5427 = sst [smem:[#allocation51_spill]] %s4574_s4 }
  0x1d   :  { %s4594_s4 = sld [smem:[%s5417_s0 + %s4447_s28]]   ;;  %s4451_s28 = smov 25  }
  0x1e   :  { %s4609_s3 = sld [smem:[%s5417_s0 + %s4450_s22]]   ;;  %s4454_s22 = smov 28  }
  0x20   :  { %5428 = sst [smem:[#allocation52_spill]] %s4584_s20 }
  0x21   :  { %5430 = sst [smem:[#allocation54_spill]] %s4599_s14 }
  0x22   :  { %s4604_s20 = sld [smem:[%s5417_s0 + %s4449_s15]]   ;;  %s4453_s15 = smov 27  }
  0x23   :  { %5429 = sst [smem:[#allocation53_spill]] %s4594_s4 }
  0x24   :  { %5432 = sst [smem:[#allocation56_spill]] %s4609_s3 }
  0x25   :  { %s4614_s4 = sld [smem:[%s5417_s0 + %s4451_s28]]   ;;  %s4455_s28 = smov 29  }
  0x26   :  { %s4619_s14 = sld [smem:[%s5417_s0 + %s4452_s7]]  }
  0x27   :  { %s4629_s3 = sld [smem:[%s5417_s0 + %s4454_s22]]  }
  0x28   :  { %5431 = sst [smem:[#allocation55_spill]] %s4604_s20 }
  0x29   :  { %s4624_s20 = sld [smem:[%s5417_s0 + %s4453_s15]]  }
  0x2b   :  { %5433 = sst [smem:[#allocation57_spill]] %s4614_s4 }
  0x2c   :  { %s4634_s4 = sld [smem:[%s5417_s0 + %s4455_s28]]  }
  0x2d   :  { %65 = vsyncpa [#allocation3], 0 }
  0x2e   :  { %66 = vsyncpa [#allocation6], 0 }
  0x2f   :  { %67 = vsyncpa [#allocation9], 0 }
  0x30   :  { %68 = vsyncpa [#allocation12], 0 }
  0x31   :  { %69 = vsyncpa [#allocation15], 0 }
  0x32   :  { %70 = vsyncpa [#allocation18], 0 }
  0x33   :  { %71 = vsyncpa [#allocation21], 0 }
  0x34   :  { %72 = vsyncpa [#allocation4], 0 }
  0x35   :  { %73 = vsyncpa [#allocation24], 0 }
  0x36   :  { %74 = vsyncpa [#allocation27], 0 }
  0x37   :  { %75 = vsyncpa [#allocation30], 0 }
  0x38   :  { %76 = vsyncpa [#allocation33], 0  ;;  %s94_s7 = sshll.u32 %s4494_s9, 4  ;;  %s4456_s10 = smov [#allocation5]   ;;  %s95_s7 = int_to_ptr.hbm [resolvable:$true] %s94_s7 }
  0x39   :  { %s96_s0 = sshll.u32 %s4456_s10, 4  ;;  %s3923_s11 = sshra.s32 %s95_s7, 4  ;;  %s97_s0 = int_to_ptr.vmem [resolvable:$true] %s96_s0  ;;  %s3924_s11 = int_to_ptr.hbm [resolvable:$true] %s3923_s11 }
  0x3a   :  { %s3925_s15 = scalar_lea.hbm %s3924_s11, 16  ;;  %s3927_s16 = scalar_lea.hbm %s4494_s9, 16 }
  0x3b   :  { %p3926_p0 = scmp.ne.s32.totalorder %s3924_s11, %s3925_s15  ;;  %p3928_p1 = scmp.lt.s32.totalorder %s3924_s11, %s4494_s9 }
  0x3c   :  { %p3929_p2 = scmp.lt.s32.totalorder %s3927_s16, %s3925_s15 }
  0x3e   :  { %p3930_p3 = por %p3929_p2, %p3928_p1 }
  0x40   :  { %p3931_p4 = pnand %p3930_p3, %p3926_p0 }
  0x42   :  { %3934 = shalt.err (!%p3931_p4)
}
  0x43   :  { %s4457_s18 = smov 128   ;;  %s4458_s22 = smov 8  }
  0x44   :  { %102 = dma.hbm_to_vmem [thread:$0]  %s95_s7, 256, %s97_s0, [#allocation6], %s4457_s18, %s4457_s18, %s4458_s22  }
  0x45   :  { %s122_s23 = sshll.u32 %s4509_s21, 4  ;;  %s4459_s26 = smov [#allocation8]   ;;  %s123_s23 = int_to_ptr.hbm [resolvable:$true] %s122_s23 }
  0x46   :  { %s124_s28 = sshll.u32 %s4459_s26, 4  ;;  %s152_s1 = sshll.u32 %s4529_s8, 4  ;;  %s125_s28 = int_to_ptr.vmem [resolvable:$true] %s124_s28  ;;  %s4644_s1 = int_to_ptr.hbm [resolvable:$true] %s152_s1 }
  0x47   :  { %s3947_s9 = sshra.s32 %s123_s23, 4  ;;  %s3951_s10 = scalar_lea.hbm %s4509_s21, 64  ;;  %s3948_s9 = int_to_ptr.hbm [resolvable:$true] %s3947_s9 }
  0x48   :  { %s3949_s2 = scalar_lea.hbm %s3948_s9, 64  ;;  %p3952_p6 = scmp.lt.s32.totalorder %s3948_s9, %s4509_s21 }
  0x49   :  { %p3950_p5 = scmp.ne.s32.totalorder %s3948_s9, %s3949_s2  ;;  %p3953_p7 = scmp.lt.s32.totalorder %s3951_s10, %s3949_s2 }
  0x4b   :  { %p3954_p8 = por %p3953_p7, %p3952_p6 }
  0x4d   :  { %p3955_p9 = pnand %p3954_p8, %p3950_p5 }
  0x4f   :  { %3958 = shalt.err (!%p3955_p9)
}
  0x50   :  { %s4460_s11 = smov 64   ;;  %s4461_s7 = smov 4  }
  0x51   :  { %130 = dma.hbm_to_vmem [thread:$0]  %s123_s23, 1024, %s125_s28, [#allocation9], %s4460_s11, %s4460_s11, %s4461_s7  }
  0x52   :  { %s182_s0 = sshll.u32 %s4549_s30, 4  ;;  %s4462_s15 = smov [#allocation11]   ;;  %s4652_s0 = int_to_ptr.hbm [resolvable:$true] %s182_s0 }
  0x53   :  { %s154_s16 = sshll.u32 %s4462_s15, 4  ;;  %s3971_s21 = sshra.s32 %s4644_s1, 4  ;;  %s155_s16 = int_to_ptr.vmem [resolvable:$true] %s154_s16  ;;  %s3972_s21 = int_to_ptr.hbm [resolvable:$true] %s3971_s21 }
  0x54   :  { %s3973_s26 = scalar_lea.hbm %s3972_s21, 64  ;;  %s3975_s9 = scalar_lea.hbm %s4529_s8, 64 }
  0x55   :  { %p3974_p10 = scmp.ne.s32.totalorder %s3972_s21, %s3973_s26  ;;  %p3976_p11 = scmp.lt.s32.totalorder %s3972_s21, %s4529_s8 }
  0x56   :  { %p3977_p12 = scmp.lt.s32.totalorder %s3975_s9, %s3973_s26 }
  0x58   :  { %p3978_p13 = por %p3977_p12, %p3976_p11 }
  0x5a   :  { %p3979_p0 = pnand %p3978_p13, %p3974_p10 }
  0x5c   :  { %3982 = shalt.err (!%p3979_p0)
}
  0x5d   :  { %160 = dma.hbm_to_vmem [thread:$0]  %s4644_s1, 1024, %s155_s16, [#allocation12], %s4460_s11, %s4460_s11, %s4461_s7  }
  0x5e   :  { %s4463_s23 = smov [#allocation14]   ;;  %s212_s2 = sshll.u32 %s4569_s27, 4  ;;  %s4662_s2 = int_to_ptr.hbm [resolvable:$true] %s212_s2 }
  0x5f   :  { %s184_s28 = sshll.u32 %s4463_s23, 4  ;;  %s3995_s8 = sshra.s32 %s4652_s0, 4  ;;  %s185_s28 = int_to_ptr.vmem [resolvable:$true] %s184_s28  ;;  %s3996_s8 = int_to_ptr.hbm [resolvable:$true] %s3995_s8 }
  0x60   :  { %s3997_s10 = scalar_lea.hbm %s3996_s8, 64  ;;  %s3999_s15 = scalar_lea.hbm %s4549_s30, 64 }
  0x61   :  { %p3998_p1 = scmp.ne.s32.totalorder %s3996_s8, %s3997_s10  ;;  %p4000_p2 = scmp.lt.s32.totalorder %s3996_s8, %s4549_s30 }
  0x62   :  { %p4001_p3 = scmp.lt.s32.totalorder %s3999_s15, %s3997_s10 }
  0x64   :  { %p4002_p4 = por %p4001_p3, %p4000_p2 }
  0x66   :  { %p4003_p5 = pnand %p4002_p4, %p3998_p1 }
  0x68   :  { %4006 = shalt.err (!%p4003_p5)
}
  0x69   :  { %190 = dma.hbm_to_vmem [thread:$0]  %s4652_s0, 1024, %s185_s28, [#allocation15], %s4460_s11, %s4460_s11, %s4461_s7  }
  0x6a   :  { %s81_s1 = sshll.u32 %s4489_s5, 4  ;;  %s4464_s16 = smov [#allocation17]   ;;  %s4672_s1 = int_to_ptr.hbm [resolvable:$true] %s81_s1 }
  0x6b   :  { %s214_s21 = sshll.u32 %s4464_s16, 4  ;;  %s4019_s30 = sshra.s32 %s4662_s2, 4  ;;  %s215_s21 = int_to_ptr.vmem [resolvable:$true] %s214_s21  ;;  %s4020_s30 = int_to_ptr.hbm [resolvable:$true] %s4019_s30 }
  0x6c   :  { %s4021_s26 = scalar_lea.hbm %s4020_s30, 64  ;;  %s4023_s9 = scalar_lea.hbm %s4569_s27, 64 }
  0x6d   :  { %p4022_p6 = scmp.ne.s32.totalorder %s4020_s30, %s4021_s26  ;;  %p4024_p7 = scmp.lt.s32.totalorder %s4020_s30, %s4569_s27 }
  0x6e   :  { %p4025_p8 = scmp.lt.s32.totalorder %s4023_s9, %s4021_s26 }
  0x70   :  { %p4026_p9 = por %p4025_p8, %p4024_p7 }
  0x72   :  { %p4027_p10 = pnand %p4026_p9, %p4022_p6 }
  0x74   :  { %4030 = shalt.err (!%p4027_p10)
}
  0x75   :  { %220 = dma.hbm_to_vmem [thread:$0]  %s4662_s2, 1024, %s215_s21, [#allocation18], %s4460_s11, %s4460_s11, %s4461_s7  }
  0x76   :  { %s4465_s0 = smov [#allocation2]   ;;  %s107_s28 = sshll.u32 %s4499_s13, 4  ;;  %s4682_s28 = int_to_ptr.hbm [resolvable:$true] %s107_s28 }
  0x77   :  { %s83_s23 = sshll.u32 %s4465_s0, 4  ;;  %s4043_s27 = sshra.s32 %s4672_s1, 4  ;;  %s84_s23 = int_to_ptr.vmem [resolvable:$true] %s83_s23  ;;  %s4044_s27 = int_to_ptr.hbm [resolvable:$true] %s4043_s27 }
  0x78   :  { %s4045_s8 = scalar_lea.hbm %s4044_s27, 16  ;;  %s4047_s10 = scalar_lea.hbm %s4489_s5, 16 }
  0x79   :  { %p4046_p11 = scmp.ne.s32.totalorder %s4044_s27, %s4045_s8  ;;  %p4048_p12 = scmp.lt.s32.totalorder %s4044_s27, %s4489_s5 }
  0x7a   :  { %p4049_p13 = scmp.lt.s32.totalorder %s4047_s10, %s4045_s8 }
  0x7c   :  { %p4050_p0 = por %p4049_p13, %p4048_p12 }
  0x7e   :  { %p4051_p1 = pnand %p4050_p0, %p4046_p11 }
  0x80   :  { %4054 = shalt.err (!%p4051_p1)
}
  0x81   :  { %89 = dma.hbm_to_vmem [thread:$0]  %s4672_s1, 256, %s84_s23, [#allocation3], %s4457_s18, %s4457_s18, %s4458_s22  }
  0x82   :  { %s137_s2 = sshll.u32 %s4519_s29, 4  ;;  %s4466_s15 = smov [#allocation7]   ;;  %s4692_s2 = int_to_ptr.hbm [resolvable:$true] %s137_s2 }
  0x83   :  { %s109_s16 = sshll.u32 %s4466_s15, 4  ;;  %s4067_s5 = sshra.s32 %s4682_s28, 4  ;;  %s110_s16 = int_to_ptr.vmem [resolvable:$true] %s109_s16  ;;  %s4068_s5 = int_to_ptr.hbm [resolvable:$true] %s4067_s5 }
  0x84   :  { %s4069_s21 = scalar_lea.hbm %s4068_s5, 64  ;;  %s4071_s30 = scalar_lea.hbm %s4499_s13, 64 }
  0x85   :  { %p4070_p2 = scmp.ne.s32.totalorder %s4068_s5, %s4069_s21  ;;  %p4072_p3 = scmp.lt.s32.totalorder %s4068_s5, %s4499_s13 }
  0x86   :  { %p4073_p4 = scmp.lt.s32.totalorder %s4071_s30, %s4069_s21 }
  0x88   :  { %p4074_p5 = por %p4073_p4, %p4072_p3 }
  0x8a   :  { %p4075_p6 = pnand %p4074_p5, %p4070_p2 }
  0x8c   :  { %4078 = shalt.err (!%p4075_p6)
}
  0x8d   :  { %115 = dma.hbm_to_vmem [thread:$0]  %s4682_s28, 1024, %s110_s16, [#allocation6], %s4460_s11, %s4460_s11, %s4461_s7  }
  0x8e   :  { %s4467_s1 = smov [#allocation10]   ;;  %s167_s9 = sshll.u32 %s4539_s19, 4  ;;  %s4702_s9 = int_to_ptr.hbm [resolvable:$true] %s167_s9 }
  0x8f   :  { %s139_s26 = sshll.u32 %s4467_s1, 4  ;;  %s4091_s13 = sshra.s32 %s4692_s2, 4  ;;  %s140_s26 = int_to_ptr.vmem [resolvable:$true] %s139_s26  ;;  %s4092_s13 = int_to_ptr.hbm [resolvable:$true] %s4091_s13 }
  0x90   :  { %s4093_s0 = scalar_lea.hbm %s4092_s13, 64  ;;  %s4095_s23 = scalar_lea.hbm %s4519_s29, 64 }
  0x91   :  { %p4094_p7 = scmp.ne.s32.totalorder %s4092_s13, %s4093_s0  ;;  %p4096_p8 = scmp.lt.s32.totalorder %s4092_s13, %s4519_s29 }
  0x92   :  { %p4097_p9 = scmp.lt.s32.totalorder %s4095_s23, %s4093_s0 }
  0x94   :  { %p4098_p10 = por %p4097_p9, %p4096_p8 }
  0x96   :  { %p4099_p11 = pnand %p4098_p10, %p4094_p7 }
  0x98   :  { %4102 = shalt.err (!%p4099_p11)
}
  0x99   :  { %145 = dma.hbm_to_vmem [thread:$0]  %s4692_s2, 1024, %s140_s26, [#allocation9], %s4460_s11, %s4460_s11, %s4461_s7  }
  0x9a   :  { %s197_s28 = sshll.u32 %s4559_s12, 4  ;;  %s4468_s27 = smov [#allocation13]   ;;  %s4712_s28 = int_to_ptr.hbm [resolvable:$true] %s197_s28 }
  0x9b   :  { %s169_s8 = sshll.u32 %s4468_s27, 4  ;;  %s4115_s29 = sshra.s32 %s4702_s9, 4  ;;  %s170_s8 = int_to_ptr.vmem [resolvable:$true] %s169_s8  ;;  %s4116_s29 = int_to_ptr.hbm [resolvable:$true] %s4115_s29 }
  0x9c   :  { %s4117_s10 = scalar_lea.hbm %s4116_s29, 64  ;;  %s4119_s15 = scalar_lea.hbm %s4539_s19, 64 }
  0x9d   :  { %p4118_p12 = scmp.ne.s32.totalorder %s4116_s29, %s4117_s10  ;;  %p4120_p13 = scmp.lt.s32.totalorder %s4116_s29, %s4539_s19 }
  0x9e   :  { %p4121_p0 = scmp.lt.s32.totalorder %s4119_s15, %s4117_s10 }
  0xa0   :  { %p4122_p1 = por %p4121_p0, %p4120_p13 }
  0xa2   :  { %p4123_p2 = pnand %p4122_p1, %p4118_p12 }
  0xa4   :  { %4126 = shalt.err (!%p4123_p2)
}
  0xa5   :  { %175 = dma.hbm_to_vmem [thread:$0]  %s4702_s9, 1024, %s170_s8, [#allocation12], %s4460_s11, %s4460_s11, %s4461_s7  }
  0xa6   :  { %s4469_s2 = smov [#allocation16]   ;;  %s227_s5 = sshll.u32 %s4579_s24, 4  ;;  %s4722_s5 = int_to_ptr.hbm [resolvable:$true] %s227_s5 }
  0xa7   :  { %s199_s16 = sshll.u32 %s4469_s2, 4  ;;  %s4139_s19 = sshra.s32 %s4712_s28, 4  ;;  %s200_s16 = int_to_ptr.vmem [resolvable:$true] %s199_s16  ;;  %s4140_s19 = int_to_ptr.hbm [resolvable:$true] %s4139_s19 }
  0xa8   :  { %s4141_s21 = scalar_lea.hbm %s4140_s19, 64  ;;  %s4143_s30 = scalar_lea.hbm %s4559_s12, 64 }
  0xa9   :  { %p4142_p3 = scmp.ne.s32.totalorder %s4140_s19, %s4141_s21  ;;  %p4144_p4 = scmp.lt.s32.totalorder %s4140_s19, %s4559_s12 }
  0xaa   :  { %p4145_p5 = scmp.lt.s32.totalorder %s4143_s30, %s4141_s21 }
  0xac   :  { %p4146_p6 = por %p4145_p5, %p4144_p4 }
  0xae   :  { %p4147_p7 = pnand %p4146_p6, %p4142_p3 }
  0xb0   :  { %4150 = shalt.err (!%p4147_p7)
}
  0xb1   :  { %205 = dma.hbm_to_vmem [thread:$0]  %s4712_s28, 1024, %s200_s16, [#allocation15], %s4460_s11, %s4460_s11, %s4461_s7  }
  0xb2   :  { %s242_s1 = sshll.u32 %s4589_s6, 4  ;;  %s4470_s26 = smov [#allocation19]   ;;  %s4732_s1 = int_to_ptr.hbm [resolvable:$true] %s242_s1 }
  0xb3   :  { %s229_s9 = sshll.u32 %s4470_s26, 4  ;;  %s4163_s12 = sshra.s32 %s4722_s5, 4  ;;  %s230_s9 = int_to_ptr.vmem [resolvable:$true] %s229_s9  ;;  %s4164_s12 = int_to_ptr.hbm [resolvable:$true] %s4163_s12 }
  0xb4   :  { %s4165_s13 = scalar_lea.hbm %s4164_s12, 64  ;;  %s4167_s0 = scalar_lea.hbm %s4579_s24, 64 }
  0xb5   :  { %p4166_p8 = scmp.ne.s32.totalorder %s4164_s12, %s4165_s13  ;;  %p4168_p9 = scmp.lt.s32.totalorder %s4164_s12, %s4579_s24 }
  0xb6   :  { %p4169_p10 = scmp.lt.s32.totalorder %s4167_s0, %s4165_s13 }
  0xb8   :  { %p4170_p11 = por %p4169_p10, %p4168_p9 }
  0xba   :  { %p4171_p12 = pnand %p4170_p11, %p4166_p8 }
  0xbc   :  { %4174 = shalt.err (!%p4171_p12)
}
  0xbd   :  { %235 = dma.hbm_to_vmem [thread:$0]  %s4722_s5, 1024, %s230_s9, [#allocation18], %s4460_s11, %s4460_s11, %s4461_s7  }
  0xbe   :  { %s4471_s23 = smov [#allocation20]   ;;  %s4187_s27 = sshra.s32 %s4732_s1, 4  ;;  %s4188_s27 = int_to_ptr.hbm [resolvable:$true] %s4187_s27 }
  0xbf   :  { %s244_s28 = sshll.u32 %s4471_s23, 4  ;;  %s4189_s8 = scalar_lea.hbm %s4188_s27, 64  ;;  %s245_s28 = int_to_ptr.vmem [resolvable:$true] %s244_s28 }
  0xc0   :  { %p4190_p13 = scmp.ne.s32.totalorder %s4188_s27, %s4189_s8  ;;  %s4191_s24 = scalar_lea.hbm %s4589_s6, 64 }
  0xc1   :  { %p4192_p0 = scmp.lt.s32.totalorder %s4188_s27, %s4589_s6  ;;  %p4193_p1 = scmp.lt.s32.totalorder %s4191_s24, %s4189_s8 }
  0xc3   :  { %p4194_p2 = por %p4193_p1, %p4192_p0 }
  0xc5   :  { %p4195_p3 = pnand %p4194_p2, %p4190_p13 }
  0xc7   :  { %4198 = shalt.err (!%p4195_p3)
}
  0xc8   :  { %250 = dma.hbm_to_vmem [thread:$0]  %s4732_s1, 1024, %s245_s28, [#allocation21], %s4460_s11, %s4460_s11, %s4461_s7  }
  0xc9   :  { %4403 = dma.done.wait [#allocation3], 256  }
  0xca   :  { %4404 = vsyncadd [#allocation3], 4294967040 }
  0xcb   :  { %4405 = dma.done.wait [#allocation6], 1280  }
  0xcc   :  { %4406 = vsyncadd [#allocation6], 4294966016 }
  0xcd   :  { %4407 = dma.done.wait [#allocation9], 2048  }
  0xce   :  { %4408 = vsyncadd [#allocation9], 4294965248 }
  0xcf   :  { %4409 = dma.done.wait [#allocation12], 2048  }
  0xd0   :  { %4410 = vsyncadd [#allocation12], 4294965248 }
  0xd1   :  { %4411 = dma.done.wait [#allocation15], 2048  }
  0xd2   :  { %4412 = vsyncadd [#allocation15], 4294965248 }
  0xd3   :  { %4413 = dma.done.wait [#allocation18], 2048  }
  0xd4   :  { %4414 = vsyncadd [#allocation18], 4294965248 }
  0xd5   :  { %4415 = dma.done.wait [#allocation21], 1024  }
  0xd6   :  { %4416 = vsyncadd [#allocation21], 4294966272  ;;  %v4748_v0 = vld [vmem:[#allocation2] sm:$0xff]  ;;  %v4752_v2 = vld [vmem:[#allocation2 + $0x8] sm:$0xff]  ;;  %v307_v52 = vlaneseq  ;;  %s5438_s6 = sld [smem:[#allocation49_spill]]  ;;  %s4472_s7 = smov 127  }
  0xd7   :  { %v309_v1 = vmul.f32 %v4748_v0, %v4748_v0  ;;  %v310_v3 = vmul.f32 %v4752_v2, %v4752_v2  ;;  %v3587_v4 = vld [vmem:[#allocation7 + $0x38] sm:$0xff]  ;;  %v3586_v5 = vld [vmem:[#allocation7 + $0x30] sm:$0xff]  ;;  %v3585_v7 = vld [vmem:[#allocation7 + $0x28] sm:$0xff]  ;;  %s5439_s11 = sld [smem:[#allocation48_spill]]  ;;  %s4473_s19 = smov [#allocation23]  }
  0xd8   :  { %461 = vmatpush.bf16.msra.mxu0 %v3587_v4  ;;  %v3584_v9 = vld [vmem:[#allocation7 + $0x20] sm:$0xff]  ;;  %v3583_v11 = vld [vmem:[#allocation7 + $0x18] sm:$0xff]  ;;  %v3582_v16 = vld [vmem:[#allocation7 + $0x10] sm:$0xff]  ;;  %v4764_v63 = vand.u32 127, %v307_v52  ;;  %s5448_s29 = sld [smem:[#allocation50_spill]]  ;;  %s3057_s21 = sshll.u32 %s4473_s19, 4  ;;  %s3058_s21 = int_to_ptr.vmem [resolvable:$true] %s3057_s21 }
  0xd9   :  { %311 = vadd.xlane.f32.xlu0 %v309_v1  ;;  %v3581_v19 = vld [vmem:[#allocation7 + $0x8] sm:$0xff]  ;;  %v3580_v25 = vld [vmem:[#allocation7] sm:$0xff]  ;;  %s5449_s10 = sld [smem:[#allocation51_spill]] }
  0xda   :  { %vm389_vm12 = vcmp.eq.s32.totalorder %v4764_v63, 0  ;;  %s5450_s15 = sld [smem:[#allocation52_spill]] }
  0xdb   :  { %s5451_s2 = sld [smem:[#allocation53_spill]] }
  0xdc   :  { %462 = vmatpush.bf16.msra.mxu0 %v3586_v5  ;;  %s5452_s16 = sld [smem:[#allocation55_spill]] }
  0xe0   :  { %463 = vmatpush.bf16.msra.mxu0 %v3585_v7 }
  0xe1   :  { %313 = vadd.xlane.f32.xlu0 %v310_v3 }
  0xe2   :  { %s3059_s5 = sshll.u32 %s5452_s16, 4  ;;  %s4227_s26 = scalar_lea.hbm %s5452_s16, 8  ;;  %s3060_s5 = int_to_ptr.hbm [resolvable:$true] %s3059_s5 }
  0xe3   :  { %s4223_s30 = sshra.s32 %s3060_s5, 4  ;;  %s4224_s30 = int_to_ptr.hbm [resolvable:$true] %s4223_s30 }
  0xe4   :  { %464 = vmatpush.bf16.msra.mxu0 %v3584_v9  ;;  %s4225_s1 = scalar_lea.hbm %s4224_s30, 8  ;;  %p4228_p5 = scmp.lt.s32.totalorder %s4224_s30, %s5452_s16 }
  0xe5   :  { %p4226_p4 = scmp.ne.s32.totalorder %s4224_s30, %s4225_s1  ;;  %p4229_p6 = scmp.lt.s32.totalorder %s4227_s26, %s4225_s1 }
  0xe7   :  { %p4230_p7 = por %p4229_p6, %p4228_p5 }
  0xe8   :  { %465 = vmatpush.bf16.msra.mxu0 %v3583_v11 }
  0xe9   :  { %p4231_p8 = pnand %p4230_p7, %p4226_p4 }
  0xec   :  { %466 = vmatpush.bf16.msra.mxu0 %v3582_v16 }
  0xf0   :  { %467 = vmatpush.bf16.msra.mxu0 %v3581_v19 }
  0xf4   :  { %468 = vmatpush.bf16.msra.mxu0 %v3580_v25 }
 0x14c   :  { %v312_v6 = vpop.xlane.xlu0 %311 }
 0x14d   :  { %v315_v8 = vmax.f32 %v312_v6, 1e-08 }
 0x14f   :  { %3731 = vrsqrt.f32 %v315_v8  ;;  %vm324_vm0 = vcmp.eq.f32.partialorder %v315_v8, inf  ;;  %v327_v26 = vand.u32 2147483648, %v315_v8  ;;  %vm326_vm1 = vcmp.eq.f32.partialorder %v315_v8, 0.0 }
 0x154   :  { %v314_v10 = vpop.xlane.xlu0 %313 }
 0x155   :  { %v3732_v12 = vpop.eup %3731  ;;  %v316_v13 = vmax.f32 %v314_v10, 1e-08 }
 0x156   :  { %v318_v14 = vmul.f32 %v3732_v12, %v315_v8 }
 0x157   :  { %3733 = vrsqrt.f32 %v316_v13  ;;  %vm336_vm2 = vcmp.eq.f32.partialorder %v316_v13, inf  ;;  %v339_v34 = vand.u32 2147483648, %v316_v13  ;;  %vm338_vm3 = vcmp.eq.f32.partialorder %v316_v13, 0.0 }
 0x158   :  { %v319_v15 = vmul.f32 %v3732_v12, %v318_v14 }
 0x15a   :  { %v320_v17 = vmul.f32 0.5, %v319_v15 }
 0x15c   :  { %v321_v18 = vsub.f32 1.5, %v320_v17  ;;  %v3721_v17 = vld [vmem:[%s4504_s17] ss:$0 sm:$0xff]  ;;  %s5436_s17 = sld [smem:[#allocation46_spill]] }
 0x15d   :  { %v3734_v20 = vpop.eup %3733 }
 0x15e   :  { %v322_v21 = vmul.f32 %v3732_v12, %v321_v18  ;;  %v330_v22 = vmul.f32 %v3734_v20, %v316_v13 }
 0x160   :  { %v323_v23 = vmul.f32 %v322_v21, %v315_v8  ;;  %v331_v24 = vmul.f32 %v3734_v20, %v330_v22 }
 0x162   :  { %v332_v27 = vmul.f32 0.5, %v331_v24  ;;  %v325_v28 = vsel %vm324_vm0, %v315_v8, %v323_v23 }
 0x163   :  { %v328_v29 = vsel %vm326_vm1, %v327_v26, %v325_v28 }
 0x164   :  { %v333_v30 = vsub.f32 1.5, %v332_v27  ;;  %v341_v31 = vmul.f32 1.442695, %v328_v29  ;;  %3735 = vrcp.f32 %v328_v29  ;;  %v366_v53 = vand.u32 2147483647, %v328_v29 }
 0x165   :  { %v368_v54 = vand.u32 2147483648, %v328_v29  ;;  %vm362_vm5 = vweird.f32 %v328_v29 }
 0x166   :  { %v334_v32 = vmul.f32 %v3734_v20, %v333_v30  ;;  %3737 = vpow2.f32 %v341_v31  ;;  %vm367_vm9 = vcmp.eq.f32.partialorder %v366_v53, 8.507059e+37 }
 0x167   :  { %v369_v1 = vor.u32 1.1754944e-38, %v368_v54 }
 0x168   :  { %v335_v33 = vmul.f32 %v334_v32, %v316_v13 }
 0x16a   :  { %v3736_v35 = vpop.eup %3735  ;;  %v337_v36 = vsel %vm336_vm2, %v316_v13, %v335_v33 }
 0x16b   :  { %v340_v37 = vsel %vm338_vm3, %v339_v34, %v337_v36  ;;  %v358_v40 = vmul.f32 %v3736_v35, %v328_v29  ;;  %vm363_vm4 = vweird.f32 %v3736_v35 }
 0x16c   :  { %v3738_v38 = vpop.eup %3737  ;;  %v343_v39 = vmul.f32 1.442695, %v340_v37  ;;  %3739 = vrcp.f32 %v340_v37  ;;  %vm4756_vm7 = vmor %vm362_vm5, %vm363_vm4  ;;  %vm377_vm8 = vweird.f32 %v340_v37  ;;  %v383_v58 = vand.u32 2147483648, %v340_v37 }
 0x16d   :  { %3741 = vrcp.f32 %v3738_v38  ;;  %v359_v41 = vsub.f32 1.0, %v358_v40  ;;  %v381_v62 = vand.u32 2147483647, %v340_v37 }
 0x16e   :  { %3743 = vpow2.f32 %v343_v39  ;;  %v384_v8 = vor.u32 1.1754944e-38, %v383_v58 }
 0x16f   :  { %v360_v47 = vmul.f32 %v3736_v35, %v359_v41  ;;  %vm382_vm11 = vcmp.eq.f32.partialorder %v381_v62, 8.507059e+37 }
 0x171   :  { %v361_v51 = vadd.f32 %v3736_v35, %v360_v47 }
 0x172   :  { %v3740_v42 = vpop.eup %3739 }
 0x173   :  { %v3742_v43 = vpop.eup %3741  ;;  %v373_v44 = vmul.f32 %v3740_v42, %v340_v37  ;;  %vm378_vm6 = vweird.f32 %v3740_v42  ;;  %v365_v61 = vsel %vm4756_vm7, %v3736_v35, %v361_v51 }
 0x174   :  { %v3744_v45 = vpop.eup %3743  ;;  %v351_v46 = vsub.f32 %v3738_v38, %v3742_v43  ;;  %vm379_vm10 = vmor %vm377_vm8, %vm378_vm6  ;;  %v347_v3 = vadd.f32 %v3742_v43, %v3738_v38  ;;  %v370_v7 = vsel %vm367_vm9, %v369_v1, %v365_v61  ;;  %vm566_vm9 = vcmask 130048  }
 0x175   :  { %3745 = vrcp.f32 %v3744_v45  ;;  %v374_v48 = vsub.f32 1.0, %v373_v44 }
 0x176   :  { %v353_v50 = vmul.f32 0.5, %v351_v46  ;;  %v349_v11 = vmul.f32 0.5, %v347_v3 }
 0x177   :  { %v375_v49 = vmul.f32 %v3740_v42, %v374_v48 }
 0x178   :  { %v355_v60 = vmul.f32 %v353_v50, %v4748_v0 }
 0x179   :  { %v376_v55 = vadd.f32 %v3740_v42, %v375_v49 }
 0x17a   :  { %v387_v0 = vmul.f32 %v370_v7, %v355_v60 }
 0x17b   :  { %v3746_v56 = vpop.eup %3745  ;;  %v380_v6 = vsel %vm379_vm10, %v3740_v42, %v376_v55 }
 0x17c   :  { %v352_v59 = vsub.f32 %v3744_v45, %v3746_v56  ;;  %v348_v4 = vadd.f32 %v3746_v56, %v3744_v45  ;;  %v385_v10 = vsel %vm382_vm11, %v384_v8, %v380_v6  ;;  %v390_v14 = vsel %vm389_vm12, %v349_v11, %v387_v0 }
 0x17e   :  { %v354_v5 = vmul.f32 0.5, %v352_v59  ;;  %v350_v12 = vmul.f32 0.5, %v348_v4 }
 0x180   :  { %v356_v9 = vmul.f32 %v354_v5, %v4752_v2 }
 0x182   :  { %v388_v13 = vmul.f32 %v385_v10, %v356_v9 }
 0x184   :  { %v391_v15 = vsel %vm389_vm12, %v350_v12, %v388_v13 }
 0x185   :  { %v409_v16 = vpack.c.bf16 %v391_v15, %v390_v14 }
 0x187   :  { %469 = vmatmul.bf16.vlgmr.msra.gmra.mxu0 %v409_v16 }
 0x204   :  { %v470_v18 = vpop.f32.mrf.mxu0 }
 0x205   :  { %v4773_v19 = vadd.f32 %v3721_v17, %v470_v18 }
 0x207   :  { %v475_v2 = vsel %vm389_vm12, %v4773_v19, 0.0  ;;  %v481_v20 = vmul.f32 %v4773_v19, %v4773_v19 }
 0x208   :  { %477 = vadd.xlane.f32.xlu1 %v475_v2 }
 0x209   :  { %v483_v21 = vsel %vm389_vm12, 0.0, %v481_v20 }
 0x20a   :  { %485 = vadd.xlane.f32.xlu2 %v483_v21 }
 0x20c   :  { %v472_v22 = vpop.f32.mrf.mxu0 }
 0x20d   :  { %v4782_v23 = vadd.f32 %v3721_v17, %v472_v22 }
 0x20f   :  { %v476_v24 = vsel %vm389_vm12, %v4782_v23, 0.0  ;;  %v482_v25 = vmul.f32 %v4782_v23, %v4782_v23 }
 0x210   :  { %479 = vadd.xlane.f32.xlu1 %v476_v24 }
 0x211   :  { %v484_v26 = vsel %vm389_vm12, 0.0, %v482_v25 }
 0x212   :  { %487 = vadd.xlane.f32.xlu2 %v484_v26 }
 0x27b   :  { %v478_v27 = vpop.xlane.xlu1 %477 }
 0x27c   :  { %v491_v28 = vmul.f32 0.5, %v478_v27 }
 0x27d   :  { %v486_v29 = vpop.xlane.xlu2 %485 }
 0x27e   :  { %3747 = vtanh.f32 %v491_v28  ;;  %v489_v30 = vmax.f32 %v486_v29, 1e-08 }
 0x280   :  { %3749 = vrcp.f32 %v489_v30  ;;  %v516_v42 = vand.u32 2147483647, %v489_v30  ;;  %v518_v43 = vand.u32 2147483648, %v489_v30  ;;  %vm512_vm14 = vweird.f32 %v489_v30 }
 0x282   :  { %vm517_vm0 = vcmp.eq.f32.partialorder %v516_v42, 8.507059e+37  ;;  %v519_v51 = vor.u32 1.1754944e-38, %v518_v43 }
 0x283   :  { %v480_v31 = vpop.xlane.xlu1 %479 }
 0x284   :  { %v3748_v32 = vpop.eup %3747  ;;  %v492_v33 = vmul.f32 0.5, %v480_v31 }
 0x285   :  { %v495_v34 = vadd.f32 1.0, %v3748_v32  ;;  %v488_v35 = vpop.xlane.xlu2 %487 }
 0x286   :  { %v3750_v36 = vpop.eup %3749  ;;  %3751 = vtanh.f32 %v492_v33  ;;  %v490_v37 = vmax.f32 %v488_v35, 1e-08  ;;  %v302_v33 = vld [vmem:[#allocation5] sm:$0xff] }
 0x287   :  { %v497_v38 = vmul.f32 0.5, %v495_v34  ;;  %v508_v39 = vmul.f32 %v3750_v36, %v489_v30  ;;  %vm513_vm13 = vweird.f32 %v3750_v36  ;;  %v303_v34 = vld [vmem:[#allocation5 + $0x8] sm:$0xff] }
 0x288   :  { %3753 = vrcp.f32 %v490_v37  ;;  %vm514_vm15 = vmor %vm512_vm14, %vm513_vm13  ;;  %v531_v61 = vand.u32 2147483647, %v490_v37  ;;  %v533_v62 = vand.u32 2147483648, %v490_v37  ;;  %vm527_vm2 = vweird.f32 %v490_v37 }
 0x289   :  { %v499_v40 = vmul.f32 10.0, %v497_v38  ;;  %v509_v41 = vsub.f32 1.0, %v508_v39  ;;  %v4802_v38 = vpack.c.bf16 %v303_v34, %v302_v33 }
 0x28a   :  { %v534_v6 = vor.u32 1.1754944e-38, %v533_v62  ;;  %vm532_vm4 = vcmp.eq.f32.partialorder %v531_v61, 8.507059e+37 }
 0x28b   :  { %v4791_v44 = vadd.f32 1.1, %v499_v40  ;;  %v510_v45 = vmul.f32 %v3750_v36, %v509_v41 }
 0x28c   :  { %v3752_v46 = vpop.eup %3751 }
 0x28d   :  { %v503_v47 = vmul.f32 %v4791_v44, %v4791_v44  ;;  %v511_v48 = vadd.f32 %v3750_v36, %v510_v45  ;;  %v496_v49 = vadd.f32 1.0, %v3752_v46  ;;  %v3595_v45 = vld [vmem:[#allocation8 + $0x38] sm:$0xff]  ;;  %v3594_v46 = vld [vmem:[#allocation8 + $0x30] sm:$0xff] }
 0x28e   :  { %v3754_v50 = vpop.eup %3753  ;;  %733 = vmatpush.bf16.msra.mxu3 %v3595_v45 }
 0x28f   :  { %v3236_v53 = vadd.f32 -1.0, %v503_v47  ;;  %v515_v54 = vsel %vm514_vm15, %v3750_v36, %v511_v48  ;;  %v498_v55 = vmul.f32 0.5, %v496_v49  ;;  %v523_v56 = vmul.f32 %v3754_v50, %v490_v37  ;;  %v3593_v47 = vld [vmem:[#allocation8 + $0x28] sm:$0xff] }
 0x290   :  { %v520_v57 = vsel %vm517_vm0, %v519_v51, %v515_v54  ;;  %vm528_vm1 = vweird.f32 %v3754_v50  ;;  %v3592_v51 = vld [vmem:[#allocation8 + $0x20] sm:$0xff] }
 0x291   :  { %v521_v58 = vmul.f32 %v3236_v53, %v520_v57  ;;  %v500_v59 = vmul.f32 10.0, %v498_v55  ;;  %v524_v60 = vsub.f32 1.0, %v523_v56  ;;  %vm529_vm3 = vmor %vm527_vm2, %vm528_vm1  ;;  %v3591_v55 = vld [vmem:[#allocation8 + $0x18] sm:$0xff] }
 0x292   :  { %734 = vmatpush.bf16.msra.mxu3 %v3594_v46 }
 0x293   :  { %v502_v1 = vadd.f32 1.1, %v500_v59  ;;  %v525_v3 = vmul.f32 %v3754_v50, %v524_v60  ;;  %3755 = vrsqrt.f32 %v521_v58  ;;  %vm544_vm5 = vcmp.eq.f32.partialorder %v521_v58, inf  ;;  %v3590_v60 = vld [vmem:[#allocation8 + $0x10] sm:$0xff] }
 0x294   :  { %v547_v24 = vand.u32 2147483648, %v521_v58  ;;  %vm546_vm6 = vcmp.eq.f32.partialorder %v521_v58, 0.0 }
 0x295   :  { %v504_v4 = vmul.f32 %v502_v1, %v502_v1  ;;  %v526_v5 = vadd.f32 %v3754_v50, %v525_v3 }
 0x296   :  { %735 = vmatpush.bf16.msra.mxu3 %v3593_v47 }
 0x297   :  { %v3237_v7 = vadd.f32 -1.0, %v504_v4  ;;  %v530_v8 = vsel %vm529_vm3, %v3754_v50, %v526_v5 }
 0x298   :  { %v535_v9 = vsel %vm532_vm4, %v534_v6, %v530_v8  ;;  %v3588_v6 = vld [vmem:[#allocation8] sm:$0xff] }
 0x299   :  { %v3756_v0 = vpop.eup %3755  ;;  %v536_v10 = vmul.f32 %v3237_v7, %v535_v9 }
 0x29a   :  { %v538_v11 = vmul.f32 %v3756_v0, %v521_v58  ;;  %736 = vmatpush.bf16.msra.mxu3 %v3592_v51  ;;  %v3722_v51 = vld [vmem:[%s4514_s25] ss:$0 sm:$0xff]  ;;  %s5437_s25 = sld [smem:[#allocation47_spill]] }
 0x29b   :  { %3757 = vrsqrt.f32 %v536_v10  ;;  %vm556_vm7 = vcmp.eq.f32.partialorder %v536_v10, inf  ;;  %v559_v28 = vand.u32 2147483648, %v536_v10  ;;  %vm558_vm8 = vcmp.eq.f32.partialorder %v536_v10, 0.0 }
 0x29c   :  { %v539_v12 = vmul.f32 %v3756_v0, %v538_v11 }
 0x29e   :  { %v540_v13 = vmul.f32 0.5, %v539_v12  ;;  %737 = vmatpush.bf16.msra.mxu3 %v3591_v55 }
 0x2a0   :  { %v541_v14 = vsub.f32 1.5, %v540_v13 }
 0x2a1   :  { %v3758_v15 = vpop.eup %3757 }
 0x2a2   :  { %v542_v16 = vmul.f32 %v3756_v0, %v541_v14  ;;  %v550_v17 = vmul.f32 %v3758_v15, %v536_v10  ;;  %738 = vmatpush.bf16.msra.mxu3 %v3590_v60 }
 0x2a4   :  { %v543_v18 = vmul.f32 %v542_v16, %v521_v58  ;;  %v551_v2 = vmul.f32 %v3758_v15, %v550_v17 }
 0x2a6   :  { %v552_v20 = vmul.f32 0.5, %v551_v2  ;;  %v545_v21 = vsel %vm544_vm5, %v521_v58, %v543_v18 }
 0x2a7   :  { %v548_v26 = vsel %vm546_vm6, %v547_v24, %v545_v21 }
 0x2a8   :  { %v553_v22 = vsub.f32 1.5, %v552_v20  ;;  %v561_v30 = vmul.f32 %v548_v26, %v4773_v19 }
 0x2aa   :  { %v554_v25 = vmul.f32 %v3758_v15, %v553_v22  ;;  %v563_v35 = vsel %vm389_vm12, %v4791_v44, %v561_v30 }
 0x2ac   :  { %v555_v27 = vmul.f32 %v554_v25, %v536_v10 }
 0x2ae   :  { %v557_v29 = vsel %vm556_vm7, %v536_v10, %v555_v27 }
 0x2af   :  { %v560_v31 = vsel %vm558_vm8, %v559_v28, %v557_v29 }
 0x2b0   :  { %v562_v32 = vmul.f32 %v560_v31, %v4782_v23 }
 0x2b2   :  { %v564_v36 = vsel %vm389_vm12, %v502_v1, %v562_v32  ;;  %v3589_v1 = vld [vmem:[#allocation8 + $0x8] sm:$0xff] }
 0x2b3   :  { %v565_v37 = vpack.c.bf16 %v564_v36, %v563_v35  ;;  %739 = vmatpush.bf16.msra.mxu3 %v3589_v1 }
 0x2b5   :  { %577 = vmatpush.bf16.msra.mxu1 %v565_v37 }
 0x2b7   :  { %740 = vmatpush.bf16.msra.mxu3 %v3588_v6 }
 0x2b8   :  { %3238 = vmatmul.msk.bf16.vlgmr.msra.gmra.mxu1 %vm566_vm9, %v4802_v38 }
 0x335   :  { %v4806_v19 = vpop.f32.mrf.mxu1 }
 0x336   :  { %v584_v23 = vsel %vm389_vm12, %v4806_v19, 0.0  ;;  %v590_v39 = vmul.f32 %v4806_v19, %v4806_v19 }
 0x337   :  { %586 = vadd.xlane.f32.xlu0 %v584_v23 }
 0x338   :  { %v592_v40 = vsel %vm389_vm12, 0.0, %v590_v39 }
 0x339   :  { %594 = vadd.xlane.f32.xlu2 %v592_v40 }
 0x33d   :  { %v4815_v41 = vpop.f32.mrf.mxu1 }
 0x33e   :  { %v585_v42 = vsel %vm389_vm12, %v4815_v41, 0.0  ;;  %v591_v43 = vmul.f32 %v4815_v41, %v4815_v41 }
 0x33f   :  { %588 = vadd.xlane.f32.xlu1 %v585_v42 }
 0x340   :  { %v593_v44 = vsel %vm389_vm12, 0.0, %v591_v43 }
 0x341   :  { %596 = vadd.xlane.f32.xlu0 %v593_v44 }
 0x3aa   :  { %v587_v48 = vpop.xlane.xlu0 %586 }
 0x3ab   :  { %v598_v49 = vmul.f32 %v587_v48, %v587_v48 }
 0x3ac   :  { %v595_v50 = vpop.xlane.xlu2 %594 }
 0x3ad   :  { %v600_v53 = vsub.f32 %v595_v50, %v598_v49 }
 0x3af   :  { %v602_v54 = vand.u32 2147483647, %v600_v53 }
 0x3b1   :  { %v604_v56 = vmax.f32 %v602_v54, 1e-08 }
 0x3b2   :  { %v589_v57 = vpop.xlane.xlu1 %588 }
 0x3b3   :  { %3759 = vrsqrt.f32 %v604_v56  ;;  %v599_v58 = vmul.f32 %v589_v57, %v589_v57  ;;  %vm613_vm10 = vcmp.eq.f32.partialorder %v604_v56, inf  ;;  %v616_v14 = vand.u32 2147483648, %v604_v56 }
 0x3b4   :  { %v597_v59 = vpop.xlane.xlu0 %596  ;;  %vm615_vm11 = vcmp.eq.f32.partialorder %v604_v56, 0.0 }
 0x3b5   :  { %v601_v61 = vsub.f32 %v597_v59, %v599_v58 }
 0x3b7   :  { %v603_v62 = vand.u32 2147483647, %v601_v61 }
 0x3b9   :  { %v3760_v3 = vpop.eup %3759  ;;  %v605_v4 = vmax.f32 %v603_v62, 1e-08 }
 0x3ba   :  { %v607_v5 = vmul.f32 %v3760_v3, %v604_v56 }
 0x3bb   :  { %3761 = vrsqrt.f32 %v605_v4  ;;  %vm625_vm13 = vcmp.eq.f32.partialorder %v605_v4, inf  ;;  %v628_v21 = vand.u32 2147483648, %v605_v4  ;;  %vm627_vm14 = vcmp.eq.f32.partialorder %v605_v4, 0.0 }
 0x3bc   :  { %v608_v7 = vmul.f32 %v3760_v3, %v607_v5 }
 0x3be   :  { %v609_v8 = vmul.f32 0.5, %v608_v7 }
 0x3c0   :  { %v610_v9 = vsub.f32 1.5, %v609_v8 }
 0x3c1   :  { %v3762_v0 = vpop.eup %3761 }
 0x3c2   :  { %v619_v10 = vmul.f32 %v3762_v0, %v605_v4  ;;  %v611_v11 = vmul.f32 %v3760_v3, %v610_v9 }
 0x3c4   :  { %v612_v12 = vmul.f32 %v611_v11, %v604_v56  ;;  %v620_v13 = vmul.f32 %v3762_v0, %v619_v10 }
 0x3c6   :  { %v614_v15 = vsel %vm613_vm10, %v604_v56, %v612_v12  ;;  %v621_v16 = vmul.f32 0.5, %v620_v13 }
 0x3c7   :  { %v617_v17 = vsel %vm615_vm11, %v616_v14, %v614_v15 }
 0x3c8   :  { %v622_v18 = vsub.f32 1.5, %v621_v16  ;;  %3763 = vrcp.f32 %v617_v17  ;;  %v641_v31 = vand.u32 2147483648, %v617_v17  ;;  %vm635_vm0 = vweird.f32 %v617_v17 }
 0x3c9   :  { %v639_v32 = vand.u32 2147483647, %v617_v17 }
 0x3ca   :  { %v623_v2 = vmul.f32 %v3762_v0, %v622_v18  ;;  %v642_v36 = vor.u32 1.1754944e-38, %v641_v31 }
 0x3cb   :  { %vm640_vm2 = vcmp.eq.f32.partialorder %v639_v32, 8.507059e+37 }
 0x3cc   :  { %v624_v20 = vmul.f32 %v623_v2, %v605_v4 }
 0x3ce   :  { %v3764_v22 = vpop.eup %3763  ;;  %v626_v24 = vsel %vm625_vm13, %v605_v4, %v624_v20 }
 0x3cf   :  { %v629_v25 = vsel %vm627_vm14, %v628_v21, %v626_v24  ;;  %v631_v26 = vmul.f32 %v3764_v22, %v617_v17  ;;  %vm636_vm15 = vweird.f32 %v3764_v22 }
 0x3d0   :  { %3765 = vrcp.f32 %v629_v25  ;;  %vm637_vm1 = vmor %vm635_vm0, %vm636_vm15  ;;  %v656_v37 = vand.u32 2147483648, %v629_v25  ;;  %v654_v39 = vand.u32 2147483647, %v629_v25  ;;  %vm650_vm4 = vweird.f32 %v629_v25 }
 0x3d1   :  { %v632_v27 = vsub.f32 1.0, %v631_v26 }
 0x3d2   :  { %v657_v43 = vor.u32 1.1754944e-38, %v656_v37  ;;  %vm655_vm6 = vcmp.eq.f32.partialorder %v654_v39, 8.507059e+37 }
 0x3d3   :  { %v633_v28 = vmul.f32 %v3764_v22, %v632_v27 }
 0x3d5   :  { %v634_v29 = vadd.f32 %v3764_v22, %v633_v28 }
 0x3d6   :  { %v3766_v30 = vpop.eup %3765 }
 0x3d7   :  { %v646_v33 = vmul.f32 %v3766_v30, %v629_v25  ;;  %v638_v34 = vsel %vm637_vm1, %v3764_v22, %v634_v29  ;;  %vm651_vm3 = vweird.f32 %v3766_v30 }
 0x3d8   :  { %v643_v40 = vsel %vm640_vm2, %v642_v36, %v638_v34  ;;  %vm652_vm5 = vmor %vm650_vm4, %vm651_vm3 }
 0x3d9   :  { %v647_v35 = vsub.f32 1.0, %v646_v33  ;;  %v660_v45 = vmul.f32 %v643_v40, %v4806_v19 }
 0x3db   :  { %v648_v23 = vmul.f32 %v3766_v30, %v647_v35  ;;  %v679_v48 = vmax.f32 %v660_v45, 0.0 }
 0x3dd   :  { %v649_v42 = vadd.f32 %v3766_v30, %v648_v23 }
 0x3df   :  { %v653_v44 = vsel %vm652_vm5, %v3766_v30, %v649_v42 }
 0x3e0   :  { %v658_v46 = vsel %vm655_vm6, %v657_v43, %v653_v44 }
 0x3e1   :  { %v661_v47 = vmul.f32 %v658_v46, %v4815_v41 }
 0x3e3   :  { %v680_v49 = vmax.f32 %v661_v47, 0.0 }
 0x3e5   :  { %v681_v50 = vpack.c.bf16 %v680_v49, %v679_v48 }
 0x3e7   :  { %741 = vmatmul.bf16.vlgmr.msra.gmra.mxu3 %v681_v50 }
 0x46a   :  { %v742_v53 = vpop.f32.mrf.mxu3 }
 0x46b   :  { %v4827_v54 = vadd.f32 %v3722_v51, %v742_v53 }
 0x46d   :  { %v747_v55 = vsel %vm389_vm12, %v4827_v54, 0.0  ;;  %v753_v56 = vmul.f32 %v4827_v54, %v4827_v54 }
 0x46e   :  { %749 = vadd.xlane.f32.xlu1 %v747_v55 }
 0x46f   :  { %v755_v19 = vsel %vm389_vm12, 0.0, %v753_v56 }
 0x470   :  { %757 = vadd.xlane.f32.xlu0 %v755_v19 }
 0x472   :  { %v744_v41 = vpop.f32.mrf.mxu3 }
 0x473   :  { %v4836_v57 = vadd.f32 %v3722_v51, %v744_v41 }
 0x475   :  { %v748_v58 = vsel %vm389_vm12, %v4836_v57, 0.0  ;;  %v754_v59 = vmul.f32 %v4836_v57, %v4836_v57 }
 0x476   :  { %751 = vadd.xlane.f32.xlu2 %v748_v58 }
 0x477   :  { %v756_v60 = vsel %vm389_vm12, 0.0, %v754_v59 }
 0x478   :  { %759 = vadd.xlane.f32.xlu1 %v756_v60 }
 0x4e1   :  { %v750_v61 = vpop.xlane.xlu1 %749 }
 0x4e2   :  { %v763_v62 = vmul.f32 0.5, %v750_v61 }
 0x4e3   :  { %v758_v1 = vpop.xlane.xlu0 %757 }
 0x4e4   :  { %3767 = vtanh.f32 %v763_v62  ;;  %v761_v3 = vmax.f32 %v758_v1, 1e-08 }
 0x4e6   :  { %3769 = vrcp.f32 %v761_v3  ;;  %v788_v14 = vand.u32 2147483647, %v761_v3  ;;  %v790_v15 = vand.u32 2147483648, %v761_v3  ;;  %vm784_vm8 = vweird.f32 %v761_v3 }
 0x4e8   :  { %vm789_vm11 = vcmp.eq.f32.partialorder %v788_v14, 8.507059e+37  ;;  %v791_v24 = vor.u32 1.1754944e-38, %v790_v15 }
 0x4e9   :  { %v752_v4 = vpop.xlane.xlu2 %751 }
 0x4ea   :  { %v3768_v5 = vpop.eup %3767  ;;  %v764_v6 = vmul.f32 0.5, %v752_v4 }
 0x4eb   :  { %v767_v7 = vadd.f32 1.0, %v3768_v5  ;;  %v760_v8 = vpop.xlane.xlu1 %759 }
 0x4ec   :  { %v3770_v9 = vpop.eup %3769  ;;  %3771 = vtanh.f32 %v764_v6  ;;  %v762_v0 = vmax.f32 %v760_v8, 1e-08 }
 0x4ed   :  { %v769_v10 = vmul.f32 0.5, %v767_v7  ;;  %v780_v11 = vmul.f32 %v3770_v9, %v761_v3  ;;  %vm785_vm7 = vweird.f32 %v3770_v9 }
 0x4ee   :  { %3773 = vrcp.f32 %v762_v0  ;;  %vm786_vm10 = vmor %vm784_vm8, %vm785_vm7  ;;  %v803_v33 = vand.u32 2147483647, %v762_v0  ;;  %v805_v34 = vand.u32 2147483648, %v762_v0  ;;  %vm799_vm14 = vweird.f32 %v762_v0 }
 0x4ef   :  { %v771_v12 = vmul.f32 10.0, %v769_v10  ;;  %v781_v13 = vsub.f32 1.0, %v780_v11 }
 0x4f0   :  { %v806_v39 = vor.u32 1.1754944e-38, %v805_v34  ;;  %vm804_vm0 = vcmp.eq.f32.partialorder %v803_v33, 8.507059e+37 }
 0x4f1   :  { %v4845_v16 = vadd.f32 1.1, %v771_v12  ;;  %v782_v17 = vmul.f32 %v3770_v9, %v781_v13 }
 0x4f2   :  { %v3772_v18 = vpop.eup %3771 }
 0x4f3   :  { %v775_v2 = vmul.f32 %v4845_v16, %v4845_v16  ;;  %v783_v20 = vadd.f32 %v3770_v9, %v782_v17  ;;  %v768_v21 = vadd.f32 1.0, %v3772_v18 }
 0x4f4   :  { %v3774_v22 = vpop.eup %3773 }
 0x4f5   :  { %v3271_v25 = vadd.f32 -1.0, %v775_v2  ;;  %v787_v26 = vsel %vm786_vm10, %v3770_v9, %v783_v20  ;;  %v770_v27 = vmul.f32 0.5, %v768_v21  ;;  %v795_v28 = vmul.f32 %v3774_v22, %v762_v0 }
 0x4f6   :  { %v792_v29 = vsel %vm789_vm11, %v791_v24, %v787_v26  ;;  %vm800_vm13 = vweird.f32 %v3774_v22 }
 0x4f7   :  { %v793_v30 = vmul.f32 %v3271_v25, %v792_v29  ;;  %v772_v31 = vmul.f32 10.0, %v770_v27  ;;  %v796_v32 = vsub.f32 1.0, %v795_v28  ;;  %vm801_vm15 = vmor %vm799_vm14, %vm800_vm13 }
 0x4f9   :  { %v774_v35 = vadd.f32 1.1, %v772_v31  ;;  %v797_v36 = vmul.f32 %v3774_v22, %v796_v32  ;;  %3775 = vrsqrt.f32 %v793_v30  ;;  %vm816_vm1 = vcmp.eq.f32.partialorder %v793_v30, inf }
 0x4fa   :  { %v819_v59 = vand.u32 2147483648, %v793_v30  ;;  %vm818_vm2 = vcmp.eq.f32.partialorder %v793_v30, 0.0 }
 0x4fb   :  { %v776_v37 = vmul.f32 %v774_v35, %v774_v35  ;;  %v798_v23 = vadd.f32 %v3774_v22, %v797_v36 }
 0x4fd   :  { %v3272_v40 = vadd.f32 -1.0, %v776_v37  ;;  %v802_v42 = vsel %vm801_vm15, %v3774_v22, %v798_v23 }
 0x4fe   :  { %v807_v43 = vsel %vm804_vm0, %v806_v39, %v802_v42 }
 0x4ff   :  { %v3776_v44 = vpop.eup %3775  ;;  %v808_v45 = vmul.f32 %v3272_v40, %v807_v43 }
 0x500   :  { %v810_v46 = vmul.f32 %v3776_v44, %v793_v30 }
 0x501   :  { %3777 = vrsqrt.f32 %v808_v45  ;;  %vm828_vm3 = vcmp.eq.f32.partialorder %v808_v45, inf  ;;  %v831_v1 = vand.u32 2147483648, %v808_v45  ;;  %vm830_vm4 = vcmp.eq.f32.partialorder %v808_v45, 0.0 }
 0x502   :  { %v811_v47 = vmul.f32 %v3776_v44, %v810_v46 }
 0x504   :  { %v812_v48 = vmul.f32 0.5, %v811_v47 }
 0x506   :  { %v813_v49 = vsub.f32 1.5, %v812_v48 }
 0x507   :  { %v3778_v50 = vpop.eup %3777 }
 0x508   :  { %v814_v51 = vmul.f32 %v3776_v44, %v813_v49  ;;  %v822_v53 = vmul.f32 %v3778_v50, %v808_v45 }
 0x50a   :  { %v815_v55 = vmul.f32 %v814_v51, %v793_v30  ;;  %v823_v56 = vmul.f32 %v3778_v50, %v822_v53 }
 0x50c   :  { %v824_v19 = vmul.f32 0.5, %v823_v56  ;;  %v817_v41 = vsel %vm816_vm1, %v793_v30, %v815_v55 }
 0x50d   :  { %v820_v61 = vsel %vm818_vm2, %v819_v59, %v817_v41 }
 0x50e   :  { %v825_v58 = vsub.f32 1.5, %v824_v19  ;;  %v833_v4 = vmul.f32 %v820_v61, %v4827_v54 }
 0x510   :  { %v826_v60 = vmul.f32 %v3778_v50, %v825_v58  ;;  %v835_v7 = vsel %vm389_vm12, %v4845_v16, %v833_v4 }
 0x512   :  { %v827_v62 = vmul.f32 %v826_v60, %v808_v45 }
 0x514   :  { %v829_v3 = vsel %vm828_vm3, %v808_v45, %v827_v62 }
 0x515   :  { %v832_v5 = vsel %vm830_vm4, %v831_v1, %v829_v3 }
 0x516   :  { %v834_v6 = vmul.f32 %v832_v5, %v4836_v57 }
 0x518   :  { %v836_v8 = vsel %vm389_vm12, %v774_v35, %v834_v6 }
 0x519   :  { %v837_v9 = vpack.c.bf16 %v836_v8, %v835_v7 }
 0x51b   :  { %845 = vmatpush.bf16.msrb.mxu3 %v837_v9 }
 0x51e   :  { %3273 = vmatmul.msk.bf16.vlgmr.msrb.gmra.mxu3 %vm566_vm9, %v4802_v38 }
 0x5a1   :  { %v4858_v0 = vpop.f32.mrf.mxu3 }
 0x5a2   :  { %v852_v54 = vsel %vm389_vm12, %v4858_v0, 0.0  ;;  %v858_v57 = vmul.f32 %v4858_v0, %v4858_v0 }
 0x5a3   :  { %854 = vadd.xlane.f32.xlu2 %v852_v54 }
 0x5a4   :  { %v860_v10 = vsel %vm389_vm12, 0.0, %v858_v57 }
 0x5a5   :  { %862 = vadd.xlane.f32.xlu1 %v860_v10 }
 0x5a9   :  { %v4867_v11 = vpop.f32.mrf.mxu3 }
 0x5aa   :  { %v853_v12 = vsel %vm389_vm12, %v4867_v11, 0.0  ;;  %v859_v13 = vmul.f32 %v4867_v11, %v4867_v11 }
 0x5ab   :  { %856 = vadd.xlane.f32.xlu0 %v853_v12 }
 0x5ac   :  { %v861_v14 = vsel %vm389_vm12, 0.0, %v859_v13 }
 0x5ad   :  { %864 = vadd.xlane.f32.xlu2 %v861_v14 }
 0x616   :  { %v855_v15 = vpop.xlane.xlu2 %854 }
 0x617   :  { %v866_v16 = vmul.f32 %v855_v15, %v855_v15 }
 0x618   :  { %v863_v17 = vpop.xlane.xlu1 %862 }
 0x619   :  { %v868_v18 = vsub.f32 %v863_v17, %v866_v16 }
 0x61b   :  { %v870_v2 = vand.u32 2147483647, %v868_v18 }
 0x61d   :  { %v872_v20 = vmax.f32 %v870_v2, 1e-08 }
 0x61e   :  { %v857_v21 = vpop.xlane.xlu0 %856 }
 0x61f   :  { %3779 = vrsqrt.f32 %v872_v20  ;;  %v867_v22 = vmul.f32 %v857_v21, %v857_v21  ;;  %vm881_vm5 = vcmp.eq.f32.partialorder %v872_v20, inf  ;;  %v884_v23 = vand.u32 2147483648, %v872_v20 }
 0x620   :  { %v865_v24 = vpop.xlane.xlu2 %864  ;;  %vm883_vm6 = vcmp.eq.f32.partialorder %v872_v20, 0.0 }
 0x621   :  { %v869_v25 = vsub.f32 %v865_v24, %v867_v22 }
 0x623   :  { %v871_v26 = vand.u32 2147483647, %v869_v25 }
 0x625   :  { %v3780_v27 = vpop.eup %3779  ;;  %v873_v28 = vmax.f32 %v871_v26, 1e-08 }
 0x626   :  { %v875_v29 = vmul.f32 %v3780_v27, %v872_v20 }
 0x627   :  { %3781 = vrsqrt.f32 %v873_v28  ;;  %vm893_vm7 = vcmp.eq.f32.partialorder %v873_v28, inf  ;;  %v896_v47 = vand.u32 2147483648, %v873_v28  ;;  %vm895_vm8 = vcmp.eq.f32.partialorder %v873_v28, 0.0 }
 0x628   :  { %v876_v30 = vmul.f32 %v3780_v27, %v875_v29 }
 0x62a   :  { %v877_v31 = vmul.f32 0.5, %v876_v30 }
 0x62c   :  { %v878_v32 = vsub.f32 1.5, %v877_v31 }
 0x62d   :  { %v3782_v33 = vpop.eup %3781 }
 0x62e   :  { %v887_v34 = vmul.f32 %v3782_v33, %v873_v28  ;;  %v879_v35 = vmul.f32 %v3780_v27, %v878_v32 }
 0x630   :  { %v880_v36 = vmul.f32 %v879_v35, %v872_v20  ;;  %v888_v37 = vmul.f32 %v3782_v33, %v887_v34 }
 0x632   :  { %v882_v39 = vsel %vm881_vm5, %v872_v20, %v880_v36  ;;  %v889_v40 = vmul.f32 0.5, %v888_v37 }
 0x633   :  { %v885_v42 = vsel %vm883_vm6, %v884_v23, %v882_v39 }
 0x634   :  { %3783 = vrcp.f32 %v885_v42  ;;  %v890_v43 = vsub.f32 1.5, %v889_v40  ;;  %v909_v53 = vand.u32 2147483648, %v885_v42  ;;  %v907_v56 = vand.u32 2147483647, %v885_v42 }
 0x635   :  { %vm903_vm11 = vweird.f32 %v885_v42 }
 0x636   :  { %v891_v44 = vmul.f32 %v3782_v33, %v890_v43  ;;  %v910_v41 = vor.u32 1.1754944e-38, %v909_v53  ;;  %vm908_vm14 = vcmp.eq.f32.partialorder %v907_v56, 8.507059e+37 }
 0x638   :  { %v892_v45 = vmul.f32 %v891_v44, %v873_v28 }
 0x63a   :  { %v3784_v46 = vpop.eup %3783  ;;  %v894_v49 = vsel %vm893_vm7, %v873_v28, %v892_v45 }
 0x63b   :  { %v899_v48 = vmul.f32 %v3784_v46, %v885_v42  ;;  %v897_v50 = vsel %vm895_vm8, %v896_v47, %v894_v49  ;;  %vm904_vm10 = vweird.f32 %v3784_v46 }
 0x63c   :  { %3785 = vrcp.f32 %v897_v50  ;;  %vm905_vm13 = vmor %vm903_vm11, %vm904_vm10  ;;  %v924_v4 = vand.u32 2147483648, %v897_v50  ;;  %v922_v6 = vand.u32 2147483647, %v897_v50  ;;  %vm918_vm0 = vweird.f32 %v897_v50 }
 0x63d   :  { %v900_v51 = vsub.f32 1.0, %v899_v48 }
 0x63e   :  { %v925_v8 = vor.u32 1.1754944e-38, %v924_v4  ;;  %vm923_vm2 = vcmp.eq.f32.partialorder %v922_v6, 8.507059e+37 }
 0x63f   :  { %v901_v55 = vmul.f32 %v3784_v46, %v900_v51 }
 0x641   :  { %v902_v19 = vadd.f32 %v3784_v46, %v901_v55 }
 0x642   :  { %v3786_v58 = vpop.eup %3785 }
 0x643   :  { %v906_v59 = vsel %vm905_vm13, %v3784_v46, %v902_v19  ;;  %v914_v61 = vmul.f32 %v3786_v58, %v897_v50  ;;  %vm919_vm15 = vweird.f32 %v3786_v58 }
 0x644   :  { %v911_v60 = vsel %vm908_vm14, %v910_v41, %v906_v59  ;;  %vm920_vm1 = vmor %vm918_vm0, %vm919_vm15 }
 0x645   :  { %v928_v62 = vmul.f32 %v911_v60, %v4858_v0  ;;  %v915_v1 = vsub.f32 1.0, %v914_v61  ;;  %v3603_v61 = vld [vmem:[#allocation10 + $0x38] sm:$0xff] }
 0x646   :  { %1206 = vmatpush.bf16.msrb.mxu1 %v3603_v61 }
 0x647   :  { %v930_v3 = vsel %vm389_vm12, %v928_v62, 0.0  ;;  %v916_v5 = vmul.f32 %v3786_v58, %v915_v1  ;;  %v936_v26 = vsel %vm389_vm12, 0.0, %v928_v62  ;;  %v3602_v1 = vld [vmem:[#allocation10 + $0x30] sm:$0xff] }
 0x648   :  { %932 = vadd.xlane.f32.xlu0 %v930_v3 }
 0x649   :  { %v917_v7 = vadd.f32 %v3786_v58, %v916_v5 }
 0x64a   :  { %1207 = vmatpush.bf16.msrb.mxu1 %v3602_v1  ;;  %v3620_v1 = vld [vmem:[#allocation14] sm:$0xff] }
 0x64b   :  { %v921_v9 = vsel %vm920_vm1, %v3786_v58, %v917_v7 }
 0x64c   :  { %v926_v54 = vsel %vm923_vm2, %v925_v8, %v921_v9  ;;  %v3601_v8 = vld [vmem:[#allocation10 + $0x28] sm:$0xff] }
 0x64d   :  { %v929_v57 = vmul.f32 %v926_v54, %v4867_v11 }
 0x64e   :  { %1208 = vmatpush.bf16.msrb.mxu1 %v3601_v8 }
 0x64f   :  { %v931_v0 = vsel %vm389_vm12, %v929_v57, 0.0  ;;  %v937_v37 = vsel %vm389_vm12, 0.0, %v929_v57 }
 0x650   :  { %934 = vadd.xlane.f32.xlu1 %v931_v0 }
 0x6bb   :  { %v933_v10 = vpop.xlane.xlu0 %932 }
 0x6bc   :  { %v938_v12 = vadd.f32 1.0, %v933_v10 }
 0x6be   :  { %3787 = vrcp.f32 %v938_v12  ;;  %v951_v18 = vand.u32 2147483648, %v938_v12  ;;  %v949_v20 = vand.u32 2147483647, %v938_v12  ;;  %vm945_vm4 = vweird.f32 %v938_v12 }
 0x6c0   :  { %v952_v11 = vor.u32 1.1754944e-38, %v951_v18  ;;  %vm950_vm6 = vcmp.eq.f32.partialorder %v949_v20, 8.507059e+37 }
 0x6c3   :  { %v935_v14 = vpop.xlane.xlu1 %934 }
 0x6c4   :  { %v3788_v13 = vpop.eup %3787  ;;  %v939_v16 = vadd.f32 1.0, %v935_v14 }
 0x6c5   :  { %v941_v15 = vmul.f32 %v3788_v13, %v938_v12  ;;  %vm946_vm3 = vweird.f32 %v3788_v13 }
 0x6c6   :  { %3789 = vrcp.f32 %v939_v16  ;;  %vm947_vm5 = vmor %vm945_vm4, %vm946_vm3  ;;  %v966_v31 = vand.u32 2147483648, %v939_v16  ;;  %v964_v33 = vand.u32 2147483647, %v939_v16  ;;  %vm960_vm8 = vweird.f32 %v939_v16 }
 0x6c7   :  { %v942_v17 = vsub.f32 1.0, %v941_v15 }
 0x6c8   :  { %v967_v35 = vor.u32 1.1754944e-38, %v966_v31  ;;  %vm965_vm11 = vcmp.eq.f32.partialorder %v964_v33, 8.507059e+37  ;;  %v3600_v33 = vld [vmem:[#allocation10 + $0x20] sm:$0xff] }
 0x6c9   :  { %v943_v2 = vmul.f32 %v3788_v13, %v942_v17  ;;  %1209 = vmatpush.bf16.msrb.mxu1 %v3600_v33 }
 0x6cb   :  { %v944_v21 = vadd.f32 %v3788_v13, %v943_v2 }
 0x6cc   :  { %v3790_v22 = vpop.eup %3789 }
 0x6cd   :  { %v948_v24 = vsel %vm947_vm5, %v3788_v13, %v944_v21  ;;  %v956_v25 = vmul.f32 %v3790_v22, %v939_v16  ;;  %vm961_vm7 = vweird.f32 %v3790_v22 }
 0x6ce   :  { %v953_v27 = vsel %vm950_vm6, %v952_v11, %v948_v24  ;;  %vm962_vm10 = vmor %vm960_vm8, %vm961_vm7 }
 0x6cf   :  { %v4884_v28 = vmul.f32 %v953_v27, %v936_v26  ;;  %v957_v29 = vsub.f32 1.0, %v956_v25 }
 0x6d1   :  { %v972_v30 = vmul.f32 %v4884_v28, %v4884_v28  ;;  %v958_v32 = vmul.f32 %v3790_v22, %v957_v29 }
 0x6d3   :  { %974 = vadd.xlane.f32.xlu2 %v972_v30  ;;  %v959_v34 = vadd.f32 %v3790_v22, %v958_v32 }
 0x6d5   :  { %v963_v36 = vsel %vm962_vm10, %v3790_v22, %v959_v34  ;;  %v3619_v34 = vld [vmem:[#allocation13 + $0x38] sm:$0xff] }
 0x6d6   :  { %v968_v23 = vsel %vm965_vm11, %v967_v35, %v963_v36  ;;  %1616 = vmatpush.bf16.msra.mxu2 %v3619_v34  ;;  %v3599_v35 = vld [vmem:[#allocation10 + $0x18] sm:$0xff]  ;;  %v3618_v36 = vld [vmem:[#allocation13 + $0x30] sm:$0xff] }
 0x6d7   :  { %v4890_v39 = vmul.f32 %v968_v23, %v937_v37  ;;  %1210 = vmatpush.bf16.msrb.mxu1 %v3599_v35  ;;  %v3598_v37 = vld [vmem:[#allocation10 + $0x10] sm:$0xff]  ;;  %v3617_v23 = vld [vmem:[#allocation13 + $0x28] sm:$0xff] }
 0x6d9   :  { %v973_v40 = vmul.f32 %v4890_v39, %v4890_v39 }
 0x6da   :  { %1617 = vmatpush.bf16.msra.mxu2 %v3618_v36 }
 0x6db   :  { %976 = vadd.xlane.f32.xlu0 %v973_v40  ;;  %1211 = vmatpush.bf16.msrb.mxu1 %v3598_v37  ;;  %v3597_v40 = vld [vmem:[#allocation10 + $0x8] sm:$0xff] }
 0x6de   :  { %1618 = vmatpush.bf16.msra.mxu2 %v3617_v23 }
 0x6df   :  { %1212 = vmatpush.bf16.msrb.mxu1 %v3597_v40  ;;  %v3611_v40 = vld [vmem:[#allocation11 + $0x38] sm:$0xff] }
 0x6e0   :  { %1364 = vmatpush.bf16.msra.mxu3 %v3611_v40 }
 0x746   :  { %v975_v42 = vpop.xlane.xlu2 %974 }
 0x747   :  { %3791 = vrsqrt.f32 %v975_v42  ;;  %vm985_vm13 = vcmp.eq.f32.partialorder %v975_v42, inf  ;;  %v988_v55 = vand.u32 2147483648, %v975_v42  ;;  %vm987_vm14 = vcmp.eq.f32.partialorder %v975_v42, 0.0 }
 0x74d   :  { %v3792_v43 = vpop.eup %3791 }
 0x74e   :  { %v979_v44 = vmul.f32 %v3792_v43, %v975_v42  ;;  %v977_v45 = vpop.xlane.xlu0 %976 }
 0x74f   :  { %3793 = vrsqrt.f32 %v977_v45  ;;  %vm997_vm15 = vcmp.eq.f32.partialorder %v977_v45, inf  ;;  %v1000_v4 = vand.u32 2147483648, %v977_v45  ;;  %vm999_vm0 = vcmp.eq.f32.partialorder %v977_v45, 0.0 }
 0x750   :  { %v980_v46 = vmul.f32 %v3792_v43, %v979_v44  ;;  %v3627_v44 = vld [vmem:[#allocation14 + $0x38] sm:$0xff] }
 0x752   :  { %v981_v47 = vmul.f32 0.5, %v980_v46  ;;  %v3626_v46 = vld [vmem:[#allocation14 + $0x30] sm:$0xff] }
 0x754   :  { %v982_v48 = vsub.f32 1.5, %v981_v47  ;;  %v3613_v47 = vld [vmem:[#allocation13 + $0x8] sm:$0xff] }
 0x755   :  { %v3794_v49 = vpop.eup %3793 }
 0x756   :  { %v983_v50 = vmul.f32 %v3792_v43, %v982_v48  ;;  %v991_v51 = vmul.f32 %v3794_v49, %v977_v45  ;;  %v3615_v43 = vld [vmem:[#allocation13 + $0x18] sm:$0xff]  ;;  %v3625_v48 = vld [vmem:[#allocation14 + $0x28] sm:$0xff] }
 0x758   :  { %v984_v53 = vmul.f32 %v983_v50, %v975_v42  ;;  %v992_v56 = vmul.f32 %v3794_v49, %v991_v51  ;;  %v3624_v50 = vld [vmem:[#allocation14 + $0x20] sm:$0xff] }
 0x75a   :  { %v986_v19 = vsel %vm985_vm13, %v975_v42, %v984_v53  ;;  %v993_v58 = vmul.f32 0.5, %v992_v56  ;;  %v3616_v42 = vld [vmem:[#allocation13 + $0x20] sm:$0xff]  ;;  %v3623_v56 = vld [vmem:[#allocation14 + $0x18] sm:$0xff] }
 0x75b   :  { %v989_v41 = vsel %vm987_vm14, %v988_v55, %v986_v19  ;;  %1619 = vmatpush.bf16.msra.mxu2 %v3616_v42  ;;  %v3622_v19 = vld [vmem:[#allocation14 + $0x10] sm:$0xff] }
 0x75c   :  { %v1002_v59 = vmax.f32 %v989_v41, 1e-12  ;;  %v994_v60 = vsub.f32 1.5, %v993_v58  ;;  %v3621_v58 = vld [vmem:[#allocation14 + $0x8] sm:$0xff]  ;;  %v3610_v42 = vld [vmem:[#allocation11 + $0x30] sm:$0xff] }
 0x75d   :  { %1365 = vmatpush.bf16.msra.mxu3 %v3610_v42 }
 0x75e   :  { %3795 = vrcp.f32 %v1002_v59  ;;  %v995_v62 = vmul.f32 %v3794_v49, %v994_v60  ;;  %v1015_v0 = vand.u32 2147483648, %v1002_v59  ;;  %v1013_v12 = vand.u32 2147483647, %v1002_v59  ;;  %v3612_v49 = vld [vmem:[#allocation13] sm:$0xff] }
 0x75f   :  { %vm1009_vm2 = vweird.f32 %v1002_v59  ;;  %1620 = vmatpush.bf16.msra.mxu2 %v3615_v43 }
 0x760   :  { %v996_v3 = vmul.f32 %v995_v62, %v977_v45  ;;  %v1016_v14 = vor.u32 1.1754944e-38, %v1015_v0  ;;  %vm1014_vm4 = vcmp.eq.f32.partialorder %v1013_v12, 8.507059e+37 }
 0x762   :  { %v998_v5 = vsel %vm997_vm15, %v977_v45, %v996_v3  ;;  %v3614_v45 = vld [vmem:[#allocation13 + $0x10] sm:$0xff] }
 0x763   :  { %v1001_v7 = vsel %vm999_vm0, %v1000_v4, %v998_v5  ;;  %1621 = vmatpush.bf16.msra.mxu2 %v3614_v45  ;;  %v3609_v45 = vld [vmem:[#allocation11 + $0x28] sm:$0xff] }
 0x764   :  { %v3796_v6 = vpop.eup %3795  ;;  %v1003_v9 = vmax.f32 %v1001_v7, 1e-12  ;;  %1366 = vmatpush.bf16.msra.mxu3 %v3609_v45 }
 0x765   :  { %v1005_v54 = vmul.f32 %v3796_v6, %v1002_v59  ;;  %vm1010_vm1 = vweird.f32 %v3796_v6 }
 0x766   :  { %3797 = vrcp.f32 %v1003_v9  ;;  %vm1011_vm3 = vmor %vm1009_vm2, %vm1010_vm1  ;;  %v1030_v11 = vand.u32 2147483648, %v1003_v9  ;;  %v1028_v24 = vand.u32 2147483647, %v1003_v9  ;;  %vm1024_vm6 = vweird.f32 %v1003_v9 }
 0x767   :  { %v1006_v57 = vsub.f32 1.0, %v1005_v54  ;;  %1622 = vmatpush.bf16.msra.mxu2 %v3613_v47  ;;  %v3608_v47 = vld [vmem:[#allocation11 + $0x20] sm:$0xff] }
 0x768   :  { %v1031_v27 = vor.u32 1.1754944e-38, %v1030_v11  ;;  %vm1029_vm8 = vcmp.eq.f32.partialorder %v1028_v24, 8.507059e+37  ;;  %1367 = vmatpush.bf16.msra.mxu3 %v3608_v47 }
 0x769   :  { %v1007_v10 = vmul.f32 %v3796_v6, %v1006_v57 }
 0x76b   :  { %v1008_v13 = vadd.f32 %v3796_v6, %v1007_v10  ;;  %1623 = vmatpush.bf16.msra.mxu2 %v3612_v49 }
 0x76c   :  { %v3798_v15 = vpop.eup %3797 }
 0x76d   :  { %v1012_v16 = vsel %vm1011_vm3, %v3796_v6, %v1008_v13  ;;  %v1020_v18 = vmul.f32 %v3798_v15, %v1003_v9  ;;  %vm1025_vm5 = vweird.f32 %v3798_v15 }
 0x76e   :  { %v1017_v17 = vsel %vm1014_vm4, %v1016_v14, %v1012_v16  ;;  %vm1026_vm7 = vmor %vm1024_vm6, %vm1025_vm5 }
 0x76f   :  { %v1018_v2 = vmul.f32 0.999, %v1017_v17  ;;  %v1021_v20 = vsub.f32 1.0, %v1020_v18 }
 0x771   :  { %v4895_v21 = vmul.f32 %v1018_v2, %v4884_v28  ;;  %v1022_v22 = vmul.f32 %v3798_v15, %v1021_v20 }
 0x773   :  { %v1036_v25 = vmul.f32 %v4895_v21, %v4895_v21  ;;  %v1023_v26 = vadd.f32 %v3798_v15, %v1022_v22  ;;  %v1044_v9 = vmul.f32 2.0, %v4895_v21 }
 0x775   :  { %1038 = vadd.xlane.f32.xlu1 %v1036_v25  ;;  %v1027_v29 = vsel %vm1026_vm7, %v3798_v15, %v1023_v26 }
 0x776   :  { %v1032_v30 = vsel %vm1029_vm8, %v1031_v27, %v1027_v29  ;;  %v3723_v29 = vld [vmem:[%s5436_s17] ss:$0 sm:$0xff] }
 0x777   :  { %v1033_v31 = vmul.f32 0.999, %v1032_v30 }
 0x779   :  { %v4900_v32 = vmul.f32 %v1033_v31, %v4890_v39  ;;  %v3596_v39 = vld [vmem:[#allocation10] sm:$0xff] }
 0x77a   :  { %1213 = vmatpush.bf16.msrb.mxu1 %v3596_v39 }
 0x77b   :  { %v1037_v28 = vmul.f32 %v4900_v32, %v4900_v32  ;;  %v1045_v21 = vmul.f32 2.0, %v4900_v32 }
 0x77d   :  { %1040 = vadd.xlane.f32.xlu2 %v1037_v28 }
 0x77e   :  { %1771 = vmatpush.bf16.msra.mxu1 %v3627_v44 }
 0x782   :  { %1772 = vmatpush.bf16.msra.mxu1 %v3626_v46 }
 0x786   :  { %1773 = vmatpush.bf16.msra.mxu1 %v3625_v48 }
 0x78a   :  { %1774 = vmatpush.bf16.msra.mxu1 %v3624_v50 }
 0x78e   :  { %1775 = vmatpush.bf16.msra.mxu1 %v3623_v56 }
 0x792   :  { %1776 = vmatpush.bf16.msra.mxu1 %v3622_v19 }
 0x796   :  { %1777 = vmatpush.bf16.msra.mxu1 %v3621_v58 }
 0x79a   :  { %1778 = vmatpush.bf16.msra.mxu1 %v3620_v1 }
 0x7e8   :  { %v1039_v51 = vpop.xlane.xlu1 %1038 }
 0x7e9   :  { %v1048_v53 = vsub.f32 1.0, %v1039_v51  ;;  %v1042_v7 = vadd.f32 1.0, %v1039_v51 }
 0x7eb   :  { %v1050_v55 = vadd.f32 1e-06, %v1048_v53  ;;  %v1046_v10 = vsel %vm389_vm12, %v1042_v7, %v1044_v9  ;;  %v3605_v9 = vld [vmem:[#allocation11 + $0x8] sm:$0xff] }
 0x7ed   :  { %3799 = vrcp.f32 %v1050_v55  ;;  %v1063_v4 = vand.u32 2147483648, %v1050_v55  ;;  %v1061_v6 = vand.u32 2147483647, %v1050_v55  ;;  %vm1057_vm11 = vweird.f32 %v1050_v55 }
 0x7ef   :  { %v1064_v54 = vor.u32 1.1754944e-38, %v1063_v4  ;;  %vm1062_vm14 = vcmp.eq.f32.partialorder %v1061_v6, 8.507059e+37 }
 0x7f0   :  { %v1041_v41 = vpop.xlane.xlu2 %1040 }
 0x7f1   :  { %v1049_v59 = vsub.f32 1.0, %v1041_v41  ;;  %v1043_v2 = vadd.f32 1.0, %v1041_v41 }
 0x7f3   :  { %v3800_v60 = vpop.eup %3799  ;;  %v1051_v62 = vadd.f32 1e-06, %v1049_v59  ;;  %v1047_v24 = vsel %vm389_vm12, %v1043_v2, %v1045_v21 }
 0x7f4   :  { %v1053_v61 = vmul.f32 %v3800_v60, %v1050_v55  ;;  %vm1058_vm10 = vweird.f32 %v3800_v60  ;;  %v3607_v55 = vld [vmem:[#allocation11 + $0x18] sm:$0xff] }
 0x7f5   :  { %3801 = vrcp.f32 %v1051_v62  ;;  %vm1059_vm13 = vmor %vm1057_vm11, %vm1058_vm10  ;;  %v1078_v16 = vand.u32 2147483648, %v1051_v62  ;;  %v1076_v18 = vand.u32 2147483647, %v1051_v62  ;;  %vm1072_vm0 = vweird.f32 %v1051_v62  ;;  %1368 = vmatpush.bf16.msra.mxu3 %v3607_v55 }
 0x7f6   :  { %v1054_v3 = vsub.f32 1.0, %v1053_v61  ;;  %v3606_v61 = vld [vmem:[#allocation11 + $0x10] sm:$0xff] }
 0x7f7   :  { %v1079_v11 = vor.u32 1.1754944e-38, %v1078_v16  ;;  %vm1077_vm2 = vcmp.eq.f32.partialorder %v1076_v18, 8.507059e+37  ;;  %v3604_v18 = vld [vmem:[#allocation11] sm:$0xff] }
 0x7f8   :  { %v1055_v5 = vmul.f32 %v3800_v60, %v1054_v3 }
 0x7f9   :  { %1369 = vmatpush.bf16.msra.mxu3 %v3606_v61 }
 0x7fa   :  { %v1056_v8 = vadd.f32 %v3800_v60, %v1055_v5 }
 0x7fb   :  { %v3802_v57 = vpop.eup %3801 }
 0x7fc   :  { %v1060_v0 = vsel %vm1059_vm13, %v3800_v60, %v1056_v8  ;;  %v1068_v13 = vmul.f32 %v3802_v57, %v1051_v62  ;;  %vm1073_vm15 = vweird.f32 %v3802_v57 }
 0x7fd   :  { %v1065_v12 = vsel %vm1062_vm14, %v1064_v54, %v1060_v0  ;;  %vm1074_vm1 = vmor %vm1072_vm0, %vm1073_vm15  ;;  %1370 = vmatpush.bf16.msra.mxu3 %v3605_v9 }
 0x7fe   :  { %v1082_v14 = vmul.f32 %v1065_v12, %v1046_v10  ;;  %v1069_v15 = vsub.f32 1.0, %v1068_v13 }
 0x800   :  { %1084 = vst [vmem:[#allocation22] sm:$0xff] %v1082_v14  ;;  %v1070_v17 = vmul.f32 %v3802_v57, %v1069_v15 }
 0x801   :  { %1371 = vmatpush.bf16.msra.mxu3 %v3604_v18 }
 0x802   :  { %v1071_v20 = vadd.f32 %v3802_v57, %v1070_v17 }
 0x804   :  { %v1075_v22 = vsel %vm1074_vm1, %v3802_v57, %v1071_v20 }
 0x805   :  { %v1080_v25 = vsel %vm1077_vm2, %v1079_v11, %v1075_v22 }
 0x806   :  { %v1083_v26 = vmul.f32 %v1080_v25, %v1047_v24 }
 0x808   :  { %1085 = vst [vmem:[#allocation22 + $0x8] sm:$0xff] %v1083_v26  ;;  %v4910_v27 = vpack.c.bf16 %v1083_v26, %v1082_v14 }
 0x80a   :  { %1214 = vmatmul.bf16.vlgmr.msrb.gmra.mxu1 %v4910_v27  ;;  %1624 = vmatmul.bf16.vlgmr.msra.gmra.mxu2 %v4910_v27 }
 0x81a   :  { %1779 = vmatmul.bf16.vlgmr.msra.gmra.mxu1 %v4910_v27 }
 0x887   :  { %v1215_v30 = vpop.f32.mrf.mxu1 }
 0x888   :  { %v4916_v31 = vadd.f32 %v3723_v29, %v1215_v30 }
 0x88a   :  { %v1220_v32 = vsel %vm389_vm12, %v4916_v31, 0.0  ;;  %v1226_v28 = vmul.f32 %v4916_v31, %v4916_v31 }
 0x88b   :  { %1222 = vadd.xlane.f32.xlu0 %v1220_v32 }
 0x88c   :  { %v1228_v33 = vsel %vm389_vm12, 0.0, %v1226_v28 }
 0x88d   :  { %1230 = vadd.xlane.f32.xlu2 %v1228_v33 }
 0x88f   :  { %v1217_v34 = vpop.f32.mrf.mxu1 }
 0x890   :  { %v4925_v35 = vadd.f32 %v3723_v29, %v1217_v34 }
 0x892   :  { %v1221_v36 = vsel %vm389_vm12, %v4925_v35, 0.0  ;;  %v1227_v37 = vmul.f32 %v4925_v35, %v4925_v35 }
 0x893   :  { %1224 = vadd.xlane.f32.xlu1 %v1221_v36 }
 0x894   :  { %v1229_v23 = vsel %vm389_vm12, 0.0, %v1227_v37 }
 0x895   :  { %1232 = vadd.xlane.f32.xlu0 %v1229_v23 }
 0x8fe   :  { %v1223_v39 = vpop.xlane.xlu0 %1222 }
 0x8ff   :  { %v1236_v43 = vmul.f32 0.5, %v1223_v39 }
 0x900   :  { %v1231_v44 = vpop.xlane.xlu2 %1230 }
 0x901   :  { %3803 = vtanh.f32 %v1236_v43  ;;  %v1234_v46 = vmax.f32 %v1231_v44, 1e-08 }
 0x903   :  { %3805 = vrcp.f32 %v1234_v46  ;;  %v1261_v62 = vand.u32 2147483647, %v1234_v46  ;;  %v1263_v1 = vand.u32 2147483648, %v1234_v46  ;;  %vm1257_vm4 = vweird.f32 %v1234_v46 }
 0x905   :  { %vm1262_vm6 = vcmp.eq.f32.partialorder %v1261_v62, 8.507059e+37  ;;  %v1264_v57 = vor.u32 1.1754944e-38, %v1263_v1  ;;  %v3726_v62 = vld [vmem:[%s5437_s25] ss:$0 sm:$0xff] }
 0x906   :  { %v1225_v48 = vpop.xlane.xlu1 %1224 }
 0x907   :  { %v3804_v49 = vpop.eup %3803  ;;  %v1237_v50 = vmul.f32 0.5, %v1225_v48 }
 0x908   :  { %v1240_v51 = vadd.f32 1.0, %v3804_v49  ;;  %v1233_v53 = vpop.xlane.xlu0 %1232 }
 0x909   :  { %v3806_v56 = vpop.eup %3805  ;;  %3807 = vtanh.f32 %v1237_v50  ;;  %v1235_v19 = vmax.f32 %v1233_v53, 1e-08 }
 0x90a   :  { %v1242_v41 = vmul.f32 0.5, %v1240_v51  ;;  %v1253_v58 = vmul.f32 %v3806_v56, %v1234_v46  ;;  %vm1258_vm3 = vweird.f32 %v3806_v56 }
 0x90b   :  { %3809 = vrcp.f32 %v1235_v19  ;;  %vm1259_vm5 = vmor %vm1257_vm4, %vm1258_vm3  ;;  %v1276_v2 = vand.u32 2147483647, %v1235_v19  ;;  %v1278_v20 = vand.u32 2147483648, %v1235_v19  ;;  %vm1272_vm8 = vweird.f32 %v1235_v19 }
 0x90c   :  { %v1244_v59 = vmul.f32 10.0, %v1242_v41  ;;  %v1254_v60 = vsub.f32 1.0, %v1253_v58 }
 0x90d   :  { %v1279_v25 = vor.u32 1.1754944e-38, %v1278_v20  ;;  %vm1277_vm11 = vcmp.eq.f32.partialorder %v1276_v2, 8.507059e+37 }
 0x90e   :  { %v4934_v3 = vadd.f32 1.1, %v1244_v59  ;;  %v1255_v4 = vmul.f32 %v3806_v56, %v1254_v60 }
 0x90f   :  { %v3808_v5 = vpop.eup %3807 }
 0x910   :  { %v1248_v6 = vmul.f32 %v4934_v3, %v4934_v3  ;;  %v1256_v7 = vadd.f32 %v3806_v56, %v1255_v4  ;;  %v1241_v8 = vadd.f32 1.0, %v3808_v5 }
 0x911   :  { %v3810_v54 = vpop.eup %3809 }
 0x912   :  { %v3306_v0 = vadd.f32 -1.0, %v1248_v6  ;;  %v1260_v10 = vsel %vm1259_vm5, %v3806_v56, %v1256_v7  ;;  %v1243_v12 = vmul.f32 0.5, %v1241_v8  ;;  %v1268_v13 = vmul.f32 %v3810_v54, %v1235_v19  ;;  %v3725_v7 = vld [vmem:[%s5438_s6] ss:$0 sm:$0xff]  ;;  %v1625_v8 = vpop.f32.mrf.mxu2 }
 0x913   :  { %v1265_v14 = vsel %vm1262_vm6, %v1264_v57, %v1260_v10  ;;  %vm1273_vm7 = vweird.f32 %v3810_v54 }
 0x914   :  { %v1266_v15 = vmul.f32 %v3306_v0, %v1265_v14  ;;  %v1245_v16 = vmul.f32 10.0, %v1243_v12  ;;  %v1269_v17 = vsub.f32 1.0, %v1268_v13  ;;  %vm1274_vm10 = vmor %vm1272_vm8, %vm1273_vm7  ;;  %v3724_v12 = vld [vmem:[%s5439_s11] ss:$0 sm:$0xff] }
 0x916   :  { %v1247_v21 = vadd.f32 1.1, %v1245_v16  ;;  %v1270_v11 = vmul.f32 %v3810_v54, %v1269_v17  ;;  %3811 = vrsqrt.f32 %v1266_v15  ;;  %vm1289_vm13 = vcmp.eq.f32.partialorder %v1266_v15, inf }
 0x917   :  { %v1292_v46 = vand.u32 2147483648, %v1266_v15  ;;  %vm1291_vm14 = vcmp.eq.f32.partialorder %v1266_v15, 0.0  ;;  %v4973_v16 = vadd.f32 %v3724_v12, %v1625_v8 }
 0x918   :  { %v1249_v22 = vmul.f32 %v1247_v21, %v1247_v21  ;;  %v1271_v24 = vadd.f32 %v3810_v54, %v1270_v11 }
 0x91a   :  { %v3307_v26 = vadd.f32 -1.0, %v1249_v22  ;;  %v1275_v29 = vsel %vm1274_vm10, %v3810_v54, %v1271_v24  ;;  %v1627_v18 = vpop.f32.mrf.mxu2 }
 0x91b   :  { %v1280_v30 = vsel %vm1277_vm11, %v1279_v25, %v1275_v29  ;;  %v4980_v20 = vadd.f32 %v3724_v12, %v1627_v18 }
 0x91c   :  { %v3812_v32 = vpop.eup %3811  ;;  %v1281_v28 = vmul.f32 %v3307_v26, %v1280_v30  ;;  %v1636_v30 = vmul.f32 %v4973_v16, %v4973_v16 }
 0x91d   :  { %v1283_v33 = vmul.f32 %v3812_v32, %v1266_v15  ;;  %v1637_v24 = vmul.f32 %v4980_v20, %v4980_v20  ;;  %v1631_v29 = vsel %vm389_vm12, %v4980_v20, 0.0 }
 0x91e   :  { %3813 = vrsqrt.f32 %v1281_v28  ;;  %vm1301_vm15 = vcmp.eq.f32.partialorder %v1281_v28, inf  ;;  %v1304_v53 = vand.u32 2147483648, %v1281_v28  ;;  %vm1303_vm0 = vcmp.eq.f32.partialorder %v1281_v28, 0.0 }
 0x91f   :  { %v1284_v34 = vmul.f32 %v3812_v32, %v1283_v33  ;;  %v1639_v26 = vsel %vm389_vm12, 0.0, %v1637_v24 }
 0x921   :  { %v1285_v36 = vmul.f32 0.5, %v1284_v34 }
 0x923   :  { %v1286_v37 = vsub.f32 1.5, %v1285_v36 }
 0x924   :  { %v3814_v23 = vpop.eup %3813 }
 0x925   :  { %v1287_v40 = vmul.f32 %v3812_v32, %v1286_v37  ;;  %v1295_v42 = vmul.f32 %v3814_v23, %v1281_v28  ;;  %v1638_v32 = vsel %vm389_vm12, 0.0, %v1636_v30 }
 0x927   :  { %v1288_v39 = vmul.f32 %v1287_v40, %v1266_v15  ;;  %v1296_v43 = vmul.f32 %v3814_v23, %v1295_v42 }
 0x929   :  { %v1290_v44 = vsel %vm1289_vm13, %v1266_v15, %v1288_v39  ;;  %v1297_v45 = vmul.f32 0.5, %v1296_v43 }
 0x92a   :  { %v1293_v48 = vsel %vm1291_vm14, %v1292_v46, %v1290_v44 }
 0x92b   :  { %v1298_v47 = vsub.f32 1.5, %v1297_v45  ;;  %v1306_v51 = vmul.f32 %v1293_v48, %v4916_v31  ;;  %v1780_v31 = vpop.f32.mrf.mxu1 }
 0x92c   :  { %v4966_v13 = vadd.f32 %v3725_v7, %v1780_v31 }
 0x92d   :  { %v1299_v49 = vmul.f32 %v3814_v23, %v1298_v47  ;;  %v1308_v41 = vsel %vm389_vm12, %v4934_v3, %v1306_v51 }
 0x92e   :  { %v1310_v59 = vmax.f32 %v1308_v41, 0.0  ;;  %v1791_v17 = vmul.f32 %v4966_v13, %v4966_v13  ;;  %v1785_v2 = vsel %vm389_vm12, %v4966_v13, 0.0 }
 0x92f   :  { %v1300_v50 = vmul.f32 %v1299_v49, %v1281_v28 }
 0x930   :  { %v1793_v11 = vsel %vm389_vm12, 0.0, %v1791_v17 }
 0x931   :  { %v1302_v55 = vsel %vm1301_vm15, %v1281_v28, %v1300_v50 }
 0x932   :  { %v1305_v56 = vsel %vm1303_vm0, %v1304_v53, %v1302_v55 }
 0x933   :  { %v1307_v19 = vmul.f32 %v1305_v56, %v4925_v35  ;;  %v1782_v6 = vpop.f32.mrf.mxu1 }
 0x934   :  { %v4956_v54 = vadd.f32 %v3725_v7, %v1782_v6 }
 0x935   :  { %v1309_v58 = vsel %vm389_vm12, %v1247_v21, %v1307_v19  ;;  %v1630_v21 = vsel %vm389_vm12, %v4973_v16, 0.0 }
 0x936   :  { %v1311_v60 = vmax.f32 %v1309_v58, 0.0  ;;  %v1786_v14 = vsel %vm389_vm12, %v4956_v54, 0.0  ;;  %v1792_v22 = vmul.f32 %v4956_v54, %v4956_v54 }
 0x938   :  { %v1312_v61 = vpack.c.bf16 %v1311_v60, %v1310_v59  ;;  %v1794_v25 = vsel %vm389_vm12, 0.0, %v1792_v22 }
 0x93a   :  { %1372 = vmatmul.bf16.vlgmr.msra.gmra.mxu3 %v1312_v61 }
 0x9bd   :  { %v1373_v1 = vpop.f32.mrf.mxu3 }
 0x9be   :  { %v4946_v4 = vadd.f32 %v3726_v62, %v1373_v1 }
 0x9c0   :  { %v1378_v35 = vsel %vm389_vm12, %v4946_v4, 0.0  ;;  %v1384_v3 = vmul.f32 %v4946_v4, %v4946_v4 }
 0x9c1   :  { %1380 = vadd.xlane.f32.xlu1 %v1378_v35 }
 0x9c2   :  { %v1386_v5 = vsel %vm389_vm12, 0.0, %v1384_v3 }
 0x9c3   :  { %1388 = vadd.xlane.f32.xlu0 %v1386_v5 }
 0x9c5   :  { %v1375_v9 = vpop.f32.mrf.mxu3 }
 0x9c6   :  { %v4958_v57 = vadd.f32 %v3726_v62, %v1375_v9 }
 0x9c8   :  { %v1379_v0 = vsel %vm389_vm12, %v4958_v57, 0.0  ;;  %v1385_v10 = vmul.f32 %v4958_v57, %v4958_v57 }
 0x9c9   :  { %1382 = vadd.xlane.f32.xlu2 %v1379_v0 }
 0x9ca   :  { %v1387_v15 = vsel %vm389_vm12, 0.0, %v1385_v10 }
 0x9cb   :  { %1789 = vadd.xlane.f32.xlu0 %v1786_v14  ;;  %1390 = vadd.xlane.f32.xlu1 %v1387_v15 }
 0x9d1   :  { %1787 = vadd.xlane.f32.xlu2 %v1785_v2 }
 0x9d3   :  { %1632 = vadd.xlane.f32.xlu0 %v1630_v21  ;;  %1795 = vadd.xlane.f32.xlu1 %v1793_v11 }
 0x9d9   :  { %1797 = vadd.xlane.f32.xlu2 %v1794_v25 }
 0x9db   :  { %1642 = vadd.xlane.f32.xlu0 %v1639_v26  ;;  %1634 = vadd.xlane.f32.xlu1 %v1631_v29 }
 0x9e1   :  { %1640 = vadd.xlane.f32.xlu2 %v1638_v32 }
 0xa34   :  { %v1381_v28 = vpop.xlane.xlu1 %1380 }
 0xa35   :  { %v1394_v33 = vmul.f32 0.5, %v1381_v28 }
 0xa36   :  { %v1389_v34 = vpop.xlane.xlu0 %1388 }
 0xa37   :  { %3815 = vtanh.f32 %v1394_v33  ;;  %v1392_v36 = vmax.f32 %v1389_v34, 1e-08 }
 0xa39   :  { %3817 = vrcp.f32 %v1392_v36  ;;  %v1419_v51 = vand.u32 2147483647, %v1392_v36  ;;  %v1421_v53 = vand.u32 2147483648, %v1392_v36  ;;  %vm1415_vm2 = vweird.f32 %v1392_v36 }
 0xa3b   :  { %vm1420_vm3 = vcmp.eq.f32.partialorder %v1419_v51, 8.507059e+37  ;;  %v1422_v35 = vor.u32 1.1754944e-38, %v1421_v53 }
 0xa3c   :  { %v1383_v37 = vpop.xlane.xlu2 %1382 }
 0xa3d   :  { %v3816_v23 = vpop.eup %3815  ;;  %v1395_v40 = vmul.f32 0.5, %v1383_v37 }
 0xa3e   :  { %v1398_v42 = vadd.f32 1.0, %v3816_v23  ;;  %v1790_v39 = vpop.xlane.xlu0 %1789  ;;  %v1391_v43 = vpop.xlane.xlu1 %1390 }
 0xa3f   :  { %v3818_v44 = vpop.eup %3817  ;;  %3819 = vtanh.f32 %v1395_v40  ;;  %v1802_v45 = vmul.f32 0.5, %v1790_v39  ;;  %v1393_v46 = vmax.f32 %v1391_v43, 1e-08 }
 0xa40   :  { %v1400_v47 = vmul.f32 0.5, %v1398_v42  ;;  %v1411_v48 = vmul.f32 %v3818_v44, %v1392_v36  ;;  %vm1416_vm1 = vweird.f32 %v3818_v44 }
 0xa41   :  { %3821 = vtanh.f32 %v1802_v45  ;;  %vm1417_vm4 = vmor %vm1415_vm2, %vm1416_vm1  ;;  %v1434_v24 = vand.u32 2147483647, %v1393_v46  ;;  %v1436_v25 = vand.u32 2147483648, %v1393_v46  ;;  %vm1430_vm6 = vweird.f32 %v1393_v46 }
 0xa42   :  { %v1402_v49 = vmul.f32 10.0, %v1400_v47  ;;  %v1412_v50 = vsub.f32 1.0, %v1411_v48  ;;  %3823 = vrcp.f32 %v1393_v46 }
 0xa43   :  { %vm5023_vm8 = vcmp.eq.f32.partialorder %v1434_v24, 8.507059e+37  ;;  %v1437_v42 = vor.u32 1.1754944e-38, %v1436_v25 }
 0xa44   :  { %v5002_v55 = vadd.f32 1.1, %v1402_v49  ;;  %v1413_v56 = vmul.f32 %v3818_v44, %v1412_v50  ;;  %v1788_v19 = vpop.xlane.xlu2 %1787 }
 0xa45   :  { %v3820_v41 = vpop.eup %3819  ;;  %v1801_v58 = vmul.f32 0.5, %v1788_v19 }
 0xa46   :  { %v1406_v59 = vmul.f32 %v5002_v55, %v5002_v55  ;;  %v1414_v60 = vadd.f32 %v3818_v44, %v1413_v56  ;;  %v1399_v61 = vadd.f32 1.0, %v3820_v41  ;;  %v1633_v31 = vpop.xlane.xlu0 %1632  ;;  %v1796_v62 = vpop.xlane.xlu1 %1795 }
 0xa47   :  { %v3822_v1 = vpop.eup %3821  ;;  %3825 = vtanh.f32 %v1801_v58  ;;  %v1646_v3 = vmul.f32 0.5, %v1633_v31  ;;  %v5006_v5 = vmax.f32 %v1796_v62, 1e-08 }
 0xa48   :  { %v3824_v6 = vpop.eup %3823  ;;  %v3340_v7 = vadd.f32 -1.0, %v1406_v59  ;;  %v1418_v8 = vsel %vm1417_vm4, %v3818_v44, %v1414_v60  ;;  %v1401_v9 = vmul.f32 0.5, %v1399_v61  ;;  %v1806_v0 = vadd.f32 1.0, %v3822_v1 }
 0xa49   :  { %v1423_v10 = vsel %vm1420_vm3, %v1422_v35, %v1418_v8  ;;  %v1426_v12 = vmul.f32 %v3824_v6, %v1393_v46  ;;  %3827 = vtanh.f32 %v1646_v3  ;;  %vm1431_vm5 = vweird.f32 %v3824_v6 }
 0xa4a   :  { %v5008_v14 = vmul.f32 %v3340_v7, %v1423_v10  ;;  %v1403_v15 = vmul.f32 10.0, %v1401_v9  ;;  %3829 = vrcp.f32 %v5006_v5  ;;  %v1808_v17 = vmul.f32 0.5, %v1806_v0  ;;  %vm5019_vm7 = vmor %vm1430_vm6, %vm1431_vm5 }
 0xa4b   :  { %v1427_v18 = vsub.f32 1.0, %v1426_v12  ;;  %vm1822_vm10 = vweird.f32 %v5006_v5  ;;  %v1826_v47 = vand.u32 2147483647, %v5006_v5  ;;  %v1828_v48 = vand.u32 2147483648, %v5006_v5 }
 0xa4c   :  { %v5011_v2 = vadd.f32 1.1, %v1403_v15  ;;  %v1798_v21 = vpop.xlane.xlu2 %1797  ;;  %3831 = vrsqrt.f32 %v5008_v14  ;;  %v1810_v32 = vmul.f32 10.0, %v1808_v17  ;;  %vm1447_vm3 = vcmp.eq.f32.partialorder %v5008_v14, inf }
 0xa4d   :  { %v3826_v11 = vpop.eup %3825  ;;  %v1428_v22 = vmul.f32 %v3824_v6, %v1427_v18  ;;  %v5014_v26 = vmax.f32 %v1798_v21, 1e-08  ;;  %vm5048_vm13 = vcmp.eq.f32.partialorder %v1826_v47, 8.507059e+37  ;;  %v1829_v35 = vor.u32 1.1754944e-38, %v1828_v48 }
 0xa4e   :  { %v1805_v29 = vadd.f32 1.0, %v3826_v11  ;;  %v1407_v34 = vmul.f32 %v5011_v2, %v5011_v2  ;;  %v1643_v37 = vpop.xlane.xlu0 %1642  ;;  %v1635_v43 = vpop.xlane.xlu1 %1634  ;;  %v5035_v49 = vadd.f32 1.1, %v1810_v32 }
 0xa4f   :  { %v3828_v30 = vpop.eup %3827  ;;  %v1429_v28 = vadd.f32 %v3824_v6, %v1428_v22  ;;  %3833 = vrcp.f32 %v5014_v26  ;;  %v5037_v53 = vmax.f32 %v1643_v37, 1e-08  ;;  %v1647_v41 = vmul.f32 0.5, %v1635_v43 }
 0xa50   :  { %v3830_v33 = vpop.eup %3829  ;;  %v1807_v36 = vmul.f32 0.5, %v1805_v29  ;;  %v1650_v50 = vadd.f32 1.0, %v3828_v30  ;;  %v3341_v56 = vadd.f32 -1.0, %v1407_v34  ;;  %v1841_v8 = vand.u32 2147483647, %v5014_v26 }
 0xa51   :  { %v1818_v39 = vmul.f32 %v3830_v33, %v5006_v5  ;;  %v1433_v45 = vsel %vm5019_vm7, %v3824_v6, %v1429_v28  ;;  %vm1823_vm11 = vweird.f32 %v3830_v33  ;;  %3835 = vrcp.f32 %v5037_v53 }
 0xa52   :  { %v5029_v44 = vpop.eup %3831  ;;  %v1809_v46 = vmul.f32 10.0, %v1807_v36  ;;  %v1438_v59 = vsel %vm5023_vm8, %v1437_v42, %v1433_v45  ;;  %v1652_v6 = vmul.f32 0.5, %v1650_v50  ;;  %3837 = vtanh.f32 %v1647_v41  ;;  %vm1824_vm14 = vmor %vm1822_vm10, %vm1823_vm11 }
 0xa53   :  { %v1819_v51 = vsub.f32 1.0, %v1818_v39  ;;  %v1441_v31 = vmul.f32 %v5029_v44, %v5008_v14  ;;  %v1814_v9 = vmul.f32 %v5035_v49, %v5035_v49  ;;  %v5056_v0 = vmul.f32 %v3341_v56, %v1438_v59 }
 0xa54   :  { %v5039_v19 = vadd.f32 1.1, %v1809_v46  ;;  %v1641_v61 = vpop.xlane.xlu2 %1640  ;;  %v1843_v18 = vand.u32 2147483648, %v5014_v26  ;;  %v1654_v5 = vmul.f32 10.0, %v1652_v6  ;;  %vm1837_vm0 = vweird.f32 %v5014_v26 }
 0xa55   :  { %v3834_v58 = vpop.eup %3833  ;;  %v1820_v60 = vmul.f32 %v3830_v33, %v1819_v51  ;;  %v5061_v12 = vmax.f32 %v1641_v61, 1e-08  ;;  %v1442_v21 = vmul.f32 %v5029_v44, %v1441_v31  ;;  %vm1842_vm1 = vcmp.eq.f32.partialorder %v1841_v8, 8.507059e+37 }
 0xa56   :  { %v1813_v62 = vmul.f32 %v5039_v19, %v5039_v19  ;;  %v1833_v3 = vmul.f32 %v3834_v58, %v5014_v26  ;;  %vm1838_vm15 = vweird.f32 %v3834_v58  ;;  %v3410_v28 = vadd.f32 -1.0, %v1814_v9 }
 0xa57   :  { %v1821_v7 = vadd.f32 %v3830_v33, %v1820_v60  ;;  %3839 = vrcp.f32 %v5061_v12  ;;  %v5068_v24 = vpop.eup %3835  ;;  %v1443_v30 = vmul.f32 0.5, %v1442_v21  ;;  %vm1839_vm2 = vmor %vm1837_vm0, %vm1838_vm15  ;;  %v1844_v34 = vor.u32 1.1754944e-38, %v1843_v18 }
 0xa58   :  { %v1834_v10 = vsub.f32 1.0, %v1833_v3  ;;  %v3409_v15 = vadd.f32 -1.0, %v1813_v62  ;;  %v1678_v29 = vmul.f32 %v5068_v24, %v5037_v53  ;;  %v3838_v32 = vpop.eup %3837  ;;  %3841 = vrsqrt.f32 %v5056_v0 }
 0xa59   :  { %v1825_v17 = vsel %vm1824_vm14, %v3830_v33, %v1821_v7  ;;  %v1651_v23 = vadd.f32 1.0, %v3838_v32  ;;  %v1444_v40 = vsub.f32 1.5, %v1443_v30  ;;  %v5076_v42 = vadd.f32 1.1, %v1654_v5 }
 0xa5a   :  { %v1830_v11 = vsel %vm5048_vm13, %v1829_v35, %v1825_v17  ;;  %v1835_v22 = vmul.f32 %v3834_v58, %v1834_v10  ;;  %v1679_v37 = vsub.f32 1.0, %v1678_v29  ;;  %v1688_v47 = vand.u32 2147483648, %v5037_v53 }
 0xa5b   :  { %v5073_v33 = vmul.f32 %v3409_v15, %v1830_v11  ;;  %v1653_v46 = vmul.f32 0.5, %v1651_v23  ;;  %v1445_v50 = vmul.f32 %v5029_v44, %v1444_v40  ;;  %vm1683_vm4 = vweird.f32 %v5068_v24 }
 0xa5c   :  { %v1836_v25 = vadd.f32 %v3834_v58, %v1835_v22  ;;  %v1680_v45 = vmul.f32 %v5068_v24, %v1679_v37  ;;  %v1686_v56 = vand.u32 2147483647, %v5037_v53  ;;  %v1658_v59 = vmul.f32 %v5076_v42, %v5076_v42 }
 0xa5d   :  { %v3840_v39 = vpop.eup %3839  ;;  %3843 = vrsqrt.f32 %v5073_v33  ;;  %v1655_v41 = vmul.f32 10.0, %v1653_v46  ;;  %v1671_v61 = vand.u32 2147483647, %v5061_v12  ;;  %vm1682_vm5 = vweird.f32 %v5037_v53 }
 0xa5e   :  { %v1840_v36 = vsel %vm1839_vm2, %v3834_v58, %v1836_v25  ;;  %v1663_v48 = vmul.f32 %v3840_v39, %v5061_v12  ;;  %v1681_v51 = vadd.f32 %v5068_v24, %v1680_v45  ;;  %v3842_v58 = vpop.eup %3841  ;;  %v1673_v31 = vand.u32 2147483648, %v5061_v12  ;;  %vm5098_vm6 = vmor %vm1682_vm5, %vm1683_vm4 }
 0xa5f   :  { %v1845_v26 = vsel %vm1842_vm1, %v1844_v34, %v1840_v36  ;;  %v5094_v44 = vadd.f32 1.1, %v1655_v41  ;;  %v1453_v62 = vmul.f32 %v3842_v58, %v5056_v0  ;;  %v1689_v35 = vor.u32 1.1754944e-38, %v1688_v47 }
 0xa60   :  { %v5078_v43 = vmul.f32 %v3410_v28, %v1845_v26  ;;  %v1664_v60 = vsub.f32 1.0, %v1663_v48  ;;  %vm1668_vm7 = vweird.f32 %v3840_v39  ;;  %v1446_v6 = vmul.f32 %v1445_v50, %v5008_v14 }
 0xa61   :  { %v1685_v7 = vsel %vm5098_vm6, %v5068_v24, %v1681_v51  ;;  %vm1687_vm8 = vcmp.eq.f32.partialorder %v1686_v56, 8.507059e+37  ;;  %v1659_v53 = vmul.f32 %v5094_v44, %v5094_v44  ;;  %v1454_v8 = vmul.f32 %v3842_v58, %v1453_v62 }
 0xa62   :  { %3845 = vrsqrt.f32 %v5078_v43  ;;  %v1665_v3 = vmul.f32 %v3840_v39, %v1664_v60  ;;  %v3375_v10 = vadd.f32 -1.0, %v1658_v59  ;;  %vm1667_vm10 = vweird.f32 %v5061_v12 }
 0xa63   :  { %v3844_v9 = vpop.eup %3843  ;;  %vm1672_vm11 = vcmp.eq.f32.partialorder %v1671_v61, 8.507059e+37  ;;  %v3376_v17 = vadd.f32 -1.0, %v1659_v53  ;;  %vm1669_vm13 = vmor %vm1667_vm10, %vm1668_vm7  ;;  %v1674_v18 = vor.u32 1.1754944e-38, %v1673_v31  ;;  %v1455_v21 = vmul.f32 0.5, %v1454_v8 }
 0xa64   :  { %v1666_v15 = vadd.f32 %v3840_v39, %v1665_v3  ;;  %v1848_v11 = vmul.f32 %v3844_v9, %v5073_v33  ;;  %v1690_v5 = vsel %vm1687_vm8, %v1689_v35, %v1685_v7  ;;  %v1448_v25 = vsel %vm1447_vm3, %v5008_v14, %v1446_v6 }
 0xa65   :  { %v1450_v29 = vand.u32 2147483648, %v5008_v14  ;;  %v5114_v30 = vmul.f32 %v3376_v17, %v1690_v5  ;;  %v1456_v12 = vsub.f32 1.5, %v1455_v21  ;;  %vm1449_vm14 = vcmp.eq.f32.partialorder %v5008_v14, 0.0 }
 0xa66   :  { %v1670_v24 = vsel %vm1669_vm13, %v3840_v39, %v1666_v15  ;;  %v1849_v28 = vmul.f32 %v3844_v9, %v1848_v11  ;;  %vm1459_vm15 = vcmp.eq.f32.partialorder %v5056_v0, inf  ;;  %v1462_v47 = vand.u32 2147483648, %v5056_v0 }
 0xa67   :  { %v1675_v32 = vsel %vm1672_vm11, %v1674_v18, %v1670_v24  ;;  %3847 = vrsqrt.f32 %v5114_v30  ;;  %v1451_v37 = vsel %vm1449_vm14, %v1450_v29, %v1448_v25  ;;  %v1457_v23 = vmul.f32 %v3842_v58, %v1456_v12 }
 0xa68   :  { %v3846_v22 = vpop.eup %3845  ;;  %v5116_v34 = vmul.f32 %v3375_v10, %v1675_v32  ;;  %v1850_v40 = vmul.f32 0.5, %v1849_v28  ;;  %v1464_v14 = vmul.f32 %v1451_v37, %v4946_v4  ;;  %vm1461_vm0 = vcmp.eq.f32.partialorder %v5056_v0, 0.0 }
 0xa69   :  { %v1860_v36 = vmul.f32 %v3846_v22, %v5078_v43  ;;  %v1458_v39 = vmul.f32 %v1457_v23, %v5056_v0  ;;  %vm1854_vm1 = vcmp.eq.f32.partialorder %v5073_v33, inf  ;;  %vm1856_vm2 = vcmp.eq.f32.partialorder %v5073_v33, 0.0 }
 0xa6a   :  { %3849 = vrsqrt.f32 %v5116_v34  ;;  %v1851_v45 = vsub.f32 1.5, %v1850_v40  ;;  %v1857_v31 = vand.u32 2147483648, %v5073_v33  ;;  %vm1866_vm3 = vcmp.eq.f32.partialorder %v5078_v43, inf }
 0xa6b   :  { %v1861_v26 = vmul.f32 %v3846_v22, %v1860_v36  ;;  %v1460_v48 = vsel %vm1459_vm15, %v5056_v0, %v1458_v39  ;;  %v1466_v0 = vsel %vm389_vm12, %v5002_v55, %v1464_v14  ;;  %v1869_v53 = vand.u32 2147483648, %v5078_v43 }
 0xa6c   :  { %v1852_v50 = vmul.f32 %v3844_v9, %v1851_v45  ;;  %v1463_v41 = vsel %vm1461_vm0, %v1462_v47, %v1460_v48  ;;  %vm1868_vm4 = vcmp.eq.f32.partialorder %v5078_v43, 0.0  ;;  %vm1711_vm5 = vcmp.eq.f32.partialorder %v5114_v30, inf }
 0xa6d   :  { %v1862_v46 = vmul.f32 0.5, %v1861_v26  ;;  %v3848_v56 = vpop.eup %3847  ;;  %v1465_v60 = vmul.f32 %v1463_v41, %v4958_v57  ;;  %vm1713_vm6 = vcmp.eq.f32.partialorder %v5114_v30, 0.0  ;;  %vm1699_vm7 = vcmp.eq.f32.partialorder %v5116_v34, inf }
 0xa6e   :  { %v1705_v59 = vmul.f32 %v3848_v56, %v5114_v30  ;;  %v1853_v61 = vmul.f32 %v1852_v50, %v5073_v33  ;;  %vm1701_vm8 = vcmp.eq.f32.partialorder %v5116_v34, 0.0 }
 0xa6f   :  { %v1863_v51 = vsub.f32 1.5, %v1862_v46  ;;  %v1467_v35 = vsel %vm389_vm12, %v5011_v2, %v1465_v60 }
 0xa70   :  { %v3850_v58 = vpop.eup %3849  ;;  %v1706_v1 = vmul.f32 %v3848_v56, %v1705_v59  ;;  %v1855_v57 = vsel %vm1854_vm1, %v5073_v33, %v1853_v61  ;;  %v1468_v6 = vpack.c.bf16 %v1467_v35, %v1466_v0 }
 0xa71   :  { %v1864_v4 = vmul.f32 %v3846_v22, %v1863_v51  ;;  %v1693_v62 = vmul.f32 %v3850_v58, %v5116_v34  ;;  %v1858_v7 = vsel %vm1856_vm2, %v1857_v31, %v1855_v57 }
 0xa72   :  { %v1707_v8 = vmul.f32 0.5, %v1706_v1  ;;  %v1871_v10 = vmul.f32 %v1858_v7, %v4966_v13  ;;  %1476 = vmatpush.bf16.msrb.mxu0 %v1468_v6 }
 0xa73   :  { %v1865_v3 = vmul.f32 %v1864_v4, %v5078_v43  ;;  %v1694_v55 = vmul.f32 %v3850_v58, %v1693_v62 }
 0xa74   :  { %v1708_v2 = vsub.f32 1.5, %v1707_v8  ;;  %v1873_v11 = vsel %vm389_vm12, %v5039_v19, %v1871_v10 }
 0xa75   :  { %v1867_v9 = vsel %vm1866_vm3, %v5078_v43, %v1865_v3  ;;  %v1695_v17 = vmul.f32 0.5, %v1694_v55  ;;  %3342 = vmatmul.msk.bf16.vlgmr.msrb.gmra.mxu0 %vm566_vm9, %v4802_v38 }
 0xa76   :  { %v1870_v15 = vsel %vm1868_vm4, %v1869_v53, %v1867_v9  ;;  %v1709_v21 = vmul.f32 %v3848_v56, %v1708_v2 }
 0xa77   :  { %v1872_v33 = vmul.f32 %v1870_v15, %v4956_v54  ;;  %v1696_v18 = vsub.f32 1.5, %v1695_v17  ;;  %v1714_v54 = vand.u32 2147483648, %v5114_v30 }
 0xa78   :  { %v1710_v5 = vmul.f32 %v1709_v21, %v5114_v30 }
 0xa79   :  { %v1874_v43 = vsel %vm389_vm12, %v5035_v49, %v1872_v33  ;;  %v1697_v22 = vmul.f32 %v3850_v58, %v1696_v18  ;;  %v1702_v49 = vand.u32 2147483648, %v5116_v34 }
 0xa7a   :  { %v1880_v13 = vpack.c.bf16 %v1874_v43, %v1873_v11  ;;  %v1712_v25 = vsel %vm1711_vm5, %v5114_v30, %v1710_v5 }
 0xa7b   :  { %v1698_v24 = vmul.f32 %v1697_v22, %v5116_v34  ;;  %v1715_v19 = vsel %vm1713_vm6, %v1714_v54, %v1712_v25 }
 0xa7c   :  { %1888 = vmatpush.bf16.xpose.msrb.mxu3 %v1880_v13  ;;  %v1717_v32 = vmul.f32 %v1715_v19, %v4980_v20 }
 0xa7d   :  { %v1700_v29 = vsel %vm1699_vm7, %v5116_v34, %v1698_v24  ;;  %vm1932_vm7 = vcmp.lt.s32.totalorder %v4764_v63, 8 }
 0xa7e   :  { %v1703_v12 = vsel %vm1701_vm8, %v1702_v49, %v1700_v29  ;;  %v1719_v30 = vsel %vm389_vm12, %v5094_v44, %v1717_v32 }
 0xa7f   :  { %v1716_v28 = vmul.f32 %v1703_v12, %v4973_v16  ;;  %v1876_v36 = vsub.f32 0.0, %v1719_v30 }
 0xa81   :  { %v1878_v34 = vsel %vm389_vm12, %v1876_v36, %v1717_v32 }
 0xa84   :  { %2031 = vmatpush.bf16.msra.mxu3 %v4910_v27  ;;  %v1718_v27 = vsel %vm389_vm12, %v5076_v42, %v1716_v28 }
 0xa85   :  { %v1875_v37 = vsub.f32 0.0, %v1718_v27 }
 0xa87   :  { %v1877_v23 = vsel %vm389_vm12, %v1875_v37, %v1716_v28 }
 0xa88   :  { %v1879_v20 = vpack.c.bf16 %v1878_v34, %v1877_v23 }
 0xa8a   :  { %1889 = vmatmul.bf16.vlgmr.msrb.gmra.mxu3 %v1879_v20 }
 0xaf2   :  { %v5180_v40 = vpop.f32.mrf.mxu0 }
 0xaf3   :  { %v1483_v16 = vsel %vm389_vm12, %v5180_v40, 0.0  ;;  %v1489_v44 = vmul.f32 %v5180_v40, %v5180_v40 }
 0xaf4   :  { %1485 = vadd.xlane.f32.xlu1 %v1483_v16 }
 0xaf5   :  { %v1491_v42 = vsel %vm389_vm12, 0.0, %v1489_v44 }
 0xaf6   :  { %1493 = vadd.xlane.f32.xlu0 %v1491_v42 }
 0xafa   :  { %v5189_v26 = vpop.f32.mrf.mxu0 }
 0xafb   :  { %v1484_v39 = vsel %vm389_vm12, %v5189_v26, 0.0  ;;  %v1490_v45 = vmul.f32 %v5189_v26, %v5189_v26 }
 0xafc   :  { %1487 = vadd.xlane.f32.xlu2 %v1484_v39 }
 0xafd   :  { %v1492_v46 = vsel %vm389_vm12, 0.0, %v1490_v45 }
 0xafe   :  { %1495 = vadd.xlane.f32.xlu1 %v1492_v46 }
 0xb0d   :  { %v1890_v42 = vpop.f32.mrf.mxu3 }
 0xb0e   :  { %v1895_v46 = vmul.f32 2.0, %v1890_v42 }
 0xb15   :  { %v1892_v39 = vpop.f32.mrf.mxu3 }
 0xb16   :  { %v1896_v45 = vmul.f32 2.0, %v1892_v39 }
 0xb67   :  { %v1486_v47 = vpop.xlane.xlu1 %1485 }
 0xb68   :  { %v1497_v14 = vmul.f32 %v1486_v47, %v1486_v47  ;;  %v1898_v47 = vadd.f32 2.0, %v1896_v45 }
 0xb69   :  { %v1494_v48 = vpop.xlane.xlu0 %1493 }
 0xb6a   :  { %v1499_v50 = vsub.f32 %v1494_v48, %v1497_v14  ;;  %v1897_v14 = vadd.f32 2.0, %v1895_v46  ;;  %v1900_v48 = vmul.f32 0.33333334, %v1898_v47 }
 0xb6c   :  { %v1501_v51 = vand.u32 2147483647, %v1499_v50  ;;  %v1899_v50 = vmul.f32 0.33333334, %v1897_v14 }
 0xb6e   :  { %v1503_v56 = vmax.f32 %v1501_v51, 1e-08  ;;  %v1902_v51 = vadd.f32 20.0, %v1900_v48 }
 0xb6f   :  { %v1488_v41 = vpop.xlane.xlu2 %1487 }
 0xb70   :  { %3851 = vrsqrt.f32 %v1503_v56  ;;  %v1498_v58 = vmul.f32 %v1488_v41, %v1488_v41  ;;  %vm1512_vm10 = vcmp.eq.f32.partialorder %v1503_v56, inf  ;;  %v1515_v55 = vand.u32 2147483648, %v1503_v56 }
 0xb71   :  { %v1496_v59 = vpop.xlane.xlu1 %1495  ;;  %vm1514_vm11 = vcmp.eq.f32.partialorder %v1503_v56, 0.0  ;;  %v1904_v41 = vmul.f32 0.5, %v1902_v51 }
 0xb72   :  { %v1500_v60 = vsub.f32 %v1496_v59, %v1498_v58 }
 0xb74   :  { %v1502_v61 = vand.u32 2147483647, %v1500_v60 }
 0xb76   :  { %v3852_v4 = vpop.eup %3851  ;;  %v1504_v0 = vmax.f32 %v1502_v61, 1e-08 }
 0xb77   :  { %v1506_v31 = vmul.f32 %v3852_v4, %v1503_v56 }
 0xb78   :  { %3853 = vrsqrt.f32 %v1504_v0  ;;  %vm1524_vm13 = vcmp.eq.f32.partialorder %v1504_v0, inf  ;;  %v1527_v33 = vand.u32 2147483648, %v1504_v0  ;;  %vm1526_vm14 = vcmp.eq.f32.partialorder %v1504_v0, 0.0 }
 0xb79   :  { %v1507_v62 = vmul.f32 %v3852_v4, %v1506_v31 }
 0xb7b   :  { %v1508_v1 = vmul.f32 0.5, %v1507_v62 }
 0xb7d   :  { %v1509_v35 = vsub.f32 1.5, %v1508_v1  ;;  %v3921_v1 = vld [vmem:[#allocation5 + $0x8] sm:$0xff] }
 0xb7e   :  { %v3854_v57 = vpop.eup %3853 }
 0xb7f   :  { %v1518_v3 = vmul.f32 %v3854_v57, %v1504_v0  ;;  %v1510_v6 = vmul.f32 %v3852_v4, %v1509_v35 }
 0xb81   :  { %v1511_v7 = vmul.f32 %v1510_v6, %v1503_v56  ;;  %v1519_v53 = vmul.f32 %v3854_v57, %v1518_v3  ;;  %v3922_v3 = vld [vmem:[#allocation5] sm:$0xff] }
 0xb83   :  { %v1513_v8 = vsel %vm1512_vm10, %v1503_v56, %v1511_v7  ;;  %v1520_v9 = vmul.f32 0.5, %v1519_v53  ;;  %v1901_v56 = vadd.f32 20.0, %v1899_v50 }
 0xb84   :  { %v1516_v10 = vsel %vm1514_vm11, %v1515_v55, %v1513_v8 }
 0xb85   :  { %v1521_v15 = vsub.f32 1.5, %v1520_v9  ;;  %3855 = vrcp.f32 %v1516_v10  ;;  %v1540_v25 = vand.u32 2147483648, %v1516_v10  ;;  %vm1534_vm0 = vweird.f32 %v1516_v10 }
 0xb86   :  { %v1538_v49 = vand.u32 2147483647, %v1516_v10  ;;  %v1903_v58 = vmul.f32 0.5, %v1901_v56 }
 0xb87   :  { %v1522_v17 = vmul.f32 %v3854_v57, %v1521_v15  ;;  %v1541_v30 = vor.u32 1.1754944e-38, %v1540_v25 }
 0xb88   :  { %vm1539_vm3 = vcmp.eq.f32.partialorder %v1538_v49, 8.507059e+37 }
 0xb89   :  { %v1523_v2 = vmul.f32 %v1522_v17, %v1504_v0 }
 0xb8b   :  { %v3856_v18 = vpop.eup %3855  ;;  %v1525_v21 = vsel %vm1524_vm13, %v1504_v0, %v1523_v2 }
 0xb8c   :  { %v1528_v11 = vsel %vm1526_vm14, %v1527_v33, %v1525_v21  ;;  %v1530_v43 = vmul.f32 %v3856_v18, %v1516_v10  ;;  %vm1535_vm15 = vweird.f32 %v3856_v18 }
 0xb8d   :  { %3857 = vrcp.f32 %v1528_v11  ;;  %vm1536_vm1 = vmor %vm1534_vm0, %vm1535_vm15  ;;  %v1555_v29 = vand.u32 2147483648, %v1528_v11  ;;  %v1553_v28 = vand.u32 2147483647, %v1528_v11  ;;  %vm1549_vm4 = vweird.f32 %v1528_v11 }
 0xb8e   :  { %v1531_v13 = vsub.f32 1.0, %v1530_v43  ;;  %3859 = vtanh.f32 %v1904_v41 }
 0xb8f   :  { %v1556_v37 = vor.u32 1.1754944e-38, %v1555_v29  ;;  %vm1554_vm6 = vcmp.eq.f32.partialorder %v1553_v28, 8.507059e+37  ;;  %3861 = vtanh.f32 %v1903_v58 }
 0xb90   :  { %v1532_v22 = vmul.f32 %v3856_v18, %v1531_v13 }
 0xb92   :  { %v1533_v54 = vadd.f32 %v3856_v18, %v1532_v22 }
 0xb93   :  { %v3858_v5 = vpop.eup %3857 }
 0xb94   :  { %v1545_v24 = vmul.f32 %v3858_v5, %v1528_v11  ;;  %v1537_v32 = vsel %vm1536_vm1, %v3856_v18, %v1533_v54  ;;  %vm1550_vm2 = vweird.f32 %v3858_v5 }
 0xb95   :  { %v1542_v27 = vsel %vm1539_vm3, %v1541_v30, %v1537_v32  ;;  %vm1551_vm5 = vmor %vm1549_vm4, %vm1550_vm2  ;;  %vm2459_vm4 = vcmask 1043456  }
 0xb96   :  { %v1546_v19 = vsub.f32 1.0, %v1545_v24  ;;  %v1559_v20 = vmul.f32 %v1542_v27, %v5180_v40  ;;  %v3860_v40 = vpop.eup %3859 }
 0xb97   :  { %v1908_v59 = vadd.f32 1.0, %v3860_v40 }
 0xb98   :  { %v1547_v12 = vmul.f32 %v3858_v5, %v1546_v19 }
 0xb99   :  { %v1910_v61 = vmul.f32 0.5, %v1908_v59  ;;  %v3634_v59 = vld [vmem:[#allocation16 + $0x30] sm:$0xff] }
 0xb9a   :  { %v1548_v36 = vadd.f32 %v3858_v5, %v1547_v12 }
 0xb9b   :  { %v1912_v35 = vmul.f32 %v3921_v1, %v1910_v61 }
 0xb9c   :  { %v1552_v23 = vsel %vm1551_vm5, %v3858_v5, %v1548_v36 }
 0xb9d   :  { %v1557_v34 = vsel %vm1554_vm6, %v1556_v37, %v1552_v23 }
 0xb9e   :  { %v1560_v16 = vmul.f32 %v1557_v34, %v5189_v26  ;;  %v3862_v26 = vpop.eup %3861 }
 0xb9f   :  { %v1907_v60 = vadd.f32 1.0, %v3862_v26  ;;  %v3635_v26 = vld [vmem:[#allocation16 + $0x38] sm:$0xff] }
 0xba0   :  { %v3716_v44 = vpack.i.bf16 %v1560_v16, %v1559_v20  ;;  %2285 = vmatpush.bf16.msrb.mxu1 %v3635_v26 }
 0xba1   :  { %v1909_v4 = vmul.f32 0.5, %v1907_v60  ;;  %v3633_v60 = vld [vmem:[#allocation16 + $0x28] sm:$0xff] }
 0xba2   :  { %3717 = vrot.lane.b32.xlu2 %v3716_v44, %s4472_s7 }
 0xba3   :  { %v1911_v6 = vmul.f32 %v3922_v3, %v1909_v4  ;;  %v3631_v3 = vld [vmem:[#allocation16 + $0x18] sm:$0xff] }
 0xba4   :  { %2286 = vmatpush.bf16.msrb.mxu1 %v3634_v59 }
 0xba5   :  { %v1913_v7 = vpack.c.bf16 %v1912_v35, %v1911_v6  ;;  %v5221_v35 = vshrl.u32 %v307_v52, 7  ;;  %v3629_v52 = vld [vmem:[#allocation16 + $0x8] sm:$0xff] }
 0xba7   :  { %vm2150_vm2 = vcmp.eq.s32.totalorder %v5221_v35, %v4764_v63 }
 0xba8   :  { %2287 = vmatpush.bf16.msrb.mxu1 %v3633_v60 }
 0xbfc   :  { %v3718_v0 = vpop.permute.xlu2 %3717 }
 0xbfd   :  { %v3720_v31 = vunpack.i.h.bf16 %v3718_v0  ;;  %v3719_v62 = vunpack.i.l.bf16 %v3718_v0 }
 0xbff   :  { %v1914_v57 = vpack.c.bf16 %v3720_v31, %v3719_v62  ;;  %v3632_v62 = vld [vmem:[#allocation16 + $0x20] sm:$0xff] }
 0xc00   :  { %2288 = vmatpush.bf16.msrb.mxu1 %v3632_v62 }
 0xc01   :  { %1925 = vmatpush.bf16.msra.mxu0 %v1914_v57 }
 0xc04   :  { %3411 = vmatmul.msk.bf16.vlgmr.msra.gmra.mxu0 %vm566_vm9, %v1913_v7  ;;  %2289 = vmatpush.bf16.msrb.mxu1 %v3631_v3  ;;  %v3630_v7 = vld [vmem:[#allocation16 + $0x10] sm:$0xff] }
 0xc05   :  { %2104 = vmatpush.bf16.msrb.mxu0 %v4802_v38 }
 0xc08   :  { %2290 = vmatpush.bf16.msrb.mxu1 %v3630_v7  ;;  %v3650_v7 = vld [vmem:[#allocation19 + $0x30] sm:$0xff] }
 0xc0c   :  { %2291 = vmatpush.bf16.msrb.mxu1 %v3629_v52 }
 0xc81   :  { %v1927_v53 = vpop.f32.mrf.mxu0 }
 0xc82   :  { %v1933_v55 = vsel %vm1932_vm7, %v1927_v53, -1e+30 }
 0xc83   :  { %1935 = vmax.xlane.f32.xlu0 %v1933_v55 }
 0xc89   :  { %v1929_v8 = vpop.f32.mrf.mxu0 }
 0xc8a   :  { %v1934_v9 = vsel %vm1932_vm7, %v1929_v8, -1e+30 }
 0xc8b   :  { %1937 = vmax.xlane.f32.xlu1 %v1934_v9 }
 0xcf6   :  { %v1936_v10 = vpop.xlane.xlu0 %1935 }
 0xcf7   :  { %v1939_v15 = vsub.f32 %v1933_v55, %v1936_v10 }
 0xcf9   :  { %v1941_v17 = vmul.f32 10.0, %v1939_v15 }
 0xcfb   :  { %v1943_v2 = vmul.f32 1.442695, %v1941_v17 }
 0xcfd   :  { %3863 = vpow2.f32 %v1943_v2  ;;  %v3628_v2 = vld [vmem:[#allocation16] sm:$0xff] }
 0xcfe   :  { %v1938_v38 = vpop.xlane.xlu1 %1937  ;;  %2292 = vmatpush.bf16.msrb.mxu1 %v3628_v2 }
 0xcff   :  { %v1940_v33 = vsub.f32 %v1934_v9, %v1938_v38 }
 0xd01   :  { %v1942_v18 = vmul.f32 10.0, %v1940_v33 }
 0xd03   :  { %v3864_v21 = vpop.eup %3863  ;;  %v1945_v11 = vmul.f32 1.442695, %v1942_v18 }
 0xd04   :  { %1947 = vadd.xlane.f32.xlu0 %v3864_v21 }
 0xd05   :  { %3865 = vpow2.f32 %v1945_v11 }
 0xd0b   :  { %v3866_v43 = vpop.eup %3865 }
 0xd0c   :  { %1949 = vadd.xlane.f32.xlu1 %v3866_v43 }
 0xd77   :  { %v1948_v13 = vpop.xlane.xlu0 %1947 }
 0xd78   :  { %3867 = vrcp.f32 %v1948_v13  ;;  %v1962_v25 = vand.u32 2147483648, %v1948_v13  ;;  %v1960_v19 = vand.u32 2147483647, %v1948_v13  ;;  %vm1956_vm10 = vweird.f32 %v1948_v13 }
 0xd7a   :  { %v1963_v12 = vor.u32 1.1754944e-38, %v1962_v25  ;;  %vm1961_vm13 = vcmp.eq.f32.partialorder %v1960_v19, 8.507059e+37 }
 0xd7e   :  { %v3868_v22 = vpop.eup %3867 }
 0xd7f   :  { %v1952_v5 = vmul.f32 %v3868_v22, %v1948_v13  ;;  %v1950_v54 = vpop.xlane.xlu1 %1949  ;;  %vm1957_vm8 = vweird.f32 %v3868_v22 }
 0xd80   :  { %3869 = vrcp.f32 %v1950_v54  ;;  %vm1958_vm11 = vmor %vm1956_vm10, %vm1957_vm8  ;;  %v1977_v23 = vand.u32 2147483648, %v1950_v54  ;;  %v1975_v20 = vand.u32 2147483647, %v1950_v54  ;;  %vm1971_vm15 = vweird.f32 %v1950_v54 }
 0xd81   :  { %v1953_v24 = vsub.f32 1.0, %v1952_v5 }
 0xd82   :  { %v1978_v44 = vor.u32 1.1754944e-38, %v1977_v23  ;;  %vm1976_vm1 = vcmp.eq.f32.partialorder %v1975_v20, 8.507059e+37 }
 0xd83   :  { %v1954_v49 = vmul.f32 %v3868_v22, %v1953_v24 }
 0xd85   :  { %v1955_v29 = vadd.f32 %v3868_v22, %v1954_v49 }
 0xd86   :  { %v3870_v32 = vpop.eup %3869 }
 0xd87   :  { %v1967_v28 = vmul.f32 %v3870_v32, %v1950_v54  ;;  %v1959_v30 = vsel %vm1958_vm11, %v3868_v22, %v1955_v29  ;;  %vm1972_vm14 = vweird.f32 %v3870_v32 }
 0xd88   :  { %v1964_v36 = vsel %vm1961_vm13, %v1963_v12, %v1959_v30  ;;  %vm1973_vm0 = vmor %vm1971_vm15, %vm1972_vm14 }
 0xd89   :  { %v1968_v27 = vsub.f32 1.0, %v1967_v28  ;;  %v1981_v37 = vmul.f32 %v3864_v21, %v1964_v36 }
 0xd8b   :  { %v1969_v34 = vmul.f32 %v3870_v32, %v1968_v27  ;;  %2162 = vst [vmem:[#allocation26] sm:$0xff] %v1981_v37 }
 0xd8d   :  { %v1970_v16 = vadd.f32 %v3870_v32, %v1969_v34 }
 0xd8f   :  { %v1974_v42 = vsel %vm1973_vm0, %v3870_v32, %v1970_v16  ;;  %v3727_v16 = vld [vmem:[%s5448_s29] ss:$0 sm:$0xff] }
 0xd90   :  { %v1979_v39 = vsel %vm1976_vm1, %v1978_v44, %v1974_v42 }
 0xd91   :  { %v1982_v45 = vmul.f32 %v3866_v43, %v1979_v39 }
 0xd93   :  { %v1983_v46 = vpack.c.bf16 %v1982_v45, %v1981_v37  ;;  %2163 = vst [vmem:[#allocation26 + $0x8] sm:$0xff] %v1982_v45 }
 0xd95   :  { %1984 = vxpose.xlu0.c.b16.start.end [1/1] (short) %v1983_v46, 128  ;;  %2142 = vmatpush.bf16.msrb.mxu2 %v1983_v46 }
 0xe41   :  { %v1992_v47 = vpop.trf.xlu0 }
 0xe42   :  { %3412 = vmatmul.msk.bf16.vlgmr.msra.gmra.mxu3 %vm566_vm9, %v1992_v47  ;;  %3420 = vmatmul.msk.bf16.vlgmr.msrb.gmra.mxu0 %vm566_vm9, %v1992_v47 }
 0xebf   :  { %v2106_v14 = vpop.f32.mrf.mxu0 }
 0xec0   :  { %v2131_v48 = vpack.c.bf16 %v2106_v14, %v2106_v14  ;;  %v3643_v14 = vld [vmem:[#allocation17 + $0x38] sm:$0xff] }
 0xec1   :  { %2396 = vmatpush.bf16.msra.mxu2 %v3643_v14 }
 0xec2   :  { %3428 = vmatmul.msk.bf16.vlgmr.msrb.gmra.mxu2 %vm566_vm9, %v2131_v48  ;;  %v3642_v48 = vld [vmem:[#allocation17 + $0x30] sm:$0xff] }
 0xec5   :  { %v5211_v50 = vpop.f32.mrf.mxu3  ;;  %2397 = vmatpush.bf16.msra.mxu2 %v3642_v48  ;;  %v3729_v48 = vld [vmem:[%s5450_s15] ss:$0 sm:$0xff] }
 0xec6   :  { %v2058_v51 = vsel %vm389_vm12, %v5211_v50, 0.0  ;;  %v2061_v56 = vmul.f32 %v5211_v50, %v5211_v50 }
 0xec7   :  { %v2108_v41 = vpop.f32.mrf.mxu0  ;;  %2059 = vadd.xlane.f32.xlu1 %v2058_v51  ;;  %v3640_v51 = vld [vmem:[#allocation17 + $0x20] sm:$0xff] }
 0xec8   :  { %v2062_v58 = vsel %vm389_vm12, 0.0, %v2061_v56 }
 0xec9   :  { %2063 = vadd.xlane.f32.xlu2 %v2062_v58  ;;  %v3639_v58 = vld [vmem:[#allocation17 + $0x18] sm:$0xff] }
 0xecd   :  { %v2035_v40 = vpop.f32.mrf.mxu3 }
 0xece   :  { %v3638_v40 = vld [vmem:[#allocation17 + $0x10] sm:$0xff] }
 0xf3a   :  { %v2060_v61 = vpop.xlane.xlu1 %2059 }
 0xf3b   :  { %v2065_v4 = vmul.f32 %v2060_v61, %v2060_v61  ;;  %v3637_v61 = vld [vmem:[#allocation17 + $0x8] sm:$0xff] }
 0xf3c   :  { %v2064_v0 = vpop.xlane.xlu2 %2063 }
 0xf3d   :  { %v2066_v31 = vsub.f32 %v2064_v0, %v2065_v4 }
 0xf3f   :  { %v2067_v1 = vand.u32 2147483647, %v2066_v31  ;;  %v3636_v31 = vld [vmem:[#allocation17] sm:$0xff] }
 0xf41   :  { %v2068_v57 = vmax.f32 %v2067_v1, 1e-08  ;;  %v3651_v1 = vld [vmem:[#allocation19 + $0x38] sm:$0xff] }
 0xf43   :  { %3871 = vrsqrt.f32 %v2068_v57  ;;  %vm2076_vm3 = vcmp.eq.f32.partialorder %v2068_v57, inf  ;;  %v2079_v22 = vand.u32 2147483648, %v2068_v57  ;;  %vm2078_vm5 = vcmp.eq.f32.partialorder %v2068_v57, 0.0 }
 0xf45   :  { %v2144_v6 = vpop.f32.mrf.mxu2 }
 0xf46   :  { %v2151_v53 = vsel %vm2150_vm2, 0.0, %v2144_v6 }
 0xf47   :  { %v2154_v55 = vmul.f32 10.0, %v2151_v53 }
 0xf49   :  { %v3872_v8 = vpop.eup %3871  ;;  %v2155_v9 = vmul.f32 0.5, %v2154_v55 }
 0xf4a   :  { %v2070_v10 = vmul.f32 %v3872_v8, %v2068_v57 }
 0xf4b   :  { %3873 = vtanh.f32 %v2155_v9 }
 0xf4c   :  { %v2071_v15 = vmul.f32 %v3872_v8, %v2070_v10  ;;  %v3649_v10 = vld [vmem:[#allocation19 + $0x28] sm:$0xff] }
 0xf4d   :  { %v2146_v17 = vpop.f32.mrf.mxu2 }
 0xf4e   :  { %v2072_v38 = vmul.f32 0.5, %v2071_v15 }
 0xf50   :  { %v2073_v33 = vsub.f32 1.5, %v2072_v38 }
 0xf51   :  { %v3874_v18 = vpop.eup %3873 }
 0xf52   :  { %v2074_v21 = vmul.f32 %v3872_v8, %v2073_v33  ;;  %v2157_v11 = vadd.f32 1.0, %v3874_v18  ;;  %v3648_v33 = vld [vmem:[#allocation19 + $0x20] sm:$0xff] }
 0xf54   :  { %v2075_v43 = vmul.f32 %v2074_v21, %v2068_v57  ;;  %v2158_v13 = vmul.f32 0.5, %v2157_v11  ;;  %v3647_v11 = vld [vmem:[#allocation19 + $0x18] sm:$0xff] }
 0xf56   :  { %v5230_v5 = vsel %vm1932_vm7, %v2158_v13, 0.0  ;;  %v2077_v54 = vsel %vm2076_vm3, %v2068_v57, %v2075_v43  ;;  %v3646_v43 = vld [vmem:[#allocation19 + $0x10] sm:$0xff] }
 0xf57   :  { %2161 = vst [vmem:[#allocation25] sm:$0xff] %v5230_v5  ;;  %v5235_v24 = vpack.c.bf16 %v5230_v5, %v5230_v5  ;;  %v2080_v25 = vsel %vm2078_vm5, %v2079_v22, %v2077_v54  ;;  %v3645_v54 = vld [vmem:[#allocation19 + $0x8] sm:$0xff] }
 0xf58   :  { %3875 = vrcp.f32 %v2080_v25  ;;  %v2092_v12 = vand.u32 2147483648, %v2080_v25  ;;  %v2090_v30 = vand.u32 2147483647, %v2080_v25  ;;  %vm2086_vm7 = vweird.f32 %v2080_v25 }
 0xf59   :  { %v5239_v49 = vsel %vm2459_vm4, %v5235_v24, 0 }
 0xf5a   :  { %2934 = vmatpush.bf16.msra.mxu0 %v5239_v49  ;;  %v2093_v27 = vor.u32 1.1754944e-38, %v2092_v12  ;;  %vm2091_vm10 = vcmp.eq.f32.partialorder %v2090_v30, 8.507059e+37 }
 0xf5e   :  { %v3876_v19 = vpop.eup %3875 }
 0xf5f   :  { %v2082_v29 = vmul.f32 %v3876_v19, %v2080_v25  ;;  %vm2087_vm6 = vweird.f32 %v3876_v19 }
 0xf60   :  { %vm2088_vm8 = vmor %vm2086_vm7, %vm2087_vm6 }
 0xf61   :  { %v2083_v32 = vsub.f32 1.0, %v2082_v29  ;;  %v3644_v29 = vld [vmem:[#allocation19] sm:$0xff] }
 0xf63   :  { %v2084_v28 = vmul.f32 %v3876_v19, %v2083_v32 }
 0xf65   :  { %v2085_v36 = vadd.f32 %v3876_v19, %v2084_v28 }
 0xf67   :  { %v2089_v37 = vsel %vm2088_vm8, %v3876_v19, %v2085_v36 }
 0xf68   :  { %v2094_v23 = vsel %vm2091_vm10, %v2093_v27, %v2089_v37 }
 0xf69   :  { %v2096_v34 = vmul.f32 %v2094_v23, %v5211_v50  ;;  %v3641_v50 = vld [vmem:[#allocation17 + $0x28] sm:$0xff] }
 0xf6a   :  { %2398 = vmatpush.bf16.msra.mxu2 %v3641_v50 }
 0xf6b   :  { %v5243_v20 = vpack.c.bf16 %v2096_v34, %v2096_v34  ;;  %2160 = vst [vmem:[#allocation23] sm:$0xff] %v2096_v34 }
 0xf6d   :  { %2293 = vmatmul.bf16.vlgmr.msrb.gmra.mxu1 %v5243_v20 }
 0xf6e   :  { %2399 = vmatpush.bf16.msra.mxu2 %v3640_v51 }
 0xf72   :  { %2400 = vmatpush.bf16.msra.mxu2 %v3639_v58 }
 0xf76   :  { %2401 = vmatpush.bf16.msra.mxu2 %v3638_v40 }
 0xf7a   :  { %2402 = vmatpush.bf16.msra.mxu2 %v3637_v61 }
 0xf7e   :  { %2403 = vmatpush.bf16.msra.mxu2 %v3636_v31 }
 0xf82   :  { %2568 = vmatpush.bf16.msrb.mxu2 %v3651_v1 }
 0xf86   :  { %2569 = vmatpush.bf16.msrb.mxu2 %v3650_v7 }
 0xf8a   :  { %2570 = vmatpush.bf16.msrb.mxu2 %v3649_v10 }
 0xf8e   :  { %2571 = vmatpush.bf16.msrb.mxu2 %v3648_v33 }
 0xf92   :  { %2572 = vmatpush.bf16.msrb.mxu2 %v3647_v11 }
 0xf96   :  { %2573 = vmatpush.bf16.msrb.mxu2 %v3646_v43 }
 0xf9a   :  { %2574 = vmatpush.bf16.msrb.mxu2 %v3645_v54 }
 0xf9e   :  { %2575 = vmatpush.bf16.msrb.mxu2 %v3644_v29  ;;  %v3659_v29 = vld [vmem:[#allocation20 + $0x38] sm:$0xff] }
 0xfea   :  { %v2294_v44 = vpop.f32.mrf.mxu1 }
 0xfeb   :  { %v5247_v42 = vadd.f32 %v3727_v16, %v2294_v44  ;;  %v3728_v44 = vld [vmem:[%s5449_s10] ss:$0 sm:$0xff] }
 0xfed   :  { %v2298_v39 = vsel %vm389_vm12, %v5247_v42, 0.0  ;;  %v2301_v45 = vmul.f32 %v5247_v42, %v5247_v42 }
 0xfee   :  { %2299 = vadd.xlane.f32.xlu1 %v2298_v39 }
 0xfef   :  { %v2302_v47 = vsel %vm389_vm12, 0.0, %v2301_v45 }
 0xff2   :  { %v2296_v46 = vpop.f32.mrf.mxu1 }
 0xff6   :  { %2303 = vadd.xlane.f32.xlu1 %v2302_v47 }
0x1061   :  { %v2300_v56 = vpop.xlane.xlu1 %2299 }
0x1062   :  { %v2306_v41 = vmul.f32 0.5, %v2300_v56 }
0x1064   :  { %3877 = vtanh.f32 %v2306_v41 }
0x1069   :  { %v2304_v26 = vpop.xlane.xlu1 %2303 }
0x106a   :  { %v3878_v59 = vpop.eup %3877  ;;  %v2305_v60 = vmax.f32 %v2304_v26, 1e-08 }
0x106b   :  { %v2308_v4 = vadd.f32 1.0, %v3878_v59 }
0x106c   :  { %3879 = vrcp.f32 %v2305_v60  ;;  %v2325_v55 = vand.u32 2147483648, %v2305_v60  ;;  %v2323_v52 = vand.u32 2147483647, %v2305_v60  ;;  %vm2319_vm13 = vweird.f32 %v2305_v60 }
0x106d   :  { %v2309_v0 = vmul.f32 0.5, %v2308_v4 }
0x106e   :  { %v2326_v17 = vor.u32 1.1754944e-38, %v2325_v55  ;;  %vm2324_vm15 = vcmp.eq.f32.partialorder %v2323_v52, 8.507059e+37 }
0x106f   :  { %v2310_v62 = vmul.f32 10.0, %v2309_v0 }
0x1071   :  { %v2311_v3 = vadd.f32 1.1, %v2310_v62 }
0x1072   :  { %v3880_v57 = vpop.eup %3879 }
0x1073   :  { %v2315_v6 = vmul.f32 %v3880_v57, %v2305_v60  ;;  %v2312_v8 = vmul.f32 %v2311_v3, %v2311_v3  ;;  %vm2320_vm11 = vweird.f32 %v3880_v57 }
0x1074   :  { %vm2321_vm14 = vmor %vm2319_vm13, %vm2320_vm11  ;;  %vm2455_vm11 = vcmask 64512  }
0x1075   :  { %v2316_v53 = vsub.f32 1.0, %v2315_v6  ;;  %v3461_v2 = vadd.f32 -1.0, %v2312_v8 }
0x1077   :  { %v2317_v9 = vmul.f32 %v3880_v57, %v2316_v53 }
0x1079   :  { %v2318_v15 = vadd.f32 %v3880_v57, %v2317_v9 }
0x107b   :  { %v2322_v38 = vsel %vm2321_vm14, %v3880_v57, %v2318_v15 }
0x107c   :  { %v2327_v18 = vsel %vm2324_vm15, %v2326_v17, %v2322_v38 }
0x107d   :  { %v2328_v21 = vmul.f32 %v3461_v2, %v2327_v18 }
0x107f   :  { %3881 = vrsqrt.f32 %v2328_v21  ;;  %vm2336_vm0 = vcmp.eq.f32.partialorder %v2328_v21, inf  ;;  %v2339_v30 = vand.u32 2147483648, %v2328_v21  ;;  %vm2338_vm1 = vcmp.eq.f32.partialorder %v2328_v21, 0.0 }
0x1085   :  { %v3882_v13 = vpop.eup %3881 }
0x1086   :  { %v2330_v22 = vmul.f32 %v3882_v13, %v2328_v21 }
0x1088   :  { %v2331_v25 = vmul.f32 %v3882_v13, %v2330_v22 }
0x108a   :  { %v2332_v19 = vmul.f32 0.5, %v2331_v25 }
0x108c   :  { %v2333_v32 = vsub.f32 1.5, %v2332_v19 }
0x108e   :  { %v2334_v12 = vmul.f32 %v3882_v13, %v2333_v32 }
0x1090   :  { %v2335_v28 = vmul.f32 %v2334_v12, %v2328_v21  ;;  %v3658_v12 = vld [vmem:[#allocation20 + $0x30] sm:$0xff] }
0x1092   :  { %v2337_v36 = vsel %vm2336_vm0, %v2328_v21, %v2335_v28  ;;  %v3657_v28 = vld [vmem:[#allocation20 + $0x28] sm:$0xff] }
0x1093   :  { %v2340_v27 = vsel %vm2338_vm1, %v2339_v30, %v2337_v36  ;;  %v3656_v30 = vld [vmem:[#allocation20 + $0x20] sm:$0xff]  ;;  %v3655_v36 = vld [vmem:[#allocation20 + $0x18] sm:$0xff] }
0x1094   :  { %v2341_v37 = vmul.f32 %v2340_v27, %v5247_v42  ;;  %v3654_v27 = vld [vmem:[#allocation20 + $0x10] sm:$0xff] }
0x1096   :  { %v2342_v23 = vsel %vm389_vm12, %v2311_v3, %v2341_v37  ;;  %v3653_v37 = vld [vmem:[#allocation20 + $0x8] sm:$0xff] }
0x1097   :  { %v2343_v34 = vmax.f32 %v2342_v23, 0.0  ;;  %v3652_v23 = vld [vmem:[#allocation20] sm:$0xff] }
0x1099   :  { %v2344_v16 = vpack.c.bf16 %v2343_v34, %v2343_v34 }
0x109b   :  { %2404 = vmatmul.bf16.vlgmr.msra.gmra.mxu2 %v2344_v16  ;;  %v1993_v16 = vpop.trf.xlu0 }
0x109c   :  { %3413 = vmatmul.msk.bf16.gmra.mxu3 %vm566_vm9, %v1993_v16  ;;  %3421 = vmatmul.msk.bf16.gmra.mxu0 %vm566_vm9, %v1993_v16 }
0x10ab   :  { %2576 = vmatmul.bf16.vlgmr.msrb.gmra.mxu2 %v5243_v20 }
0x111e   :  { %v2405_v39 = vpop.f32.mrf.mxu2 }
0x111f   :  { %v2406_v45 = vadd.f32 %v3728_v44, %v2405_v39  ;;  %v1994_v39 = vpop.trf.xlu0 }
0x1120   :  { %3414 = vmatmul.msk.bf16.gmra.mxu3 %vm566_vm9, %v1994_v39  ;;  %3422 = vmatmul.msk.bf16.gmra.mxu0 %vm566_vm9, %v1994_v39 }
0x1121   :  { %v2409_v46 = vsel %vm389_vm12, %v2406_v45, 0.0  ;;  %v2412_v47 = vmul.f32 %v2406_v45, %v2406_v45 }
0x1122   :  { %2410 = vadd.xlane.f32.xlu1 %v2409_v46 }
0x1123   :  { %v2413_v42 = vsel %vm389_vm12, 0.0, %v2412_v47 }
0x1126   :  { %v2407_v14 = vpop.f32.mrf.mxu2 }
0x112a   :  { %2414 = vadd.xlane.f32.xlu1 %v2413_v42 }
0x112e   :  { %v2577_v50 = vpop.f32.mrf.mxu2 }
0x112f   :  { %v5266_v51 = vadd.f32 %v3729_v48, %v2577_v50  ;;  %v1995_v50 = vpop.trf.xlu0 }
0x1130   :  { %3415 = vmatmul.msk.bf16.gmra.mxu3 %vm566_vm9, %v1995_v50  ;;  %3423 = vmatmul.msk.bf16.gmra.mxu0 %vm566_vm9, %v1995_v50 }
0x1131   :  { %v2581_v56 = vsel %vm389_vm12, %v5266_v51, 0.0 }
0x1132   :  { %2582 = vadd.xlane.f32.xlu2 %v2581_v56  ;;  %v2584_v56 = vmul.f32 %v5266_v51, %v5266_v51 }
0x1136   :  { %v2579_v41 = vpop.f32.mrf.mxu2 }
0x1195   :  { %v2411_v58 = vpop.xlane.xlu1 %2410 }
0x1196   :  { %v2417_v40 = vmul.f32 0.5, %v2411_v58  ;;  %v2585_v58 = vsel %vm389_vm12, 0.0, %v2584_v56 }
0x1198   :  { %3883 = vtanh.f32 %v2417_v40 }
0x119d   :  { %v2415_v26 = vpop.xlane.xlu1 %2414 }
0x119e   :  { %v3884_v59 = vpop.eup %3883  ;;  %v2416_v60 = vmax.f32 %v2415_v26, 1e-08 }
0x119f   :  { %v2419_v61 = vadd.f32 1.0, %v3884_v59  ;;  %v1996_v59 = vpop.trf.xlu0 }
0x11a0   :  { %3885 = vrcp.f32 %v2416_v60  ;;  %v2436_v3 = vand.u32 2147483648, %v2416_v60  ;;  %v2434_v53 = vand.u32 2147483647, %v2416_v60  ;;  %vm2430_vm5 = vweird.f32 %v2416_v60  ;;  %3416 = vmatmul.msk.bf16.gmra.mxu3 %vm566_vm9, %v1996_v59  ;;  %3424 = vmatmul.msk.bf16.gmra.mxu0 %vm566_vm9, %v1996_v59 }
0x11a1   :  { %v2420_v4 = vmul.f32 0.5, %v2419_v61 }
0x11a2   :  { %v2437_v8 = vor.u32 1.1754944e-38, %v2436_v3  ;;  %vm2435_vm7 = vcmp.eq.f32.partialorder %v2434_v53, 8.507059e+37 }
0x11a3   :  { %v2421_v0 = vmul.f32 10.0, %v2420_v4 }
0x11a5   :  { %v2422_v62 = vadd.f32 1.1, %v2421_v0  ;;  %v2110_v0 = vpop.f32.mrf.mxu0 }
0x11a6   :  { %v3886_v31 = vpop.eup %3885 }
0x11a7   :  { %v2426_v1 = vmul.f32 %v3886_v31, %v2416_v60  ;;  %v2423_v6 = vmul.f32 %v2422_v62, %v2422_v62  ;;  %vm2431_vm3 = vweird.f32 %v3886_v31  ;;  %v1997_v60 = vpop.trf.xlu0 }
0x11a8   :  { %vm2432_vm6 = vmor %vm2430_vm5, %vm2431_vm3 }
0x11a9   :  { %v2427_v57 = vsub.f32 1.0, %v2426_v1  ;;  %v3494_v9 = vadd.f32 -1.0, %v2423_v6 }
0x11ab   :  { %v2428_v7 = vmul.f32 %v3886_v31, %v2427_v57 }
0x11ad   :  { %v2429_v55 = vadd.f32 %v3886_v31, %v2428_v7  ;;  %v2111_v1 = vpop.f32.mrf.mxu0 }
0x11af   :  { %v2433_v52 = vsel %vm2432_vm6, %v3886_v31, %v2429_v55  ;;  %v1998_v61 = vpop.trf.xlu0  ;;  %v2583_v31 = vpop.xlane.xlu2 %2582 }
0x11b0   :  { %v2438_v10 = vsel %vm2435_vm7, %v2437_v8, %v2433_v52  ;;  %3417 = vmatmul.msk.bf16.gmra.mxu3 %vm566_vm9, %v1997_v60  ;;  %3425 = vmatmul.msk.bf16.gmra.mxu0 %vm566_vm9, %v1997_v60  ;;  %v2589_v57 = vmul.f32 0.5, %v2583_v31 }
0x11b1   :  { %v2439_v15 = vmul.f32 %v3494_v9, %v2438_v10 }
0x11b3   :  { %3887 = vrsqrt.f32 %v2439_v15  ;;  %vm2447_vm8 = vcmp.eq.f32.partialorder %v2439_v15, inf  ;;  %v2450_v43 = vand.u32 2147483648, %v2439_v15  ;;  %vm2449_vm10 = vcmp.eq.f32.partialorder %v2439_v15, 0.0 }
0x11b4   :  { %3889 = vtanh.f32 %v2589_v57 }
0x11b5   :  { %v2113_v6 = vpop.f32.mrf.mxu0 }
0x11b7   :  { %v1999_v4 = vpop.trf.xlu0 }
0x11b9   :  { %v3888_v17 = vpop.eup %3887 }
0x11ba   :  { %v2441_v2 = vmul.f32 %v3888_v17, %v2439_v15  ;;  %v3890_v55 = vpop.eup %3889 }
0x11bb   :  { %v2591_v52 = vadd.f32 1.0, %v3890_v55 }
0x11bc   :  { %v2442_v38 = vmul.f32 %v3888_v17, %v2441_v2 }
0x11be   :  { %v2443_v33 = vmul.f32 0.5, %v2442_v38  ;;  %v2592_v38 = vmul.f32 0.5, %v2591_v52 }
0x11c0   :  { %v2444_v18 = vsub.f32 1.5, %v2443_v33  ;;  %3418 = vmatmul.msk.bf16.gmra.mxu3 %vm566_vm9, %v1998_v61  ;;  %3426 = vmatmul.msk.bf16.gmra.mxu0 %vm566_vm9, %v1998_v61 }
0x11c2   :  { %v2445_v21 = vmul.f32 %v3888_v17, %v2444_v18 }
0x11c4   :  { %v2446_v11 = vmul.f32 %v2445_v21, %v2439_v15 }
0x11c6   :  { %v2448_v13 = vsel %vm2447_vm8, %v2439_v15, %v2446_v11  ;;  %v2114_v15 = vpop.f32.mrf.mxu0 }
0x11c7   :  { %v2451_v22 = vsel %vm2449_vm10, %v2450_v43, %v2448_v13 }
0x11c8   :  { %v2452_v54 = vmul.f32 %v2451_v22, %v2406_v45  ;;  %v3730_v45 = vld [vmem:[%s5451_s2] ss:$0 sm:$0xff]  ;;  %v2593_v22 = vmul.f32 10.0, %v2592_v38 }
0x11ca   :  { %v2453_v25 = vsel %vm389_vm12, %v2422_v62, %v2452_v54  ;;  %v2037_v62 = vpop.f32.mrf.mxu3 }
0x11cb   :  { %v2454_v19 = vpack.c.bf16 %v2453_v25, %v2453_v25 }
0x11cd   :  { %v2461_v32 = vsel %vm2459_vm4, %v2454_v19, 0 }
0x11ce   :  { %2470 = vmatpush.bf16.msra.mxu1 %v2461_v32 }
0x11d0   :  { %3419 = vmatmul.msk.bf16.gmra.mxu3 %vm566_vm9, %v1999_v4  ;;  %3427 = vmatmul.msk.bf16.gmra.mxu0 %vm566_vm9, %v1999_v4 }
0x11d1   :  { %3495 = vmatmul.msk.bf16.vlgmr.msra.gmra.mxu1 %vm2455_vm11, %v5235_v24 }
0x11d2   :  { %2677 = vmatpush.bf16.msrb.mxu1 %v3659_v29  ;;  %v2038_v3 = vpop.f32.mrf.mxu3 }
0x11d6   :  { %2678 = vmatpush.bf16.msrb.mxu1 %v3658_v12  ;;  %v2116_v12 = vpop.f32.mrf.mxu0 }
0x11da   :  { %2679 = vmatpush.bf16.msrb.mxu1 %v3657_v28  ;;  %v2040_v10 = vpop.f32.mrf.mxu3 }
0x11de   :  { %2680 = vmatpush.bf16.msrb.mxu1 %v3656_v30  ;;  %v2117_v61 = vpop.f32.mrf.mxu0 }
0x11e2   :  { %2681 = vmatpush.bf16.msrb.mxu1 %v3655_v36  ;;  %v2041_v54 = vpop.f32.mrf.mxu3 }
0x11e6   :  { %2682 = vmatpush.bf16.msrb.mxu1 %v3654_v27 }
0x11ea   :  { %2683 = vmatpush.bf16.msrb.mxu1 %v3653_v37 }
0x11ee   :  { %2684 = vmatpush.bf16.msrb.mxu1 %v3652_v23  ;;  %v5316_v23 = vadd.f32 1.1, %v2593_v22 }
0x11f0   :  { %v2595_v50 = vmul.f32 %v5316_v23, %v5316_v23 }
0x11f1   :  { %2685 = vmatmul.bf16.vlgmr.msrb.gmra.mxu1 %v5243_v20 }
0x11f2   :  { %v3528_v31 = vadd.f32 -1.0, %v2595_v50  ;;  %v2850_v50 = vsel %vm2459_vm4, %v5243_v20, 0 }
0x124e   :  { %v5277_v34 = vpop.f32.mrf.mxu1 }
0x124f   :  { %v2476_v24 = vsel %vm389_vm12, %v5277_v34, 0.0  ;;  %v2479_v40 = vmul.f32 %v5277_v34, %v5277_v34 }
0x1250   :  { %2477 = vadd.xlane.f32.xlu2 %v2476_v24 }
0x1251   :  { %v2480_v26 = vsel %vm389_vm12, 0.0, %v2479_v40  ;;  %v2043_v40 = vpop.f32.mrf.mxu3 }
0x1256   :  { %v2474_v44 = vpop.f32.mrf.mxu1 }
0x1259   :  { %v2044_v6 = vpop.f32.mrf.mxu3 }
0x126e   :  { %v2686_v46 = vpop.f32.mrf.mxu1 }
0x126f   :  { %v5287_v47 = vadd.f32 %v3730_v45, %v2686_v46 }
0x1271   :  { %v2690_v14 = vsel %vm389_vm12, %v5287_v47, 0.0  ;;  %v2693_v42 = vmul.f32 %v5287_v47, %v5287_v47 }
0x1272   :  { %2691 = vadd.xlane.f32.xlu1 %v2690_v14 }
0x1273   :  { %v2694_v48 = vsel %vm389_vm12, 0.0, %v2693_v42 }
0x1274   :  { %2695 = vadd.xlane.f32.xlu0 %v2694_v48 }
0x1276   :  { %v2688_v41 = vpop.f32.mrf.mxu1 }
0x127a   :  { %2586 = vadd.xlane.f32.xlu1 %v2585_v58 }
0x1282   :  { %2481 = vadd.xlane.f32.xlu1 %v2480_v26 }
0x12c3   :  { %v2478_v11 = vpop.xlane.xlu2 %2477 }
0x12c4   :  { %v2483_v29 = vmul.f32 %v2478_v11, %v2478_v11 }
0x12e5   :  { %v2692_v7 = vpop.xlane.xlu1 %2691 }
0x12e6   :  { %v2698_v53 = vmul.f32 0.5, %v2692_v7 }
0x12e7   :  { %v2696_v8 = vpop.xlane.xlu0 %2695 }
0x12e8   :  { %3891 = vtanh.f32 %v2698_v53  ;;  %v2697_v9 = vmax.f32 %v2696_v8, 1e-08  ;;  %v2119_v8 = vpop.f32.mrf.mxu0 }
0x12ea   :  { %3893 = vrcp.f32 %v2697_v9  ;;  %v2717_v32 = vand.u32 2147483648, %v2697_v9  ;;  %v2715_v36 = vand.u32 2147483647, %v2697_v9  ;;  %vm2711_vm13 = vweird.f32 %v2697_v9 }
0x12ec   :  { %v2718_v45 = vor.u32 1.1754944e-38, %v2717_v32  ;;  %vm2716_vm15 = vcmp.eq.f32.partialorder %v2715_v36, 8.507059e+37 }
0x12ed   :  { %v2587_v17 = vpop.xlane.xlu1 %2586 }
0x12ee   :  { %v3892_v2 = vpop.eup %3891  ;;  %v2588_v33 = vmax.f32 %v2587_v17, 1e-08 }
0x12ef   :  { %v2700_v18 = vadd.f32 1.0, %v3892_v2 }
0x12f0   :  { %v3894_v21 = vpop.eup %3893  ;;  %3895 = vrcp.f32 %v2588_v33  ;;  %v2608_v41 = vand.u32 2147483648, %v2588_v33  ;;  %v2606_v60 = vand.u32 2147483647, %v2588_v33  ;;  %vm2602_vm1 = vweird.f32 %v2588_v33 }
0x12f1   :  { %v2701_v43 = vmul.f32 0.5, %v2700_v18  ;;  %v2707_v13 = vmul.f32 %v3894_v21, %v2697_v9  ;;  %vm2712_vm9 = vweird.f32 %v3894_v21  ;;  %v2046_v18 = vpop.f32.mrf.mxu3 }
0x12f2   :  { %vm2713_vm14 = vmor %vm2711_vm13, %vm2712_vm9  ;;  %v2609_v0 = vor.u32 1.1754944e-38, %v2608_v41  ;;  %vm2607_vm5 = vcmp.eq.f32.partialorder %v2606_v60, 8.507059e+37 }
0x12f3   :  { %v2702_v25 = vmul.f32 10.0, %v2701_v43  ;;  %v2708_v19 = vsub.f32 1.0, %v2707_v13  ;;  %v2120_v13 = vpop.f32.mrf.mxu0 }
0x12f5   :  { %v5314_v28 = vadd.f32 1.1, %v2702_v25  ;;  %v2709_v30 = vmul.f32 %v3894_v21, %v2708_v19  ;;  %v2482_v27 = vpop.xlane.xlu1 %2481 }
0x12f6   :  { %v3896_v37 = vpop.eup %3895  ;;  %v2484_v24 = vsub.f32 %v2482_v27, %v2483_v29 }
0x12f7   :  { %v2704_v16 = vmul.f32 %v5314_v28, %v5314_v28  ;;  %v2710_v44 = vadd.f32 %v3894_v21, %v2709_v30  ;;  %v2598_v39 = vmul.f32 %v3896_v37, %v2588_v33  ;;  %vm2603_vm0 = vweird.f32 %v3896_v37 }
0x12f8   :  { %v2485_v46 = vand.u32 2147483647, %v2484_v24  ;;  %vm2604_vm3 = vmor %vm2602_vm1, %vm2603_vm0 }
0x12f9   :  { %v3561_v14 = vadd.f32 -1.0, %v2704_v16  ;;  %v2714_v42 = vsel %vm2713_vm14, %v3894_v21, %v2710_v44  ;;  %v2599_v48 = vsub.f32 1.0, %v2598_v39  ;;  %v2047_v16 = vpop.f32.mrf.mxu3 }
0x12fa   :  { %v2719_v56 = vsel %vm2716_vm15, %v2718_v45, %v2714_v42  ;;  %v2486_v58 = vmax.f32 %v2485_v46, 1e-08 }
0x12fb   :  { %v2720_v26 = vmul.f32 %v3561_v14, %v2719_v56  ;;  %v2600_v59 = vmul.f32 %v3896_v37, %v2599_v48  ;;  %v2122_v45 = vpop.f32.mrf.mxu0 }
0x12fc   :  { %3897 = vrsqrt.f32 %v2486_v58  ;;  %vm2494_vm6 = vcmp.eq.f32.partialorder %v2486_v58, inf  ;;  %v2497_v19 = vand.u32 2147483648, %v2486_v58  ;;  %vm2496_vm8 = vcmp.eq.f32.partialorder %v2486_v58, 0.0 }
0x12fd   :  { %v2601_v4 = vadd.f32 %v3896_v37, %v2600_v59  ;;  %3899 = vrsqrt.f32 %v2720_v26  ;;  %vm2728_vm7 = vcmp.eq.f32.partialorder %v2720_v26, inf  ;;  %v2731_v29 = vand.u32 2147483648, %v2720_v26 }
0x12fe   :  { %vm2730_vm10 = vcmp.eq.f32.partialorder %v2720_v26, 0.0 }
0x12ff   :  { %v2605_v62 = vsel %vm2604_vm3, %v3896_v37, %v2601_v4  ;;  %vm2782_vm3 = vcmp.lt.s32.totalorder %v4764_v63, 4 }
0x1300   :  { %v2610_v1 = vsel %vm2607_vm5, %v2609_v0, %v2605_v62 }
0x1301   :  { %v2611_v57 = vmul.f32 %v3528_v31, %v2610_v1  ;;  %v2049_v40 = vpop.f32.mrf.mxu3 }
0x1302   :  { %v3898_v3 = vpop.eup %3897 }
0x1303   :  { %v3900_v7 = vpop.eup %3899  ;;  %v2488_v53 = vmul.f32 %v3898_v3, %v2486_v58  ;;  %3901 = vrsqrt.f32 %v2611_v57  ;;  %vm2619_vm9 = vcmp.eq.f32.partialorder %v2611_v57, inf  ;;  %v2622_v14 = vand.u32 2147483648, %v2611_v57  ;;  %v2123_v4 = vpop.f32.mrf.mxu0 }
0x1304   :  { %v2722_v55 = vmul.f32 %v3900_v7, %v2720_v26  ;;  %vm2621_vm13 = vcmp.eq.f32.partialorder %v2611_v57, 0.0 }
0x1305   :  { %v2489_v9 = vmul.f32 %v3898_v3, %v2488_v53 }
0x1306   :  { %v2723_v52 = vmul.f32 %v3900_v7, %v2722_v55 }
0x1307   :  { %v2490_v10 = vmul.f32 0.5, %v2489_v9 }
0x1308   :  { %v2724_v15 = vmul.f32 0.5, %v2723_v52 }
0x1309   :  { %v3902_v17 = vpop.eup %3901  ;;  %v2491_v2 = vsub.f32 1.5, %v2490_v10 }
0x130a   :  { %v2725_v38 = vsub.f32 1.5, %v2724_v15  ;;  %v2613_v33 = vmul.f32 %v3902_v17, %v2611_v57 }
0x130b   :  { %v2492_v21 = vmul.f32 %v3898_v3, %v2491_v2  ;;  %v2125_v3 = vpop.f32.mrf.mxu0 }
0x130c   :  { %v2726_v11 = vmul.f32 %v3900_v7, %v2725_v38  ;;  %v2614_v43 = vmul.f32 %v3902_v17, %v2613_v33 }
0x130d   :  { %v2493_v22 = vmul.f32 %v2492_v21, %v2486_v58 }
0x130e   :  { %v2727_v54 = vmul.f32 %v2726_v11, %v2720_v26  ;;  %v2615_v25 = vmul.f32 0.5, %v2614_v43 }
0x130f   :  { %v2495_v32 = vsel %vm2494_vm6, %v2486_v58, %v2493_v22 }
0x1310   :  { %v2729_v12 = vsel %vm2728_vm7, %v2720_v26, %v2727_v54  ;;  %v2616_v30 = vsub.f32 1.5, %v2615_v25  ;;  %v2498_v36 = vsel %vm2496_vm8, %v2497_v19, %v2495_v32 }
0x1311   :  { %v2732_v27 = vsel %vm2730_vm10, %v2731_v29, %v2729_v12  ;;  %3903 = vrcp.f32 %v2498_v36  ;;  %v2510_v59 = vand.u32 2147483648, %v2498_v36  ;;  %v2508_v61 = vand.u32 2147483647, %v2498_v36 }
0x1312   :  { %v2733_v37 = vmul.f32 %v2732_v27, %v5287_v47  ;;  %v2617_v24 = vmul.f32 %v3902_v17, %v2616_v30  ;;  %vm2504_vm15 = vweird.f32 %v2498_v36 }
0x1313   :  { %vm2509_vm1 = vcmp.eq.f32.partialorder %v2508_v61, 8.507059e+37  ;;  %v2126_v7 = vpop.f32.mrf.mxu0 }
0x1314   :  { %v2734_v44 = vsel %vm389_vm12, %v5314_v28, %v2733_v37  ;;  %v2618_v39 = vmul.f32 %v2617_v24, %v2611_v57 }
0x1315   :  { %v2738_v46 = vpack.c.bf16 %v2734_v44, %v2734_v44 }
0x1316   :  { %v2620_v42 = vsel %vm2619_vm9, %v2611_v57, %v2618_v39  ;;  %v2050_v57 = vpop.f32.mrf.mxu3 }
0x1317   :  { %v3904_v48 = vpop.eup %3903  ;;  %2746 = vmatpush.bf16.xpose.msra.mxu2 %v2738_v46  ;;  %v2623_v56 = vsel %vm2621_vm13, %v2622_v14, %v2620_v42 }
0x1318   :  { %v2624_v47 = vmul.f32 %v2623_v56, %v5266_v51  ;;  %v2500_v41 = vmul.f32 %v3904_v48, %v2498_v36  ;;  %vm2505_vm14 = vweird.f32 %v3904_v48  ;;  %v2511_v51 = vor.u32 1.1754944e-38, %v2510_v59 }
0x1319   :  { %vm2506_vm0 = vmor %vm2504_vm15, %vm2505_vm14 }
0x131a   :  { %v2625_v28 = vsel %vm389_vm12, %v5316_v23, %v2624_v47  ;;  %v2501_v58 = vsub.f32 1.0, %v2500_v41 }
0x131b   :  { %v2735_v26 = vsub.f32 0.0, %v2625_v28  ;;  %v2128_v55 = vpop.f32.mrf.mxu0 }
0x131c   :  { %v2502_v60 = vmul.f32 %v3904_v48, %v2501_v58 }
0x131d   :  { %v2736_v20 = vsel %vm389_vm12, %v2735_v26, %v2624_v47 }
0x131e   :  { %v2737_v0 = vpack.c.bf16 %v2736_v20, %v2736_v20  ;;  %v2503_v31 = vadd.f32 %v3904_v48, %v2502_v60  ;;  %v2052_v6 = vpop.f32.mrf.mxu3 }
0x131f   :  { %2859 = vmatpush.bf16.msrb.mxu2 %v2850_v50 }
0x1320   :  { %2747 = vmatmul.bf16.vlgmr.msra.gmra.mxu2 %v2737_v0  ;;  %v2507_v62 = vsel %vm2506_vm0, %v3904_v48, %v2503_v31 }
0x1321   :  { %v2512_v23 = vsel %vm2509_vm1, %v2511_v51, %v2507_v62 }
0x1322   :  { %v2514_v1 = vmul.f32 %v2512_v23, %v5277_v34 }
0x1323   :  { %v2129_v9 = vpop.f32.mrf.mxu0 }
0x1324   :  { %2515 = vrot.lane.b32.xlu2 %v2514_v1, %s4472_s7 }
0x1326   :  { %v2053_v53 = vpop.f32.mrf.mxu3 }
0x132e   :  { %v2055_v8 = vpop.f32.mrf.mxu3 }
0x1336   :  { %v2056_v52 = vpop.f32.mrf.mxu3 }
0x137e   :  { %v2516_v10 = vpop.permute.xlu2 %2515 }
0x137f   :  { %v2762_v15 = vpack.c.bf16 %v2516_v10, %v2516_v10 }
0x1381   :  { %v2767_v17 = vsel %vm2459_vm4, %v2762_v15, 0 }
0x1382   :  { %2776 = vmatpush.bf16.msra.mxu1 %v2767_v17 }
0x1386   :  { %3660 = vmatpush.bf16.msrb.mxu1 %v5239_v49 }
0x13a3   :  { %v2748_v2 = vpop.f32.mrf.mxu2 }
0x13a4   :  { %v2752_v34 = vmul.f32 2.0, %v2748_v2 }
0x13a6   :  { %v2753_v38 = vadd.f32 2.0, %v2752_v34 }
0x13a8   :  { %v2754_v33 = vmul.f32 0.33333334, %v2753_v38 }
0x13aa   :  { %v2755_v18 = vadd.f32 20.0, %v2754_v33 }
0x13ab   :  { %v2750_v21 = vpop.f32.mrf.mxu2 }
0x13ac   :  { %v2756_v11 = vmul.f32 0.5, %v2755_v18 }
0x13ae   :  { %3905 = vtanh.f32 %v2756_v11 }
0x13b4   :  { %v3906_v43 = vpop.eup %3905 }
0x13b5   :  { %v2758_v13 = vadd.f32 1.0, %v3906_v43 }
0x13b7   :  { %v2759_v22 = vmul.f32 0.5, %v2758_v13 }
0x13b9   :  { %v2760_v54 = vmul.f32 %v2759_v22, %v5230_v5 }
0x13bb   :  { %v2761_v25 = vpack.c.bf16 %v2760_v54, %v2760_v54 }
0x13bd   :  { %3562 = vmatmul.msk.bf16.vlgmr.msra.gmra.mxu1 %vm2455_vm11, %v2761_v25 }
0x143a   :  { %v2778_v19 = vpop.f32.mrf.mxu1 }
0x143b   :  { %v2783_v49 = vsel %vm2782_vm3, %v2778_v19, -1e+30 }
0x143c   :  { %2784 = vmax.xlane.f32.xlu1 %v2783_v49 }
0x1442   :  { %v2780_v29 = vpop.f32.mrf.mxu1 }
0x14af   :  { %v2785_v32 = vpop.xlane.xlu1 %2784 }
0x14b0   :  { %v2786_v12 = vsub.f32 %v2783_v49, %v2785_v32 }
0x14b2   :  { %v2787_v30 = vmul.f32 10.0, %v2786_v12 }
0x14b4   :  { %v2788_v36 = vmul.f32 1.442695, %v2787_v30 }
0x14b6   :  { %3907 = vpow2.f32 %v2788_v36 }
0x14bc   :  { %v3908_v27 = vpop.eup %3907 }
0x14bd   :  { %2790 = vadd.xlane.f32.xlu1 %v3908_v27 }
0x1530   :  { %v2791_v37 = vpop.xlane.xlu1 %2790 }
0x1531   :  { %3909 = vrcp.f32 %v2791_v37  ;;  %v2803_v44 = vand.u32 2147483648, %v2791_v37  ;;  %v2801_v45 = vand.u32 2147483647, %v2791_v37  ;;  %vm2797_vm6 = vweird.f32 %v2791_v37 }
0x1533   :  { %v2804_v14 = vor.u32 1.1754944e-38, %v2803_v44  ;;  %vm2802_vm8 = vcmp.eq.f32.partialorder %v2801_v45, 8.507059e+37 }
0x1537   :  { %v3910_v5 = vpop.eup %3909 }
0x1538   :  { %v2793_v24 = vmul.f32 %v3910_v5, %v2791_v37  ;;  %vm2798_vm5 = vweird.f32 %v3910_v5 }
0x1539   :  { %vm2799_vm7 = vmor %vm2797_vm6, %vm2798_vm5 }
0x153a   :  { %v2794_v16 = vsub.f32 1.0, %v2793_v24 }
0x153c   :  { %v2795_v39 = vmul.f32 %v3910_v5, %v2794_v16 }
0x153e   :  { %v2796_v46 = vadd.f32 %v3910_v5, %v2795_v39 }
0x1540   :  { %v2800_v42 = vsel %vm2799_vm7, %v3910_v5, %v2796_v46 }
0x1541   :  { %v2805_v48 = vsel %vm2802_vm8, %v2804_v14, %v2800_v42 }
0x1542   :  { %v2807_v50 = vmul.f32 %v3908_v27, %v2805_v48 }
0x1544   :  { %v2808_v56 = vpack.c.bf16 %v2807_v50, %v2807_v50  ;;  %2992 = vst [vmem:[#allocation31] sm:$0xff] %v2807_v50 }
0x1546   :  { %2809 = vxpose.xlu1.c.b16.start.end [1/1] (short) %v2808_v56, 128  ;;  %v2966_v47 = vsel %vm2459_vm4, %v2808_v56, 0  ;;  %vm2982_vm4 = vcmp.lt.s32.totalorder %v5221_v35, 4 }
0x1547   :  { %2975 = vmatpush.bf16.msrb.mxu3 %v2966_v47 }
0x15f2   :  { %v2817_v41 = vpop.trf.xlu1 }
0x15f3   :  { %3563 = vmatmul.msk.bf16.vlgmr.msrb.gmra.mxu2 %vm2455_vm11, %v2817_v41  ;;  %3571 = vmatmul.msk.bf16.vlgmr.msra.gmra.mxu0 %vm2455_vm11, %v2817_v41 }
0x1602   :  { %v2818_v28 = vpop.trf.xlu1 }
0x1603   :  { %3564 = vmatmul.msk.bf16.gmra.mxu2 %vm2455_vm11, %v2818_v28  ;;  %3572 = vmatmul.msk.bf16.gmra.mxu0 %vm2455_vm11, %v2818_v28 }
0x1612   :  { %v2819_v0 = vpop.trf.xlu1 }
0x1613   :  { %3565 = vmatmul.msk.bf16.gmra.mxu2 %vm2455_vm11, %v2819_v0  ;;  %3573 = vmatmul.msk.bf16.gmra.mxu0 %vm2455_vm11, %v2819_v0 }
0x1622   :  { %v2820_v23 = vpop.trf.xlu1 }
0x1623   :  { %3566 = vmatmul.msk.bf16.gmra.mxu2 %vm2455_vm11, %v2820_v23  ;;  %3574 = vmatmul.msk.bf16.vlgmr.msrb.gmra.mxu1 %vm2455_vm11, %v2820_v23 }
0x1632   :  { %v2821_v53 = vpop.trf.xlu1 }
0x1633   :  { %3567 = vmatmul.msk.bf16.gmra.mxu2 %vm2455_vm11, %v2821_v53  ;;  %3575 = vmatmul.msk.bf16.gmra.mxu1 %vm2455_vm11, %v2821_v53 }
0x1642   :  { %v2822_v43 = vpop.trf.xlu1 }
0x1643   :  { %3568 = vmatmul.msk.bf16.gmra.mxu2 %vm2455_vm11, %v2822_v43  ;;  %3576 = vmatmul.msk.bf16.gmra.mxu1 %vm2455_vm11, %v2822_v43 }
0x1652   :  { %v2823_v32 = vpop.trf.xlu1 }
0x1653   :  { %3569 = vmatmul.msk.bf16.gmra.mxu2 %vm2455_vm11, %v2823_v32  ;;  %3577 = vmatmul.msk.bf16.gmra.mxu1 %vm2455_vm11, %v2823_v32 }
0x1662   :  { %v2824_v14 = vpop.trf.xlu1 }
0x1663   :  { %3570 = vmatmul.msk.bf16.gmra.mxu2 %vm2455_vm11, %v2824_v14  ;;  %3578 = vmatmul.msk.bf16.gmra.mxu1 %vm2455_vm11, %v2824_v14 }
0x1670   :  { %v2936_v58 = vpop.f32.mrf.mxu0 }
0x1671   :  { %v2961_v40 = vpack.c.bf16 %v2936_v58, %v2936_v58 }
0x1673   :  { %3579 = vmatmul.msk.bf16.vlgmr.msrb.gmra.mxu3 %vm2455_vm11, %v2961_v40 }
0x1676   :  { %v5349_v26 = vpop.f32.mrf.mxu2 }
0x1677   :  { %v2886_v59 = vsel %vm389_vm12, %v5349_v26, 0.0  ;;  %v2889_v61 = vmul.f32 %v5349_v26, %v5349_v26 }
0x1678   :  { %v2938_v60 = vpop.f32.mrf.mxu0  ;;  %2887 = vadd.xlane.f32.xlu2 %v2886_v59 }
0x1679   :  { %v2890_v20 = vsel %vm389_vm12, 0.0, %v2889_v61 }
0x167e   :  { %v2863_v4 = vpop.f32.mrf.mxu2 }
0x1680   :  { %2891 = vadd.xlane.f32.xlu2 %v2890_v20  ;;  %v2940_v31 = vpop.f32.mrf.mxu0 }
0x1686   :  { %v2865_v51 = vpop.f32.mrf.mxu2 }
0x1688   :  { %v2941_v62 = vpop.f32.mrf.mxu0 }
0x168e   :  { %v2866_v57 = vpop.f32.mrf.mxu2 }
0x16eb   :  { %v2888_v1 = vpop.xlane.xlu2 %2887 }
0x16ec   :  { %v2893_v3 = vmul.f32 %v2888_v1, %v2888_v1 }
0x16f3   :  { %v2892_v6 = vpop.xlane.xlu2 %2891 }
0x16f4   :  { %v2894_v7 = vsub.f32 %v2892_v6, %v2893_v3 }
0x16f6   :  { %v2895_v55 = vand.u32 2147483647, %v2894_v7  ;;  %v2977_v8 = vpop.f32.mrf.mxu3 }
0x16f7   :  { %v2981_v9 = vsel %vm2150_vm2, 0.0, %v2977_v8  ;;  %vm2983_vm2 = vmand %vm2982_vm4, %vm2782_vm3 }
0x16f8   :  { %v2896_v52 = vmax.f32 %v2895_v55, 1e-08  ;;  %v2984_v10 = vmul.f32 10.0, %v2981_v9 }
0x16fa   :  { %3911 = vrsqrt.f32 %v2896_v52  ;;  %v2985_v15 = vmul.f32 0.5, %v2984_v10  ;;  %vm2904_vm10 = vcmp.eq.f32.partialorder %v2896_v52, inf  ;;  %v2907_v35 = vand.u32 2147483648, %v2896_v52 }
0x16fb   :  { %vm2906_vm9 = vcmp.eq.f32.partialorder %v2896_v52, 0.0 }
0x16fc   :  { %3913 = vtanh.f32 %v2985_v15 }
0x16fe   :  { %v2979_v17 = vpop.f32.mrf.mxu3 }
0x1700   :  { %v3912_v2 = vpop.eup %3911 }
0x1701   :  { %v2898_v34 = vmul.f32 %v3912_v2, %v2896_v52 }
0x1702   :  { %v3914_v38 = vpop.eup %3913 }
0x1703   :  { %v2899_v33 = vmul.f32 %v3912_v2, %v2898_v34  ;;  %v2987_v18 = vadd.f32 1.0, %v3914_v38 }
0x1705   :  { %v2900_v21 = vmul.f32 0.5, %v2899_v33  ;;  %v2988_v11 = vmul.f32 0.5, %v2987_v18 }
0x1707   :  { %v2901_v13 = vsub.f32 1.5, %v2900_v21  ;;  %v2989_v22 = vsel %vm2983_vm2, %v2988_v11, 0.0 }
0x1708   :  { %2991 = vst [vmem:[#allocation29] sm:$0xff] %v2989_v22 }
0x1709   :  { %v2902_v54 = vmul.f32 %v3912_v2, %v2901_v13 }
0x170b   :  { %v2903_v25 = vmul.f32 %v2902_v54, %v2896_v52 }
0x170d   :  { %v2905_v19 = vsel %vm2904_vm10, %v2896_v52, %v2903_v25 }
0x170e   :  { %v2908_v49 = vsel %vm2906_vm9, %v2907_v35, %v2905_v19 }
0x170f   :  { %3915 = vrcp.f32 %v2908_v49  ;;  %v2920_v36 = vand.u32 2147483648, %v2908_v49  ;;  %v2918_v37 = vand.u32 2147483647, %v2908_v49  ;;  %vm2914_vm14 = vweird.f32 %v2908_v49 }
0x1711   :  { %v2921_v24 = vor.u32 1.1754944e-38, %v2920_v36  ;;  %vm2919_vm0 = vcmp.eq.f32.partialorder %v2918_v37, 8.507059e+37 }
0x1715   :  { %v3916_v29 = vpop.eup %3915 }
0x1716   :  { %v2910_v12 = vmul.f32 %v3916_v29, %v2908_v49  ;;  %vm2915_vm13 = vweird.f32 %v3916_v29 }
0x1717   :  { %vm2916_vm15 = vmor %vm2914_vm14, %vm2915_vm13 }
0x1718   :  { %v2911_v30 = vsub.f32 1.0, %v2910_v12 }
0x171a   :  { %v2912_v27 = vmul.f32 %v3916_v29, %v2911_v30 }
0x171c   :  { %v2913_v5 = vadd.f32 %v3916_v29, %v2912_v27 }
0x171e   :  { %v2917_v16 = vsel %vm2916_vm15, %v3916_v29, %v2913_v5 }
0x171f   :  { %v2922_v44 = vsel %vm2919_vm0, %v2921_v24, %v2917_v16 }
0x1720   :  { %v2924_v39 = vmul.f32 %v2922_v44, %v5349_v26 }
0x1722   :  { %v2993_v45 = vrot.slane %v2924_v39, 4  ;;  %2990 = vst [vmem:[#allocation28] sm:$0xff] %v2924_v39 }
0x1724   :  { %v2994_v46 = vadd.f32 %v2993_v45, %v2924_v39 }
0x1726   :  { %v2995_v42 = vrot.slane %v2994_v46, 2 }
0x1728   :  { %v2996_v48 = vadd.f32 %v2995_v42, %v2994_v46 }
0x172a   :  { %v2997_v50 = vrot.slane %v2996_v48, 1 }
0x172c   :  { %v5377_v56 = vadd.f32 %v2997_v50, %v2996_v48 }
0x172e   :  { %v2999_v47 = vsel %vm389_vm12, %v5377_v56, 0.0  ;;  %v3002_v41 = vmul.f32 %v5377_v56, %v5377_v56 }
0x172f   :  { %3000 = vadd.xlane.f32.xlu2 %v2999_v47 }
0x1730   :  { %v3003_v28 = vsel %vm389_vm12, 0.0, %v3002_v41 }
0x1731   :  { %3004 = vadd.xlane.f32.xlu1 %v3003_v28 }
0x1732   :  { %4234 = shalt.err (!%p4231_p8)
}
0x1733   :  { %3062 = dma.vmem_to_hbm [thread:$0]  %s3058_s21, 128, %s3060_s5, [#allocation24]  }
0x1734   :  { %s5453_s9 = sld [smem:[#allocation57_spill]]  ;;  %s4474_s12 = smov [#allocation26]  }
0x1735   :  { %s3078_s13 = sshll.u32 %s4474_s12, 4  ;;  %s3079_s13 = int_to_ptr.vmem [resolvable:$true] %s3078_s13 }
0x173a   :  { %s3080_s0 = sshll.u32 %s5453_s9, 4  ;;  %s4251_s27 = scalar_lea.hbm %s5453_s9, 16  ;;  %s3081_s0 = int_to_ptr.hbm [resolvable:$true] %s3080_s0 }
0x173b   :  { %s4247_s23 = sshra.s32 %s3081_s0, 4  ;;  %s4248_s23 = int_to_ptr.hbm [resolvable:$true] %s4247_s23 }
0x173c   :  { %s4249_s28 = scalar_lea.hbm %s4248_s23, 16  ;;  %p4252_p10 = scmp.lt.s32.totalorder %s4248_s23, %s5453_s9 }
0x173d   :  { %p4250_p9 = scmp.ne.s32.totalorder %s4248_s23, %s4249_s28  ;;  %p4253_p11 = scmp.lt.s32.totalorder %s4251_s27, %s4249_s28 }
0x173f   :  { %p4254_p12 = por %p4253_p11, %p4252_p10 }
0x1741   :  { %p4255_p13 = pnand %p4254_p12, %p4250_p9 }
0x1743   :  { %4258 = shalt.err (!%p4255_p13)
}
0x1744   :  { %3086 = dma.vmem_to_hbm [thread:$0]  %s3079_s13, 256, %s3081_s0, [#allocation27], %s4457_s18, %s4457_s18, %s4458_s22  }
0x1745   :  { %s3105_s8 = sshll.u32 %s4624_s20, 4  ;;  %s4475_s24 = smov [#allocation29]   ;;  %s3106_s8 = int_to_ptr.hbm [resolvable:$true] %s3105_s8 }
0x1746   :  { %s3103_s17 = sshll.u32 %s4475_s24, 4  ;;  %s4271_s25 = sshra.s32 %s3106_s8, 4  ;;  %s3104_s17 = int_to_ptr.vmem [resolvable:$true] %s3103_s17  ;;  %s4272_s25 = int_to_ptr.hbm [resolvable:$true] %s4271_s25 }
0x1747   :  { %s4273_s6 = scalar_lea.hbm %s4272_s25, 8  ;;  %s4275_s11 = scalar_lea.hbm %s4624_s20, 8 }
0x1748   :  { %p4274_p0 = scmp.ne.s32.totalorder %s4272_s25, %s4273_s6  ;;  %p4276_p1 = scmp.lt.s32.totalorder %s4272_s25, %s4624_s20 }
0x1749   :  { %p4277_p2 = scmp.lt.s32.totalorder %s4275_s11, %s4273_s6 }
0x174b   :  { %p4278_p3 = por %p4277_p2, %p4276_p1 }
0x174d   :  { %p4279_p4 = pnand %p4278_p3, %p4274_p0 }
0x174f   :  { %4282 = shalt.err (!%p4279_p4)
}
0x1750   :  { %3108 = dma.vmem_to_hbm [thread:$0]  %s3104_s17, 128, %s3106_s8, [#allocation30]  }
0x1751   :  { %s5454_s7 = sld [smem:[#allocation54_spill]]  ;;  %s4476_s29 = smov [#allocation22]  }
0x1752   :  { %s3043_s10 = sshll.u32 %s4476_s29, 4  ;;  %s3044_s10 = int_to_ptr.vmem [resolvable:$true] %s3043_s10 }
0x1757   :  { %s3045_s15 = sshll.u32 %s5454_s7, 4  ;;  %s4299_s5 = scalar_lea.hbm %s5454_s7, 16  ;;  %s3046_s15 = int_to_ptr.hbm [resolvable:$true] %s3045_s15 }
0x1758   :  { %s4295_s2 = sshra.s32 %s3046_s15, 4  ;;  %s4296_s2 = int_to_ptr.hbm [resolvable:$true] %s4295_s2 }
0x1759   :  { %s4297_s16 = scalar_lea.hbm %s4296_s2, 16  ;;  %p4300_p6 = scmp.lt.s32.totalorder %s4296_s2, %s5454_s7 }
0x175a   :  { %p4298_p5 = scmp.ne.s32.totalorder %s4296_s2, %s4297_s16  ;;  %p4301_p7 = scmp.lt.s32.totalorder %s4299_s5, %s4297_s16 }
0x175c   :  { %p4302_p8 = por %p4301_p7, %p4300_p6 }
0x175e   :  { %p4303_p9 = pnand %p4302_p8, %p4298_p5 }
0x1760   :  { %4306 = shalt.err (!%p4303_p9)
}
0x1761   :  { %s5455_s20 = sld [smem:[#allocation56_spill]]  ;;  %s4477_s21 = smov [#allocation25]  }
0x1762   :  { %3051 = dma.vmem_to_hbm [thread:$0]  %s3044_s10, 256, %s3046_s15, [#allocation4], %s4457_s18, %s4457_s18, %s4458_s22  }
0x1763   :  { %s3068_s30 = sshll.u32 %s4477_s21, 4  ;;  %s3069_s30 = int_to_ptr.vmem [resolvable:$true] %s3068_s30 }
0x1767   :  { %s3070_s19 = sshll.u32 %s5455_s20, 4  ;;  %s4323_s9 = scalar_lea.hbm %s5455_s20, 8  ;;  %s3071_s19 = int_to_ptr.hbm [resolvable:$true] %s3070_s19 }
0x1768   :  { %s4319_s1 = sshra.s32 %s3071_s19, 4  ;;  %s4320_s1 = int_to_ptr.hbm [resolvable:$true] %s4319_s1 }
0x1769   :  { %s4321_s26 = scalar_lea.hbm %s4320_s1, 8  ;;  %p4324_p11 = scmp.lt.s32.totalorder %s4320_s1, %s5455_s20 }
0x176a   :  { %p4322_p10 = scmp.ne.s32.totalorder %s4320_s1, %s4321_s26  ;;  %p4325_p12 = scmp.lt.s32.totalorder %s4323_s9, %s4321_s26 }
0x176c   :  { %p4326_p13 = por %p4325_p12, %p4324_p11 }
0x176e   :  { %p4327_p0 = pnand %p4326_p13, %p4322_p10 }
0x1770   :  { %4330 = shalt.err (!%p4327_p0)
}
0x1771   :  { %3073 = dma.vmem_to_hbm [thread:$0]  %s3069_s30, 128, %s3071_s19, [#allocation24]  }
0x1772   :  { %s4478_s18 = smov [#allocation28]   ;;  %s3094_s12 = sshll.u32 %s4619_s14, 4  ;;  %s3095_s12 = int_to_ptr.hbm [resolvable:$true] %s3094_s12 }
0x1773   :  { %s3092_s22 = sshll.u32 %s4478_s18, 4  ;;  %s4343_s13 = sshra.s32 %s3095_s12, 4  ;;  %s3093_s22 = int_to_ptr.vmem [resolvable:$true] %s3092_s22  ;;  %s4344_s13 = int_to_ptr.hbm [resolvable:$true] %s4343_s13 }
0x1774   :  { %s4345_s0 = scalar_lea.hbm %s4344_s13, 8  ;;  %s4347_s23 = scalar_lea.hbm %s4619_s14, 8 }
0x1775   :  { %p4346_p1 = scmp.ne.s32.totalorder %s4344_s13, %s4345_s0  ;;  %p4348_p2 = scmp.lt.s32.totalorder %s4344_s13, %s4619_s14 }
0x1776   :  { %p4349_p3 = scmp.lt.s32.totalorder %s4347_s23, %s4345_s0 }
0x1778   :  { %p4350_p4 = por %p4349_p3, %p4348_p2 }
0x177a   :  { %p4351_p5 = pnand %p4350_p4, %p4346_p1 }
0x177c   :  { %4354 = shalt.err (!%p4351_p5)
}
0x177d   :  { %3097 = dma.vmem_to_hbm [thread:$0]  %s3093_s22, 128, %s3095_s12, [#allocation27]  }
0x177e   :  { %s3116_s28 = sshll.u32 %s4629_s3, 4  ;;  %s4479_s27 = smov [#allocation31]   ;;  %s3117_s28 = int_to_ptr.hbm [resolvable:$true] %s3116_s28 }
0x177f   :  { %s3114_s8 = sshll.u32 %s4479_s27, 4  ;;  %s4367_s24 = sshra.s32 %s3117_s28, 4  ;;  %s3115_s8 = int_to_ptr.vmem [resolvable:$true] %s3114_s8  ;;  %s4368_s24 = int_to_ptr.hbm [resolvable:$true] %s4367_s24 }
0x1780   :  { %s4369_s17 = scalar_lea.hbm %s4368_s24, 8  ;;  %s4371_s25 = scalar_lea.hbm %s4629_s3, 8 }
0x1781   :  { %p4370_p6 = scmp.ne.s32.totalorder %s4368_s24, %s4369_s17  ;;  %p4372_p7 = scmp.lt.s32.totalorder %s4368_s24, %s4629_s3 }
0x1782   :  { %p4373_p8 = scmp.lt.s32.totalorder %s4371_s25, %s4369_s17 }
0x1784   :  { %p4374_p9 = por %p4373_p8, %p4372_p7 }
0x1786   :  { %p4375_p10 = pnand %p4374_p9, %p4370_p6 }
0x1788   :  { %4378 = shalt.err (!%p4375_p10)
}
0x1789   :  { %3119 = dma.vmem_to_hbm [thread:$0]  %s3115_s8, 128, %s3117_s28, [#allocation30]   ;;  %v2943_v63 = vpop.f32.mrf.mxu0  ;;  %v2868_v58 = vpop.f32.mrf.mxu2 }
0x178a   :  { %v2946_v59 = vpop.f32.mrf.mxu1  ;;  %s4480_s3 = smov [#allocation32]   ;;  %s3127_s6 = sshll.u32 %s4634_s4, 4  ;;  %s3128_s6 = int_to_ptr.hbm [resolvable:$true] %s3127_s6 }
0x178b   :  { %s3125_s14 = sshll.u32 %s4480_s3, 4  ;;  %s4391_s11 = sshra.s32 %s3128_s6, 4  ;;  %s3126_s14 = int_to_ptr.vmem [resolvable:$true] %s3125_s14  ;;  %s4392_s11 = int_to_ptr.hbm [resolvable:$true] %s4391_s11 }
0x178c   :  { %s4393_s7 = scalar_lea.hbm %s4392_s11, 1  ;;  %s4395_s29 = scalar_lea.hbm %s4634_s4, 1 }
0x178d   :  { %p4394_p11 = scmp.ne.s32.totalorder %s4392_s11, %s4393_s7  ;;  %p4396_p12 = scmp.lt.s32.totalorder %s4392_s11, %s4634_s4 }
0x178e   :  { %p4397_p13 = scmp.lt.s32.totalorder %s4395_s29, %s4393_s7 }
0x1790   :  { %p4398_p0 = por %p4397_p13, %p4396_p12 }
0x1791   :  { %v2944_v40 = vpop.f32.mrf.mxu0  ;;  %v2869_v26 = vpop.f32.mrf.mxu2 }
0x1792   :  { %v2947_v61 = vpop.f32.mrf.mxu1  ;;  %p4399_p1 = pnand %p4398_p0, %p4394_p11 }
0x1799   :  { %v2871_v60 = vpop.f32.mrf.mxu2 }
0x179a   :  { %v2949_v20 = vpop.f32.mrf.mxu1 }
0x17a1   :  { %v2872_v4 = vpop.f32.mrf.mxu2 }
0x17a2   :  { %v2950_v31 = vpop.f32.mrf.mxu1  ;;  %v3001_v53 = vpop.xlane.xlu2 %3000 }
0x17a3   :  { %v3006_v55 = vmul.f32 %v3001_v53, %v3001_v53 }
0x17a4   :  { %v3005_v9 = vpop.xlane.xlu1 %3004 }
0x17a5   :  { %v3007_v52 = vsub.f32 %v3005_v9, %v3006_v55 }
0x17a7   :  { %v3008_v15 = vand.u32 2147483647, %v3007_v52 }
0x17a9   :  { %v2874_v0 = vpop.f32.mrf.mxu2  ;;  %v3009_v17 = vmax.f32 %v3008_v15, 1e-08 }
0x17aa   :  { %v2952_v62 = vpop.f32.mrf.mxu1 }
0x17ab   :  { %3917 = vrsqrt.f32 %v3009_v17  ;;  %vm3017_vm12 = vcmp.eq.f32.partialorder %v3009_v17, inf  ;;  %v3020_v54 = vand.u32 2147483648, %v3009_v17  ;;  %vm3019_vm11 = vcmp.eq.f32.partialorder %v3009_v17, 0.0 }
0x17b1   :  { %v2875_v51 = vpop.f32.mrf.mxu2  ;;  %v3918_v38 = vpop.eup %3917 }
0x17b2   :  { %v2953_v1 = vpop.f32.mrf.mxu1  ;;  %v3011_v33 = vmul.f32 %v3918_v38, %v3009_v17 }
0x17b4   :  { %v3012_v21 = vmul.f32 %v3918_v38, %v3011_v33 }
0x17b6   :  { %v3013_v11 = vmul.f32 0.5, %v3012_v21 }
0x17b8   :  { %v3014_v43 = vsub.f32 1.5, %v3013_v11 }
0x17b9   :  { %v2877_v23 = vpop.f32.mrf.mxu2 }
0x17ba   :  { %v2955_v3 = vpop.f32.mrf.mxu1  ;;  %v3015_v13 = vmul.f32 %v3918_v38, %v3014_v43 }
0x17bc   :  { %v3016_v22 = vmul.f32 %v3015_v13, %v3009_v17 }
0x17be   :  { %v3018_v25 = vsel %vm3017_vm12, %v3009_v17, %v3016_v22 }
0x17bf   :  { %v3021_v35 = vsel %vm3019_vm11, %v3020_v54, %v3018_v25 }
0x17c0   :  { %3919 = vrcp.f32 %v3021_v35  ;;  %v3033_v32 = vand.u32 2147483648, %v3021_v35  ;;  %v3031_v30 = vand.u32 2147483647, %v3021_v35  ;;  %vm3027_vm3 = vweird.f32 %v3021_v35 }
0x17c1   :  { %v2878_v57 = vpop.f32.mrf.mxu2 }
0x17c2   :  { %v2956_v7 = vpop.f32.mrf.mxu1  ;;  %v3034_v27 = vor.u32 1.1754944e-38, %v3033_v32  ;;  %vm3032_vm6 = vcmp.eq.f32.partialorder %v3031_v30, 8.507059e+37 }
0x17c6   :  { %v3920_v19 = vpop.eup %3919 }
0x17c7   :  { %v3023_v49 = vmul.f32 %v3920_v19, %v3021_v35  ;;  %vm3028_vm1 = vweird.f32 %v3920_v19 }
0x17c8   :  { %vm3029_vm5 = vmor %vm3027_vm3, %vm3028_vm1 }
0x17c9   :  { %v2880_v6 = vpop.f32.mrf.mxu2  ;;  %v3024_v29 = vsub.f32 1.0, %v3023_v49 }
0x17ca   :  { %v2958_v10 = vpop.f32.mrf.mxu1 }
0x17cb   :  { %v3025_v12 = vmul.f32 %v3920_v19, %v3024_v29 }
0x17cd   :  { %v3026_v36 = vadd.f32 %v3920_v19, %v3025_v12 }
0x17cf   :  { %v3030_v37 = vsel %vm3029_vm5, %v3920_v19, %v3026_v36 }
0x17d0   :  { %v3035_v5 = vsel %vm3032_vm6, %v3034_v27, %v3030_v37 }
0x17d1   :  { %v2881_v8 = vpop.f32.mrf.mxu2  ;;  %v3037_v24 = vmul.f32 %v3035_v5, %v5377_v56 }
0x17d2   :  { %v2959_v34 = vpop.f32.mrf.mxu1 }
0x17d3   :  { %3038 = vst [vmem:[#allocation32] sm:$0x1] %v3037_v24 }
0x17d9   :  { %v2883_v2 = vpop.f32.mrf.mxu2 }
0x17e1   :  { %v2884_v18 = vpop.f32.mrf.mxu2 }
0x17e2   :  { %4402 = shalt.err (!%p4399_p1)
}
0x17e3   :  { %3130 = dma.vmem_to_hbm [thread:$0]  %s3126_s14, 16, %s3128_s6, [#allocation33]  }
0x17e4   :  { %4417 = dma.done.wait [#allocation4], 256  }
0x17e5   :  { %4418 = vsyncadd [#allocation4], 4294967040 }
0x17e6   :  { %4419 = dma.done.wait [#allocation24], 256  }
0x17e7   :  { %4420 = vsyncadd [#allocation24], 4294967040 }
0x17e8   :  { %4421 = dma.done.wait [#allocation27], 384  }
0x17e9   :  { %4422 = vsyncadd [#allocation27], 4294966912 }
0x17ea   :  { %4423 = dma.done.wait [#allocation30], 256  }
0x17eb   :  { %4424 = vsyncadd [#allocation30], 4294967040 }
0x17ec   :  { %4425 = dma.done.wait [#allocation33], 16  }
0x17ed   :  { %4426 = vsyncadd [#allocation33], 4294967280 }
0x17ee   :  { %3163 = vsyncpa [#allocation3], 1 }
0x17ef   :  { %3164 = vsyncpa [#allocation6], 1 }
0x17f0   :  { %3165 = vsyncpa [#allocation9], 1 }
0x17f1   :  { %3166 = vsyncpa [#allocation12], 1 }
0x17f2   :  { %3167 = vsyncpa [#allocation15], 1 }
0x17f3   :  { %3168 = vsyncpa [#allocation18], 1 }
0x17f4   :  { %3169 = vsyncpa [#allocation21], 1 }
0x17f5   :  { %3170 = vsyncpa [#allocation4], 1 }
0x17f6   :  { %3171 = vsyncpa [#allocation24], 1 }
0x17f7   :  { %3172 = vsyncpa [#allocation27], 1 }
0x17f8   :  { %3173 = vsyncpa [#allocation30], 1 }
0x17f9   :  { %3174 = vsyncpa [#allocation33], 1 }

</bundles_post_ra>
